<compile_context>
chip_gen: v6e
topology: v6e:2x2x1
jax: 0.10.0
libtpu: 0.0.40
codegen_flags: <defaults>
</compile_context>

<pallas_src>
import functools

import jax
import jax.numpy as jnp
import numpy as np
from jax.experimental import pallas as pl
from jax.experimental.pallas import tpu as pltpu

EPS = 1e-5  # PyTorch BatchNorm2d default eps


def _round_up(x, m):
    return ((x + m - 1) // m) * m


def _bn_fold(bias, gamma, beta, mean, var):
    # conv(x) + bias, then eval-mode BN  ==  conv(x) * scale + shift
    scale = gamma / jnp.sqrt(var + EPS)
    shift = (bias - mean) * scale + beta
    return scale.astype(jnp.float32), shift.astype(jnp.float32)


def _pack_conv_weights(w_hwio, f):
    """(3, 3, Cin, Cout) HWIO -> (WA, WB), each (3, f*Cin, f*Cout).

    Column packing: lane block u of the A operand holds input column f*t + u, lane
    block u of the B operand holds column f*(t+1) + u, output lane block s produces
    conv column f*t + s:
        WA[dy][u, s] = W[dy, u - s]      if 0 <= u - s     <= 2 else 0
        WB[dy][u, s] = W[dy, u + f - s]  if 0 <= u + f - s <= 2 else 0
    """
    taps = [w_hwio[:, dx] for dx in range(3)]          # (3, Cin, Cout) each, dy-major
    zero = jnp.zeros_like(taps[0])

    def blk(dx):
        return taps[dx] if 0 <= dx <= 2 else zero

    wa = jnp.concatenate(
        [jnp.concatenate([blk(u - s) for s in range(f)], axis=-1) for u in range(f)],
        axis=1)
    wb = jnp.concatenate(
        [jnp.concatenate([blk(u + f - s) for s in range(f)], axis=-1) for u in range(f)],
        axis=1)
    return wa, wb


# ----------------------------- in-kernel building blocks -----------------------------

def _packed_conv_pool(xq, wa, wb, scale, shift, *, p_out, wq, cout, f, tp):
    """Column-packed 3x3 conv (pad=0) + BN affine + ReLU + fused 2x2 max-pool.

    xq:          (rows, f*cin) flat packed input, xq[h*wq + t, u*cin + c] = x[h, f*t+u, c]
    wa, wb:      (3, f*cin, f*cout) packed weights (B operand = packed column t+1)
    scale/shift: (1, f*cout) folded BatchNorm affine
    Returns (p_out, wq, (f//2)*cout) pooled output (f32).  Packed columns beyond the
    valid range hold harmless junk that downstream consumers never read.
    """
    k = xq.shape[-1]
    # One row-shifted copy so every tap slice below starts at an 8-aligned sublane
    # offset (wq is a multiple of 8).  Its appended last row is only ever read for a
    # junk output column.
    xqb = jnp.concatenate([xq[1:], jnp.zeros((1, k), xq.dtype)], axis=0)
    g = f // 2
    chunks = []
    for r0 in range(0, p_out, tp):                     # row-tiled accumulation
        rows = min(r0 + tp, p_out) - r0
        mm = 2 * rows * wq
        base = 2 * r0 * wq
        acc = jnp.zeros((mm, f * cout), jnp.float32)
        for dy in range(3):
            lo = base + dy * wq                        # 8-aligned
            acc = acc + jnp.dot(xq[lo:lo + mm], wa[dy],
                                preferred_element_type=jnp.float32)
            acc = acc + jnp.dot(xqb[lo:lo + mm], wb[dy],
                                preferred_element_type=jnp.float32)
        y = jnp.maximum(acc * scale + shift, 0.0).reshape(rows, 2 * wq, f * cout)
        yh = jnp.maximum(y[:, :wq, :], y[:, wq:, :])   # H-pool (conv rows 2p / 2p+1)
        pooled = [jnp.maximum(yh[..., (2 * j) * cout:(2 * j + 1) * cout],
                              yh[..., (2 * j + 1) * cout:(2 * j + 2) * cout])
                  for j in range(g)]                   # W-pool (adjacent lane blocks)
        chunks.append(pooled[0] if g == 1 else jnp.concatenate(pooled, axis=-1))
    return chunks[0] if len(chunks) == 1 else jnp.concatenate(chunks, axis=0)


def _zero_pad_flat(x, q, wp):
    """(p, >=q, c) -> ((p+3)*wp, c) bf16 flat buffer with a 1-pixel zero border plus
    zero guard rows/columns, ready for flat shifted-window 3x3 conv taps."""
    p, _, c = x.shape
    interior = x[:, :q, :].astype(jnp.bfloat16)
    mid = jnp.concatenate(
        [jnp.zeros((p, 1, c), jnp.bfloat16), interior,
         jnp.zeros((p, wp - q - 1, c), jnp.bfloat16)], axis=1)      # (p, wp, c)
    full = jnp.concatenate(
        [jnp.zeros((1, wp, c), jnp.bfloat16), mid,
         jnp.zeros((2, wp, c), jnp.bfloat16)], axis=0)              # (p + 3, wp, c)
    return full.reshape((p + 3) * wp, c)


def _conv3x3_bn_relu(xflat, w9, scale, shift, h_out, wp):
    """Plain 3x3 conv (+BN affine +ReLU) over a flattened zero-padded buffer."""
    cout = w9.shape[-1]
    mm = h_out * wp
    acc = jnp.zeros((mm, cout), jnp.float32)
    # TODO(synk): could use the same column packing as layers 1/2 (K=N=128, 6 taps)
    # at the cost of re-pairing columns across the pad=1 border.
    for dy in range(3):
        for dx in range(3):
            lo = dy * wp + dx
            acc = acc + jnp.dot(xflat[lo:lo + mm], w9[dy * 3 + dx],
                                preferred_element_type=jnp.float32)
    y = jnp.maximum(acc * scale + shift, 0.0)
    return y.reshape(h_out, wp, cout)                  # valid columns are [0, w_out)


# ----------------------------- the fused 4-layer kernel ------------------------------

def _cnn4_kernel(xq1_ref, wa1_ref, wb1_ref, sc1_ref, sh1_ref,
                 wa2_ref, wb2_ref, sc2_ref, sh2_ref,
                 w3_ref, sc3_ref, sh3_ref,
                 w4_ref, sc4_ref, sh4_ref,
                 o_ref, *, p2, q2, wq, p1n, cout, tp):
    # ---- layer 1: quad-packed conv+BN+ReLU+pool.  Output (p1n, wq, 2*cout) is already
    #      the pair-packed layout layer 2 consumes (lane block u = pooled column 2t+u).
    pool1 = _packed_conv_pool(
        xq1_ref[0], wa1_ref[...], wb1_ref[...], sc1_ref[...], sh1_ref[...],
        p_out=p1n, wq=wq, cout=cout, f=4, tp=tp)
    # ---- layer 2: pair-packed conv+BN+ReLU+pool -> plain pooled (p2, wq, cout).
    xq2 = pool1.reshape(p1n * wq, 2 * cout).astype(jnp.bfloat16)
    pool2 = _packed_conv_pool(
        xq2, wa2_ref[...], wb2_ref[...], sc2_ref[...], sh2_ref[...],
        p_out=p2, wq=wq, cout=cout, f=2, tp=tp)
    # ---- layer 3: 3x3 conv (pad=1) + BN + ReLU.  (Dropout2d is identity in eval mode.)
    x3 = _zero_pad_flat(pool2, q2, wq)
    y3 = _conv3x3_bn_relu(x3, w3_ref[...], sc3_ref[...], sh3_ref[...], p2, wq)
    # ---- layer 4: 3x3 conv (pad=1) + BN + ReLU.
    x4 = _zero_pad_flat(y3, q2, wq)
    y4 = _conv3x3_bn_relu(x4, w4_ref[...], sc4_ref[...], sh4_ref[...], p2, wq)
    o_ref[0] = y4[:, :q2, :].astype(o_ref.dtype)


# ----------------------------- wrapper -----------------------------------------------

def _prep_pool_layer(layer_params, f, cin_pad):
    w, b, gamma, beta, mean, var = layer_params
    cin, cout = w.shape[2], w.shape[3]
    if cin_pad != cin:
        w = jnp.pad(w, ((0, 0), (0, 0), (0, cin_pad - cin), (0, 0)))
    wa, wb = _pack_conv_weights(w, f)
    scale, shift = _bn_fold(b, gamma, beta, mean, var)
    return (wa.astype(jnp.bfloat16), wb.astype(jnp.bfloat16),
            jnp.tile(scale, f).reshape(1, f * cout),
            jnp.tile(shift, f).reshape(1, f * cout))


def _prep_plain_layer(layer_params):
    w, b, gamma, beta, mean, var = layer_params
    cin, cout = w.shape[2], w.shape[3]
    w9 = w.reshape(9, cin, cout).astype(jnp.bfloat16)
    scale, shift = _bn_fold(b, gamma, beta, mean, var)
    return w9, scale.reshape(1, cout), shift.reshape(1, cout)


@jax.jit
def cnn_encoder_forward(x_nchw, params):
    n, cin, hh, ww = x_nchw.shape
    h1, w1 = hh - 2, ww - 2
    p1, q1 = h1 // 2, w1 // 2              # after layer-1 pool
    h2, w2 = p1 - 2, q1 - 2
    p2, q2 = h2 // 2, w2 // 2              # after layer-2 pool == layers 3/4 spatial dims
    assert p2 >= 1 and q2 >= 1, "input too small for the conv4 backbone"

    cout = 64
    cin_pad = _round_up(cin, 8)
    wq = _round_up(q2 + 2, 8)              # packed width (quad L1 / pair L2), padded width L3/L4
    p1n = 2 * p2 + 2                       # layer-1 pooled rows actually consumed by layer 2
    h_need = 4 * p2 + 6                    # input rows actually consumed by layer 1
    tp = max(1, 256 // (2 * wq))           # pooled-row chunk -> ~256-row f32 accumulator tiles

    # Static documentation of the in-kernel slice upper bounds (all reads stay inside
    # explicitly constructed data; junk columns are never consumed by valid outputs).
    assert h_need <= hh and h_need == 2 * p1n + 2
    assert 4 * q2 + 5 <= ww - 1
    assert 2 * p2 + 1 <= p1 - 1 and 2 * q2 + 1 <= q1 - 1

    # ---- wrapper-side input packing (single layout pass; everything else stays in VMEM)
    x = jnp.transpose(x_nchw, (0, 2, 3, 1))[:, :h_need]    # NCHW -> NHWC, crop unused rows
    wcap = 4 * wq
    if ww >= wcap:
        x = x[:, :, :wcap, :]
    else:
        x = jnp.pad(x, ((0, 0), (0, 0), (0, wcap - ww), (0, 0)))
    if cin_pad != cin:
        x = jnp.pad(x, ((0, 0), (0, 0), (0, 0), (0, cin_pad - cin)))
    xq1 = x.reshape(n, h_need * wq, 4 * cin_pad).astype(jnp.bfloat16)

    wa1, wb1, sc1, sh1 = _prep_pool_layer(params[0], 4, cin_pad)
    wa2, wb2, sc2, sh2 = _prep_pool_layer(params[1], 2, cout)
    w3, sc3, sh3 = _prep_plain_layer(params[2])
    w4, sc4, sh4 = _prep_plain_layer(params[3])

    kernel = functools.partial(_cnn4_kernel, p2=p2, q2=q2, wq=wq, p1n=p1n,
                               cout=cout, tp=tp)
    const3 = lambda i: (0, 0, 0)
    const2 = lambda i: (0, 0)
    out = pl.pallas_call(
        kernel,
        out_shape=jax.ShapeDtypeStruct((n, p2, q2, cout), jnp.float32),
        grid=(n,),
        in_specs=[
            pl.BlockSpec((1, h_need * wq, 4 * cin_pad), lambda i: (i, 0, 0)),
            pl.BlockSpec((3, 4 * cin_pad, 4 * cout), const3),
            pl.BlockSpec((3, 4 * cin_pad, 4 * cout), const3),
            pl.BlockSpec((1, 4 * cout), const2),
            pl.BlockSpec((1, 4 * cout), const2),
            pl.BlockSpec((3, 2 * cout, 2 * cout), const3),
            pl.BlockSpec((3, 2 * cout, 2 * cout), const3),
            pl.BlockSpec((1, 2 * cout), const2),
            pl.BlockSpec((1, 2 * cout), const2),
            pl.BlockSpec((9, cout, cout), const3),
            pl.BlockSpec((1, cout), const2),
            pl.BlockSpec((1, cout), const2),
            pl.BlockSpec((9, cout, cout), const3),
            pl.BlockSpec((1, cout), const2),
            pl.BlockSpec((1, cout), const2),
        ],
        out_specs=pl.BlockSpec((1, p2, q2, cout), lambda i: (i, 0, 0, 0)),
        compiler_params=pltpu.CompilerParams(
            dimension_semantics=("parallel",),
            vmem_limit_bytes=32 * 1024 * 1024),
    )(xq1, wa1, wb1, sc1, sh1, wa2, wb2, sc2, sh2, w3, sc3, sh3, w4, sc4, sh4)

    return jnp.transpose(out, (0, 3, 1, 2))                # NHWC -> NCHW, float32


# ----------------------------- params & pure-JAX reference ---------------------------

def init_params(key):
    """Deterministic synthetic parameters matching the module's shapes (HWIO weights)."""
    specs = [(3, 64), (64, 64), (64, 64), (64, 64)]
    params = []
    for i, (cin, cout) in enumerate(specs):
        ks = jax.random.split(jax.random.fold_in(key, i), 6)
        w = 0.05 * jax.random.normal(ks[0], (3, 3, cin, cout), jnp.float32)
        b = 0.05 * jax.random.normal(ks[1], (cout,), jnp.float32)
        gamma = 1.0 + 0.1 * jax.random.normal(ks[2], (cout,), jnp.float32)
        beta = 0.1 * jax.random.normal(ks[3], (cout,), jnp.float32)
        mean = 0.1 * jax.random.normal(ks[4], (cout,), jnp.float32)
        var = 1.0 + 0.1 * jnp.abs(jax.random.normal(ks[5], (cout,), jnp.float32))
        params.append((w, b, gamma, beta, mean, var))
    return params


def reference_forward(x_nchw, params):
    def block(x, w, b, gamma, beta, mean, var, pad):
        y = jax.lax.conv_general_dilated(
            x, jnp.transpose(w, (3, 2, 0, 1)),            # HWIO -> OIHW
            window_strides=(1, 1), padding=[(pad, pad), (pad, pad)],
            dimension_numbers=('NCHW', 'OIHW', 'NCHW'))
        y = y + b[None, :, None, None]
        y = (y - mean[None, :, None, None]) * jax.lax.rsqrt(var + EPS)[None, :, None, None]
        y = gamma[None, :, None, None] * y + beta[None, :, None, None]
        return jnp.maximum(y, 0.0)

    def pool(x):
        return jax.lax.reduce_window(x, -jnp.inf, jax.lax.max,
                                     (1, 1, 2, 2), (1, 1, 2, 2), 'VALID')

    h = pool(block(x_nchw, *params[0], 0))
    h = pool(block(h, *params[1], 0))
    h = block(h, *params[2], 1)
    h = block(h, *params[3], 1)
    return h


# ----------------------------- main ---------------------------------------------------

if __name__ == "__main__":
    key = jax.random.PRNGKey(0)
    params = init_params(jax.random.fold_in(key, 1))
    # Small NCHW input consistent with the module (original is (B, 3, 84, 84)).
    x = jax.random.normal(jax.random.fold_in(key, 2), (2, 3, 20, 20), jnp.float32)

    out = cnn_encoder_forward(x, params)
    out = jax.block_until_ready(out)

    ref = reference_forward(x, params)
    assert out.shape == ref.shape == (2, 64, 3, 3), (out.shape, ref.shape)
    # bf16 MXU operands -> loose-but-bug-catching tolerance.
    np.testing.assert_allclose(np.asarray(out), np.asarray(ref), rtol=5e-2, atol=5e-2)

    print("KERNEL_OK")
</pallas_src>

<mosaic_0001>
module attributes {stable_mosaic.version = 11 : i64} {
  func.func @_cnn4_kernel(%arg0: i32, %arg1: memref<1x144x32xbf16, #tpu.memory_space<vmem>>, %arg2: memref<3x32x256xbf16, #tpu.memory_space<vmem>>, %arg3: memref<3x32x256xbf16, #tpu.memory_space<vmem>>, %arg4: memref<1x256xf32, #tpu.memory_space<vmem>>, %arg5: memref<1x256xf32, #tpu.memory_space<vmem>>, %arg6: memref<3x128x128xbf16, #tpu.memory_space<vmem>>, %arg7: memref<3x128x128xbf16, #tpu.memory_space<vmem>>, %arg8: memref<1x128xf32, #tpu.memory_space<vmem>>, %arg9: memref<1x128xf32, #tpu.memory_space<vmem>>, %arg10: memref<9x64x64xbf16, #tpu.memory_space<vmem>>, %arg11: memref<1x64xf32, #tpu.memory_space<vmem>>, %arg12: memref<1x64xf32, #tpu.memory_space<vmem>>, %arg13: memref<9x64x64xbf16, #tpu.memory_space<vmem>>, %arg14: memref<1x64xf32, #tpu.memory_space<vmem>>, %arg15: memref<1x64xf32, #tpu.memory_space<vmem>>, %arg16: memref<1x3x3x64xf32, #tpu.memory_space<vmem>>) attributes {dimension_semantics = [#tpu.dimension_semantics<parallel>], iteration_bounds = array<i64: 2>, scalar_prefetch = 0 : i64, scratch_operands = 0 : i64, tpu.core_type = #tpu.core_type<tc>, window_params = [{transform_indices = @transform_0, window_bounds = array<i64: 1, 144, 32>}, {pipeline_mode = #tpu.pipeline_mode<synchronous>, transform_indices = @transform_1, window_bounds = array<i64: 3, 32, 256>}, {pipeline_mode = #tpu.pipeline_mode<synchronous>, transform_indices = @transform_2, window_bounds = array<i64: 3, 32, 256>}, {pipeline_mode = #tpu.pipeline_mode<synchronous>, transform_indices = @transform_3, window_bounds = array<i64: 1, 256>}, {pipeline_mode = #tpu.pipeline_mode<synchronous>, transform_indices = @transform_4, window_bounds = array<i64: 1, 256>}, {pipeline_mode = #tpu.pipeline_mode<synchronous>, transform_indices = @transform_5, window_bounds = array<i64: 3, 128, 128>}, {pipeline_mode = #tpu.pipeline_mode<synchronous>, transform_indices = @transform_6, window_bounds = array<i64: 3, 128, 128>}, {pipeline_mode = #tpu.pipeline_mode<synchronous>, transform_indices = @transform_7, window_bounds = array<i64: 1, 128>}, {pipeline_mode = #tpu.pipeline_mode<synchronous>, transform_indices = @transform_8, window_bounds = array<i64: 1, 128>}, {pipeline_mode = #tpu.pipeline_mode<synchronous>, transform_indices = @transform_9, window_bounds = array<i64: 9, 64, 64>}, {pipeline_mode = #tpu.pipeline_mode<synchronous>, transform_indices = @transform_10, window_bounds = array<i64: 1, 64>}, {pipeline_mode = #tpu.pipeline_mode<synchronous>, transform_indices = @transform_11, window_bounds = array<i64: 1, 64>}, {pipeline_mode = #tpu.pipeline_mode<synchronous>, transform_indices = @transform_12, window_bounds = array<i64: 9, 64, 64>}, {pipeline_mode = #tpu.pipeline_mode<synchronous>, transform_indices = @transform_13, window_bounds = array<i64: 1, 64>}, {pipeline_mode = #tpu.pipeline_mode<synchronous>, transform_indices = @transform_14, window_bounds = array<i64: 1, 64>}, {transform_indices = @transform_15, window_bounds = array<i64: 1, 3, 3, 64>}]} {
    %c0 = arith.constant 0 : index
    %c0_0 = arith.constant 0 : index
    %c0_1 = arith.constant 0 : index
    %0 = vector.load %arg1[%c0, %c0_0, %c0_1] : memref<1x144x32xbf16, #tpu.memory_space<vmem>>, vector<1x144x32xbf16>
    %1 = vector.shape_cast %0 : vector<1x144x32xbf16> to vector<144x32xbf16>
    %c0_2 = arith.constant 0 : index
    %c0_3 = arith.constant 0 : index
    %c0_4 = arith.constant 0 : index
    %2 = vector.load %arg2[%c0_2, %c0_3, %c0_4] : memref<3x32x256xbf16, #tpu.memory_space<vmem>>, vector<3x32x256xbf16>
    %c0_5 = arith.constant 0 : index
    %c0_6 = arith.constant 0 : index
    %c0_7 = arith.constant 0 : index
    %3 = vector.load %arg3[%c0_5, %c0_6, %c0_7] : memref<3x32x256xbf16, #tpu.memory_space<vmem>>, vector<3x32x256xbf16>
    %c0_8 = arith.constant 0 : index
    %c0_9 = arith.constant 0 : index
    %4 = vector.load %arg4[%c0_8, %c0_9] : memref<1x256xf32, #tpu.memory_space<vmem>>, vector<1x256xf32>
    %c0_10 = arith.constant 0 : index
    %c0_11 = arith.constant 0 : index
    %5 = vector.load %arg5[%c0_10, %c0_11] : memref<1x256xf32, #tpu.memory_space<vmem>>, vector<1x256xf32>
    %6 = vector.extract_strided_slice %1 {offsets = [1, 0], sizes = [143, 32], strides = [1, 1]} : vector<144x32xbf16> to vector<143x32xbf16>
    %cst = arith.constant 0.000000e+00 : bf16
    %7 = vector.broadcast %cst : bf16 to vector<1x32xbf16>
    %8 = tpu.concatenate %6, %7 in 0 : vector<143x32xbf16>, vector<1x32xbf16> -> vector<144x32xbf16>
    %cst_12 = arith.constant 0.000000e+00 : f32
    %9 = vector.broadcast %cst_12 : f32 to vector<128x256xf32>
    %10 = vector.extract_strided_slice %1 {offsets = [0, 0], sizes = [128, 32], strides = [1, 1]} : vector<144x32xbf16> to vector<128x32xbf16>
    %11 = vector.extract_strided_slice %2 {offsets = [0, 0, 0], sizes = [1, 32, 256], strides = [1, 1, 1]} : vector<3x32x256xbf16> to vector<1x32x256xbf16>
    %12 = vector.shape_cast %11 : vector<1x32x256xbf16> to vector<32x256xbf16>
    %cst_13 = arith.constant dense<0.000000e+00> : vector<128x256xf32>
    %13 = tpu.matmul %10, %12, %cst_13 {dimension_numbers = #tpu.dot_dimension_numbers<[1], [0], [0], [1], [0, 0, 1, 1], [], []>} : vector<128x32xbf16>, vector<32x256xbf16>, vector<128x256xf32> -> vector<128x256xf32>
    %14 = arith.addf %9, %13 : vector<128x256xf32>
    %15 = vector.extract_strided_slice %8 {offsets = [0, 0], sizes = [128, 32], strides = [1, 1]} : vector<144x32xbf16> to vector<128x32xbf16>
    %16 = vector.extract_strided_slice %3 {offsets = [0, 0, 0], sizes = [1, 32, 256], strides = [1, 1, 1]} : vector<3x32x256xbf16> to vector<1x32x256xbf16>
    %17 = vector.shape_cast %16 : vector<1x32x256xbf16> to vector<32x256xbf16>
    %cst_14 = arith.constant dense<0.000000e+00> : vector<128x256xf32>
    %18 = tpu.matmul %15, %17, %cst_14 {dimension_numbers = #tpu.dot_dimension_numbers<[1], [0], [0], [1], [0, 0, 1, 1], [], []>} : vector<128x32xbf16>, vector<32x256xbf16>, vector<128x256xf32> -> vector<128x256xf32>
    %19 = arith.addf %14, %18 : vector<128x256xf32>
    %20 = vector.extract_strided_slice %1 {offsets = [8, 0], sizes = [128, 32], strides = [1, 1]} : vector<144x32xbf16> to vector<128x32xbf16>
    %21 = vector.extract_strided_slice %2 {offsets = [1, 0, 0], sizes = [1, 32, 256], strides = [1, 1, 1]} : vector<3x32x256xbf16> to vector<1x32x256xbf16>
    %22 = vector.shape_cast %21 : vector<1x32x256xbf16> to vector<32x256xbf16>
    %cst_15 = arith.constant dense<0.000000e+00> : vector<128x256xf32>
    %23 = tpu.matmul %20, %22, %cst_15 {dimension_numbers = #tpu.dot_dimension_numbers<[1], [0], [0], [1], [0, 0, 1, 1], [], []>} : vector<128x32xbf16>, vector<32x256xbf16>, vector<128x256xf32> -> vector<128x256xf32>
    %24 = arith.addf %19, %23 : vector<128x256xf32>
    %25 = vector.extract_strided_slice %8 {offsets = [8, 0], sizes = [128, 32], strides = [1, 1]} : vector<144x32xbf16> to vector<128x32xbf16>
    %26 = vector.extract_strided_slice %3 {offsets = [1, 0, 0], sizes = [1, 32, 256], strides = [1, 1, 1]} : vector<3x32x256xbf16> to vector<1x32x256xbf16>
    %27 = vector.shape_cast %26 : vector<1x32x256xbf16> to vector<32x256xbf16>
    %cst_16 = arith.constant dense<0.000000e+00> : vector<128x256xf32>
    %28 = tpu.matmul %25, %27, %cst_16 {dimension_numbers = #tpu.dot_dimension_numbers<[1], [0], [0], [1], [0, 0, 1, 1], [], []>} : vector<128x32xbf16>, vector<32x256xbf16>, vector<128x256xf32> -> vector<128x256xf32>
    %29 = arith.addf %24, %28 : vector<128x256xf32>
    %30 = vector.extract_strided_slice %1 {offsets = [16, 0], sizes = [128, 32], strides = [1, 1]} : vector<144x32xbf16> to vector<128x32xbf16>
    %31 = vector.extract_strided_slice %2 {offsets = [2, 0, 0], sizes = [1, 32, 256], strides = [1, 1, 1]} : vector<3x32x256xbf16> to vector<1x32x256xbf16>
    %32 = vector.shape_cast %31 : vector<1x32x256xbf16> to vector<32x256xbf16>
    %cst_17 = arith.constant dense<0.000000e+00> : vector<128x256xf32>
    %33 = tpu.matmul %30, %32, %cst_17 {dimension_numbers = #tpu.dot_dimension_numbers<[1], [0], [0], [1], [0, 0, 1, 1], [], []>} : vector<128x32xbf16>, vector<32x256xbf16>, vector<128x256xf32> -> vector<128x256xf32>
    %34 = arith.addf %29, %33 : vector<128x256xf32>
    %35 = vector.extract_strided_slice %8 {offsets = [16, 0], sizes = [128, 32], strides = [1, 1]} : vector<144x32xbf16> to vector<128x32xbf16>
    %36 = vector.extract_strided_slice %3 {offsets = [2, 0, 0], sizes = [1, 32, 256], strides = [1, 1, 1]} : vector<3x32x256xbf16> to vector<1x32x256xbf16>
    %37 = vector.shape_cast %36 : vector<1x32x256xbf16> to vector<32x256xbf16>
    %cst_18 = arith.constant dense<0.000000e+00> : vector<128x256xf32>
    %38 = tpu.matmul %35, %37, %cst_18 {dimension_numbers = #tpu.dot_dimension_numbers<[1], [0], [0], [1], [0, 0, 1, 1], [], []>} : vector<128x32xbf16>, vector<32x256xbf16>, vector<128x256xf32> -> vector<128x256xf32>
    %39 = arith.addf %34, %38 : vector<128x256xf32>
    %40 = vector.broadcast %4 : vector<1x256xf32> to vector<128x256xf32>
    %41 = arith.mulf %39, %40 : vector<128x256xf32>
    %42 = vector.broadcast %5 : vector<1x256xf32> to vector<128x256xf32>
    %43 = arith.addf %41, %42 : vector<128x256xf32>
    %cst_19 = arith.constant 0.000000e+00 : f32
    %44 = vector.broadcast %cst_19 : f32 to vector<128x256xf32>
    %45 = arith.maximumf %43, %44 : vector<128x256xf32>
    %46 = vector.shape_cast %45 : vector<128x256xf32> to vector<8x16x256xf32>
    %47 = vector.extract_strided_slice %46 {offsets = [0, 0, 0], sizes = [8, 8, 256], strides = [1, 1, 1]} : vector<8x16x256xf32> to vector<8x8x256xf32>
    %48 = vector.extract_strided_slice %46 {offsets = [0, 8, 0], sizes = [8, 8, 256], strides = [1, 1, 1]} : vector<8x16x256xf32> to vector<8x8x256xf32>
    %49 = arith.maximumf %47, %48 : vector<8x8x256xf32>
    %50 = vector.extract_strided_slice %49 {offsets = [0, 0, 0], sizes = [8, 8, 64], strides = [1, 1, 1]} : vector<8x8x256xf32> to vector<8x8x64xf32>
    %51 = vector.extract_strided_slice %49 {offsets = [0, 0, 64], sizes = [8, 8, 64], strides = [1, 1, 1]} : vector<8x8x256xf32> to vector<8x8x64xf32>
    %52 = arith.maximumf %50, %51 : vector<8x8x64xf32>
    %53 = vector.extract_strided_slice %49 {offsets = [0, 0, 128], sizes = [8, 8, 64], strides = [1, 1, 1]} : vector<8x8x256xf32> to vector<8x8x64xf32>
    %54 = vector.extract_strided_slice %49 {offsets = [0, 0, 192], sizes = [8, 8, 64], strides = [1, 1, 1]} : vector<8x8x256xf32> to vector<8x8x64xf32>
    %55 = arith.maximumf %53, %54 : vector<8x8x64xf32>
    %56 = tpu.concatenate %52, %55 in 2 : vector<8x8x64xf32>, vector<8x8x64xf32> -> vector<8x8x128xf32>
    %57 = vector.shape_cast %56 : vector<8x8x128xf32> to vector<64x128xf32>
    %58 = arith.truncf %57 : vector<64x128xf32> to vector<64x128xbf16>
    %c0_20 = arith.constant 0 : index
    %c0_21 = arith.constant 0 : index
    %c0_22 = arith.constant 0 : index
    %59 = vector.load %arg6[%c0_20, %c0_21, %c0_22] : memref<3x128x128xbf16, #tpu.memory_space<vmem>>, vector<3x128x128xbf16>
    %c0_23 = arith.constant 0 : index
    %c0_24 = arith.constant 0 : index
    %c0_25 = arith.constant 0 : index
    %60 = vector.load %arg7[%c0_23, %c0_24, %c0_25] : memref<3x128x128xbf16, #tpu.memory_space<vmem>>, vector<3x128x128xbf16>
    %c0_26 = arith.constant 0 : index
    %c0_27 = arith.constant 0 : index
    %61 = vector.load %arg8[%c0_26, %c0_27] : memref<1x128xf32, #tpu.memory_space<vmem>>, vector<1x128xf32>
    %c0_28 = arith.constant 0 : index
    %c0_29 = arith.constant 0 : index
    %62 = vector.load %arg9[%c0_28, %c0_29] : memref<1x128xf32, #tpu.memory_space<vmem>>, vector<1x128xf32>
    %63 = vector.extract_strided_slice %58 {offsets = [1, 0], sizes = [63, 128], strides = [1, 1]} : vector<64x128xbf16> to vector<63x128xbf16>
    %cst_30 = arith.constant 0.000000e+00 : bf16
    %64 = vector.broadcast %cst_30 : bf16 to vector<1x128xbf16>
    %65 = tpu.concatenate %63, %64 in 0 : vector<63x128xbf16>, vector<1x128xbf16> -> vector<64x128xbf16>
    %cst_31 = arith.constant 0.000000e+00 : f32
    %66 = vector.broadcast %cst_31 : f32 to vector<48x128xf32>
    %67 = vector.extract_strided_slice %58 {offsets = [0, 0], sizes = [48, 128], strides = [1, 1]} : vector<64x128xbf16> to vector<48x128xbf16>
    %68 = vector.extract_strided_slice %59 {offsets = [0, 0, 0], sizes = [1, 128, 128], strides = [1, 1, 1]} : vector<3x128x128xbf16> to vector<1x128x128xbf16>
    %69 = vector.shape_cast %68 : vector<1x128x128xbf16> to vector<128x128xbf16>
    %cst_32 = arith.constant dense<0.000000e+00> : vector<48x128xf32>
    %70 = tpu.matmul %67, %69, %cst_32 {dimension_numbers = #tpu.dot_dimension_numbers<[1], [0], [0], [1], [0, 0, 1, 1], [], []>} : vector<48x128xbf16>, vector<128x128xbf16>, vector<48x128xf32> -> vector<48x128xf32>
    %71 = arith.addf %66, %70 : vector<48x128xf32>
    %72 = vector.extract_strided_slice %65 {offsets = [0, 0], sizes = [48, 128], strides = [1, 1]} : vector<64x128xbf16> to vector<48x128xbf16>
    %73 = vector.extract_strided_slice %60 {offsets = [0, 0, 0], sizes = [1, 128, 128], strides = [1, 1, 1]} : vector<3x128x128xbf16> to vector<1x128x128xbf16>
    %74 = vector.shape_cast %73 : vector<1x128x128xbf16> to vector<128x128xbf16>
    %cst_33 = arith.constant dense<0.000000e+00> : vector<48x128xf32>
    %75 = tpu.matmul %72, %74, %cst_33 {dimension_numbers = #tpu.dot_dimension_numbers<[1], [0], [0], [1], [0, 0, 1, 1], [], []>} : vector<48x128xbf16>, vector<128x128xbf16>, vector<48x128xf32> -> vector<48x128xf32>
    %76 = arith.addf %71, %75 : vector<48x128xf32>
    %77 = vector.extract_strided_slice %58 {offsets = [8, 0], sizes = [48, 128], strides = [1, 1]} : vector<64x128xbf16> to vector<48x128xbf16>
    %78 = vector.extract_strided_slice %59 {offsets = [1, 0, 0], sizes = [1, 128, 128], strides = [1, 1, 1]} : vector<3x128x128xbf16> to vector<1x128x128xbf16>
    %79 = vector.shape_cast %78 : vector<1x128x128xbf16> to vector<128x128xbf16>
    %cst_34 = arith.constant dense<0.000000e+00> : vector<48x128xf32>
    %80 = tpu.matmul %77, %79, %cst_34 {dimension_numbers = #tpu.dot_dimension_numbers<[1], [0], [0], [1], [0, 0, 1, 1], [], []>} : vector<48x128xbf16>, vector<128x128xbf16>, vector<48x128xf32> -> vector<48x128xf32>
    %81 = arith.addf %76, %80 : vector<48x128xf32>
    %82 = vector.extract_strided_slice %65 {offsets = [8, 0], sizes = [48, 128], strides = [1, 1]} : vector<64x128xbf16> to vector<48x128xbf16>
    %83 = vector.extract_strided_slice %60 {offsets = [1, 0, 0], sizes = [1, 128, 128], strides = [1, 1, 1]} : vector<3x128x128xbf16> to vector<1x128x128xbf16>
    %84 = vector.shape_cast %83 : vector<1x128x128xbf16> to vector<128x128xbf16>
    %cst_35 = arith.constant dense<0.000000e+00> : vector<48x128xf32>
    %85 = tpu.matmul %82, %84, %cst_35 {dimension_numbers = #tpu.dot_dimension_numbers<[1], [0], [0], [1], [0, 0, 1, 1], [], []>} : vector<48x128xbf16>, vector<128x128xbf16>, vector<48x128xf32> -> vector<48x128xf32>
    %86 = arith.addf %81, %85 : vector<48x128xf32>
    %87 = vector.extract_strided_slice %58 {offsets = [16, 0], sizes = [48, 128], strides = [1, 1]} : vector<64x128xbf16> to vector<48x128xbf16>
    %88 = vector.extract_strided_slice %59 {offsets = [2, 0, 0], sizes = [1, 128, 128], strides = [1, 1, 1]} : vector<3x128x128xbf16> to vector<1x128x128xbf16>
    %89 = vector.shape_cast %88 : vector<1x128x128xbf16> to vector<128x128xbf16>
    %cst_36 = arith.constant dense<0.000000e+00> : vector<48x128xf32>
    %90 = tpu.matmul %87, %89, %cst_36 {dimension_numbers = #tpu.dot_dimension_numbers<[1], [0], [0], [1], [0, 0, 1, 1], [], []>} : vector<48x128xbf16>, vector<128x128xbf16>, vector<48x128xf32> -> vector<48x128xf32>
    %91 = arith.addf %86, %90 : vector<48x128xf32>
    %92 = vector.extract_strided_slice %65 {offsets = [16, 0], sizes = [48, 128], strides = [1, 1]} : vector<64x128xbf16> to vector<48x128xbf16>
    %93 = vector.extract_strided_slice %60 {offsets = [2, 0, 0], sizes = [1, 128, 128], strides = [1, 1, 1]} : vector<3x128x128xbf16> to vector<1x128x128xbf16>
    %94 = vector.shape_cast %93 : vector<1x128x128xbf16> to vector<128x128xbf16>
    %cst_37 = arith.constant dense<0.000000e+00> : vector<48x128xf32>
    %95 = tpu.matmul %92, %94, %cst_37 {dimension_numbers = #tpu.dot_dimension_numbers<[1], [0], [0], [1], [0, 0, 1, 1], [], []>} : vector<48x128xbf16>, vector<128x128xbf16>, vector<48x128xf32> -> vector<48x128xf32>
    %96 = arith.addf %91, %95 : vector<48x128xf32>
    %97 = vector.broadcast %61 : vector<1x128xf32> to vector<48x128xf32>
    %98 = arith.mulf %96, %97 : vector<48x128xf32>
    %99 = vector.broadcast %62 : vector<1x128xf32> to vector<48x128xf32>
    %100 = arith.addf %98, %99 : vector<48x128xf32>
    %cst_38 = arith.constant 0.000000e+00 : f32
    %101 = vector.broadcast %cst_38 : f32 to vector<48x128xf32>
    %102 = arith.maximumf %100, %101 : vector<48x128xf32>
    %103 = vector.shape_cast %102 : vector<48x128xf32> to vector<3x16x128xf32>
    %104 = vector.extract_strided_slice %103 {offsets = [0, 0, 0], sizes = [3, 8, 128], strides = [1, 1, 1]} : vector<3x16x128xf32> to vector<3x8x128xf32>
    %105 = vector.extract_strided_slice %103 {offsets = [0, 8, 0], sizes = [3, 8, 128], strides = [1, 1, 1]} : vector<3x16x128xf32> to vector<3x8x128xf32>
    %106 = arith.maximumf %104, %105 : vector<3x8x128xf32>
    %107 = vector.extract_strided_slice %106 {offsets = [0, 0, 0], sizes = [3, 8, 64], strides = [1, 1, 1]} : vector<3x8x128xf32> to vector<3x8x64xf32>
    %108 = vector.extract_strided_slice %106 {offsets = [0, 0, 64], sizes = [3, 8, 64], strides = [1, 1, 1]} : vector<3x8x128xf32> to vector<3x8x64xf32>
    %109 = arith.maximumf %107, %108 : vector<3x8x64xf32>
    %110 = vector.extract_strided_slice %109 {offsets = [0, 0, 0], sizes = [3, 3, 64], strides = [1, 1, 1]} : vector<3x8x64xf32> to vector<3x3x64xf32>
    %111 = arith.truncf %110 : vector<3x3x64xf32> to vector<3x3x64xbf16>
    %cst_39 = arith.constant 0.000000e+00 : bf16
    %112 = vector.broadcast %cst_39 : bf16 to vector<3x1x64xbf16>
    %cst_40 = arith.constant 0.000000e+00 : bf16
    %113 = vector.broadcast %cst_40 : bf16 to vector<3x4x64xbf16>
    %114 = tpu.concatenate %112, %111, %113 in 1 : vector<3x1x64xbf16>, vector<3x3x64xbf16>, vector<3x4x64xbf16> -> vector<3x8x64xbf16>
    %cst_41 = arith.constant 0.000000e+00 : bf16
    %115 = vector.broadcast %cst_41 : bf16 to vector<1x8x64xbf16>
    %cst_42 = arith.constant 0.000000e+00 : bf16
    %116 = vector.broadcast %cst_42 : bf16 to vector<2x8x64xbf16>
    %117 = tpu.concatenate %115, %114, %116 in 0 : vector<1x8x64xbf16>, vector<3x8x64xbf16>, vector<2x8x64xbf16> -> vector<6x8x64xbf16>
    %118 = vector.shape_cast %117 : vector<6x8x64xbf16> to vector<48x64xbf16>
    %c0_43 = arith.constant 0 : index
    %c0_44 = arith.constant 0 : index
    %c0_45 = arith.constant 0 : index
    %119 = vector.load %arg10[%c0_43, %c0_44, %c0_45] : memref<9x64x64xbf16, #tpu.memory_space<vmem>>, vector<9x64x64xbf16>
    %c0_46 = arith.constant 0 : index
    %c0_47 = arith.constant 0 : index
    %120 = vector.load %arg11[%c0_46, %c0_47] : memref<1x64xf32, #tpu.memory_space<vmem>>, vector<1x64xf32>
    %c0_48 = arith.constant 0 : index
    %c0_49 = arith.constant 0 : index
    %121 = vector.load %arg12[%c0_48, %c0_49] : memref<1x64xf32, #tpu.memory_space<vmem>>, vector<1x64xf32>
    %cst_50 = arith.constant 0.000000e+00 : f32
    %122 = vector.broadcast %cst_50 : f32 to vector<24x64xf32>
    %123 = vector.extract_strided_slice %118 {offsets = [0, 0], sizes = [24, 64], strides = [1, 1]} : vector<48x64xbf16> to vector<24x64xbf16>
    %124 = vector.extract_strided_slice %119 {offsets = [0, 0, 0], sizes = [1, 64, 64], strides = [1, 1, 1]} : vector<9x64x64xbf16> to vector<1x64x64xbf16>
    %125 = vector.shape_cast %124 : vector<1x64x64xbf16> to vector<64x64xbf16>
    %cst_51 = arith.constant dense<0.000000e+00> : vector<24x64xf32>
    %126 = tpu.matmul %123, %125, %cst_51 {dimension_numbers = #tpu.dot_dimension_numbers<[1], [0], [0], [1], [0, 0, 1, 1], [], []>} : vector<24x64xbf16>, vector<64x64xbf16>, vector<24x64xf32> -> vector<24x64xf32>
    %127 = arith.addf %122, %126 : vector<24x64xf32>
    %128 = vector.extract_strided_slice %118 {offsets = [1, 0], sizes = [24, 64], strides = [1, 1]} : vector<48x64xbf16> to vector<24x64xbf16>
    %129 = vector.extract_strided_slice %119 {offsets = [1, 0, 0], sizes = [1, 64, 64], strides = [1, 1, 1]} : vector<9x64x64xbf16> to vector<1x64x64xbf16>
    %130 = vector.shape_cast %129 : vector<1x64x64xbf16> to vector<64x64xbf16>
    %cst_52 = arith.constant dense<0.000000e+00> : vector<24x64xf32>
    %131 = tpu.matmul %128, %130, %cst_52 {dimension_numbers = #tpu.dot_dimension_numbers<[1], [0], [0], [1], [0, 0, 1, 1], [], []>} : vector<24x64xbf16>, vector<64x64xbf16>, vector<24x64xf32> -> vector<24x64xf32>
    %132 = arith.addf %127, %131 : vector<24x64xf32>
    %133 = vector.extract_strided_slice %118 {offsets = [2, 0], sizes = [24, 64], strides = [1, 1]} : vector<48x64xbf16> to vector<24x64xbf16>
    %134 = vector.extract_strided_slice %119 {offsets = [2, 0, 0], sizes = [1, 64, 64], strides = [1, 1, 1]} : vector<9x64x64xbf16> to vector<1x64x64xbf16>
    %135 = vector.shape_cast %134 : vector<1x64x64xbf16> to vector<64x64xbf16>
    %cst_53 = arith.constant dense<0.000000e+00> : vector<24x64xf32>
    %136 = tpu.matmul %133, %135, %cst_53 {dimension_numbers = #tpu.dot_dimension_numbers<[1], [0], [0], [1], [0, 0, 1, 1], [], []>} : vector<24x64xbf16>, vector<64x64xbf16>, vector<24x64xf32> -> vector<24x64xf32>
    %137 = arith.addf %132, %136 : vector<24x64xf32>
    %138 = vector.extract_strided_slice %118 {offsets = [8, 0], sizes = [24, 64], strides = [1, 1]} : vector<48x64xbf16> to vector<24x64xbf16>
    %139 = vector.extract_strided_slice %119 {offsets = [3, 0, 0], sizes = [1, 64, 64], strides = [1, 1, 1]} : vector<9x64x64xbf16> to vector<1x64x64xbf16>
    %140 = vector.shape_cast %139 : vector<1x64x64xbf16> to vector<64x64xbf16>
    %cst_54 = arith.constant dense<0.000000e+00> : vector<24x64xf32>
    %141 = tpu.matmul %138, %140, %cst_54 {dimension_numbers = #tpu.dot_dimension_numbers<[1], [0], [0], [1], [0, 0, 1, 1], [], []>} : vector<24x64xbf16>, vector<64x64xbf16>, vector<24x64xf32> -> vector<24x64xf32>
    %142 = arith.addf %137, %141 : vector<24x64xf32>
    %143 = vector.extract_strided_slice %118 {offsets = [9, 0], sizes = [24, 64], strides = [1, 1]} : vector<48x64xbf16> to vector<24x64xbf16>
    %144 = vector.extract_strided_slice %119 {offsets = [4, 0, 0], sizes = [1, 64, 64], strides = [1, 1, 1]} : vector<9x64x64xbf16> to vector<1x64x64xbf16>
    %145 = vector.shape_cast %144 : vector<1x64x64xbf16> to vector<64x64xbf16>
    %cst_55 = arith.constant dense<0.000000e+00> : vector<24x64xf32>
    %146 = tpu.matmul %143, %145, %cst_55 {dimension_numbers = #tpu.dot_dimension_numbers<[1], [0], [0], [1], [0, 0, 1, 1], [], []>} : vector<24x64xbf16>, vector<64x64xbf16>, vector<24x64xf32> -> vector<24x64xf32>
    %147 = arith.addf %142, %146 : vector<24x64xf32>
    %148 = vector.extract_strided_slice %118 {offsets = [10, 0], sizes = [24, 64], strides = [1, 1]} : vector<48x64xbf16> to vector<24x64xbf16>
    %149 = vector.extract_strided_slice %119 {offsets = [5, 0, 0], sizes = [1, 64, 64], strides = [1, 1, 1]} : vector<9x64x64xbf16> to vector<1x64x64xbf16>
    %150 = vector.shape_cast %149 : vector<1x64x64xbf16> to vector<64x64xbf16>
    %cst_56 = arith.constant dense<0.000000e+00> : vector<24x64xf32>
    %151 = tpu.matmul %148, %150, %cst_56 {dimension_numbers = #tpu.dot_dimension_numbers<[1], [0], [0], [1], [0, 0, 1, 1], [], []>} : vector<24x64xbf16>, vector<64x64xbf16>, vector<24x64xf32> -> vector<24x64xf32>
    %152 = arith.addf %147, %151 : vector<24x64xf32>
    %153 = vector.extract_strided_slice %118 {offsets = [16, 0], sizes = [24, 64], strides = [1, 1]} : vector<48x64xbf16> to vector<24x64xbf16>
    %154 = vector.extract_strided_slice %119 {offsets = [6, 0, 0], sizes = [1, 64, 64], strides = [1, 1, 1]} : vector<9x64x64xbf16> to vector<1x64x64xbf16>
    %155 = vector.shape_cast %154 : vector<1x64x64xbf16> to vector<64x64xbf16>
    %cst_57 = arith.constant dense<0.000000e+00> : vector<24x64xf32>
    %156 = tpu.matmul %153, %155, %cst_57 {dimension_numbers = #tpu.dot_dimension_numbers<[1], [0], [0], [1], [0, 0, 1, 1], [], []>} : vector<24x64xbf16>, vector<64x64xbf16>, vector<24x64xf32> -> vector<24x64xf32>
    %157 = arith.addf %152, %156 : vector<24x64xf32>
    %158 = vector.extract_strided_slice %118 {offsets = [17, 0], sizes = [24, 64], strides = [1, 1]} : vector<48x64xbf16> to vector<24x64xbf16>
    %159 = vector.extract_strided_slice %119 {offsets = [7, 0, 0], sizes = [1, 64, 64], strides = [1, 1, 1]} : vector<9x64x64xbf16> to vector<1x64x64xbf16>
    %160 = vector.shape_cast %159 : vector<1x64x64xbf16> to vector<64x64xbf16>
    %cst_58 = arith.constant dense<0.000000e+00> : vector<24x64xf32>
    %161 = tpu.matmul %158, %160, %cst_58 {dimension_numbers = #tpu.dot_dimension_numbers<[1], [0], [0], [1], [0, 0, 1, 1], [], []>} : vector<24x64xbf16>, vector<64x64xbf16>, vector<24x64xf32> -> vector<24x64xf32>
    %162 = arith.addf %157, %161 : vector<24x64xf32>
    %163 = vector.extract_strided_slice %118 {offsets = [18, 0], sizes = [24, 64], strides = [1, 1]} : vector<48x64xbf16> to vector<24x64xbf16>
    %164 = vector.extract_strided_slice %119 {offsets = [8, 0, 0], sizes = [1, 64, 64], strides = [1, 1, 1]} : vector<9x64x64xbf16> to vector<1x64x64xbf16>
    %165 = vector.shape_cast %164 : vector<1x64x64xbf16> to vector<64x64xbf16>
    %cst_59 = arith.constant dense<0.000000e+00> : vector<24x64xf32>
    %166 = tpu.matmul %163, %165, %cst_59 {dimension_numbers = #tpu.dot_dimension_numbers<[1], [0], [0], [1], [0, 0, 1, 1], [], []>} : vector<24x64xbf16>, vector<64x64xbf16>, vector<24x64xf32> -> vector<24x64xf32>
    %167 = arith.addf %162, %166 : vector<24x64xf32>
    %168 = vector.broadcast %120 : vector<1x64xf32> to vector<24x64xf32>
    %169 = arith.mulf %167, %168 : vector<24x64xf32>
    %170 = vector.broadcast %121 : vector<1x64xf32> to vector<24x64xf32>
    %171 = arith.addf %169, %170 : vector<24x64xf32>
    %cst_60 = arith.constant 0.000000e+00 : f32
    %172 = vector.broadcast %cst_60 : f32 to vector<24x64xf32>
    %173 = arith.maximumf %171, %172 : vector<24x64xf32>
    %174 = vector.shape_cast %173 : vector<24x64xf32> to vector<3x8x64xf32>
    %175 = vector.extract_strided_slice %174 {offsets = [0, 0, 0], sizes = [3, 3, 64], strides = [1, 1, 1]} : vector<3x8x64xf32> to vector<3x3x64xf32>
    %176 = arith.truncf %175 : vector<3x3x64xf32> to vector<3x3x64xbf16>
    %cst_61 = arith.constant 0.000000e+00 : bf16
    %177 = vector.broadcast %cst_61 : bf16 to vector<3x1x64xbf16>
    %cst_62 = arith.constant 0.000000e+00 : bf16
    %178 = vector.broadcast %cst_62 : bf16 to vector<3x4x64xbf16>
    %179 = tpu.concatenate %177, %176, %178 in 1 : vector<3x1x64xbf16>, vector<3x3x64xbf16>, vector<3x4x64xbf16> -> vector<3x8x64xbf16>
    %cst_63 = arith.constant 0.000000e+00 : bf16
    %180 = vector.broadcast %cst_63 : bf16 to vector<1x8x64xbf16>
    %cst_64 = arith.constant 0.000000e+00 : bf16
    %181 = vector.broadcast %cst_64 : bf16 to vector<2x8x64xbf16>
    %182 = tpu.concatenate %180, %179, %181 in 0 : vector<1x8x64xbf16>, vector<3x8x64xbf16>, vector<2x8x64xbf16> -> vector<6x8x64xbf16>
    %183 = vector.shape_cast %182 : vector<6x8x64xbf16> to vector<48x64xbf16>
    %c0_65 = arith.constant 0 : index
    %c0_66 = arith.constant 0 : index
    %c0_67 = arith.constant 0 : index
    %184 = vector.load %arg13[%c0_65, %c0_66, %c0_67] : memref<9x64x64xbf16, #tpu.memory_space<vmem>>, vector<9x64x64xbf16>
    %c0_68 = arith.constant 0 : index
    %c0_69 = arith.constant 0 : index
    %185 = vector.load %arg14[%c0_68, %c0_69] : memref<1x64xf32, #tpu.memory_space<vmem>>, vector<1x64xf32>
    %c0_70 = arith.constant 0 : index
    %c0_71 = arith.constant 0 : index
    %186 = vector.load %arg15[%c0_70, %c0_71] : memref<1x64xf32, #tpu.memory_space<vmem>>, vector<1x64xf32>
    %cst_72 = arith.constant 0.000000e+00 : f32
    %187 = vector.broadcast %cst_72 : f32 to vector<24x64xf32>
    %188 = vector.extract_strided_slice %183 {offsets = [0, 0], sizes = [24, 64], strides = [1, 1]} : vector<48x64xbf16> to vector<24x64xbf16>
    %189 = vector.extract_strided_slice %184 {offsets = [0, 0, 0], sizes = [1, 64, 64], strides = [1, 1, 1]} : vector<9x64x64xbf16> to vector<1x64x64xbf16>
    %190 = vector.shape_cast %189 : vector<1x64x64xbf16> to vector<64x64xbf16>
    %cst_73 = arith.constant dense<0.000000e+00> : vector<24x64xf32>
    %191 = tpu.matmul %188, %190, %cst_73 {dimension_numbers = #tpu.dot_dimension_numbers<[1], [0], [0], [1], [0, 0, 1, 1], [], []>} : vector<24x64xbf16>, vector<64x64xbf16>, vector<24x64xf32> -> vector<24x64xf32>
    %192 = arith.addf %187, %191 : vector<24x64xf32>
    %193 = vector.extract_strided_slice %183 {offsets = [1, 0], sizes = [24, 64], strides = [1, 1]} : vector<48x64xbf16> to vector<24x64xbf16>
    %194 = vector.extract_strided_slice %184 {offsets = [1, 0, 0], sizes = [1, 64, 64], strides = [1, 1, 1]} : vector<9x64x64xbf16> to vector<1x64x64xbf16>
    %195 = vector.shape_cast %194 : vector<1x64x64xbf16> to vector<64x64xbf16>
    %cst_74 = arith.constant dense<0.000000e+00> : vector<24x64xf32>
    %196 = tpu.matmul %193, %195, %cst_74 {dimension_numbers = #tpu.dot_dimension_numbers<[1], [0], [0], [1], [0, 0, 1, 1], [], []>} : vector<24x64xbf16>, vector<64x64xbf16>, vector<24x64xf32> -> vector<24x64xf32>
    %197 = arith.addf %192, %196 : vector<24x64xf32>
    %198 = vector.extract_strided_slice %183 {offsets = [2, 0], sizes = [24, 64], strides = [1, 1]} : vector<48x64xbf16> to vector<24x64xbf16>
    %199 = vector.extract_strided_slice %184 {offsets = [2, 0, 0], sizes = [1, 64, 64], strides = [1, 1, 1]} : vector<9x64x64xbf16> to vector<1x64x64xbf16>
    %200 = vector.shape_cast %199 : vector<1x64x64xbf16> to vector<64x64xbf16>
    %cst_75 = arith.constant dense<0.000000e+00> : vector<24x64xf32>
    %201 = tpu.matmul %198, %200, %cst_75 {dimension_numbers = #tpu.dot_dimension_numbers<[1], [0], [0], [1], [0, 0, 1, 1], [], []>} : vector<24x64xbf16>, vector<64x64xbf16>, vector<24x64xf32> -> vector<24x64xf32>
    %202 = arith.addf %197, %201 : vector<24x64xf32>
    %203 = vector.extract_strided_slice %183 {offsets = [8, 0], sizes = [24, 64], strides = [1, 1]} : vector<48x64xbf16> to vector<24x64xbf16>
    %204 = vector.extract_strided_slice %184 {offsets = [3, 0, 0], sizes = [1, 64, 64], strides = [1, 1, 1]} : vector<9x64x64xbf16> to vector<1x64x64xbf16>
    %205 = vector.shape_cast %204 : vector<1x64x64xbf16> to vector<64x64xbf16>
    %cst_76 = arith.constant dense<0.000000e+00> : vector<24x64xf32>
    %206 = tpu.matmul %203, %205, %cst_76 {dimension_numbers = #tpu.dot_dimension_numbers<[1], [0], [0], [1], [0, 0, 1, 1], [], []>} : vector<24x64xbf16>, vector<64x64xbf16>, vector<24x64xf32> -> vector<24x64xf32>
    %207 = arith.addf %202, %206 : vector<24x64xf32>
    %208 = vector.extract_strided_slice %183 {offsets = [9, 0], sizes = [24, 64], strides = [1, 1]} : vector<48x64xbf16> to vector<24x64xbf16>
    %209 = vector.extract_strided_slice %184 {offsets = [4, 0, 0], sizes = [1, 64, 64], strides = [1, 1, 1]} : vector<9x64x64xbf16> to vector<1x64x64xbf16>
    %210 = vector.shape_cast %209 : vector<1x64x64xbf16> to vector<64x64xbf16>
    %cst_77 = arith.constant dense<0.000000e+00> : vector<24x64xf32>
    %211 = tpu.matmul %208, %210, %cst_77 {dimension_numbers = #tpu.dot_dimension_numbers<[1], [0], [0], [1], [0, 0, 1, 1], [], []>} : vector<24x64xbf16>, vector<64x64xbf16>, vector<24x64xf32> -> vector<24x64xf32>
    %212 = arith.addf %207, %211 : vector<24x64xf32>
    %213 = vector.extract_strided_slice %183 {offsets = [10, 0], sizes = [24, 64], strides = [1, 1]} : vector<48x64xbf16> to vector<24x64xbf16>
    %214 = vector.extract_strided_slice %184 {offsets = [5, 0, 0], sizes = [1, 64, 64], strides = [1, 1, 1]} : vector<9x64x64xbf16> to vector<1x64x64xbf16>
    %215 = vector.shape_cast %214 : vector<1x64x64xbf16> to vector<64x64xbf16>
    %cst_78 = arith.constant dense<0.000000e+00> : vector<24x64xf32>
    %216 = tpu.matmul %213, %215, %cst_78 {dimension_numbers = #tpu.dot_dimension_numbers<[1], [0], [0], [1], [0, 0, 1, 1], [], []>} : vector<24x64xbf16>, vector<64x64xbf16>, vector<24x64xf32> -> vector<24x64xf32>
    %217 = arith.addf %212, %216 : vector<24x64xf32>
    %218 = vector.extract_strided_slice %183 {offsets = [16, 0], sizes = [24, 64], strides = [1, 1]} : vector<48x64xbf16> to vector<24x64xbf16>
    %219 = vector.extract_strided_slice %184 {offsets = [6, 0, 0], sizes = [1, 64, 64], strides = [1, 1, 1]} : vector<9x64x64xbf16> to vector<1x64x64xbf16>
    %220 = vector.shape_cast %219 : vector<1x64x64xbf16> to vector<64x64xbf16>
    %cst_79 = arith.constant dense<0.000000e+00> : vector<24x64xf32>
    %221 = tpu.matmul %218, %220, %cst_79 {dimension_numbers = #tpu.dot_dimension_numbers<[1], [0], [0], [1], [0, 0, 1, 1], [], []>} : vector<24x64xbf16>, vector<64x64xbf16>, vector<24x64xf32> -> vector<24x64xf32>
    %222 = arith.addf %217, %221 : vector<24x64xf32>
    %223 = vector.extract_strided_slice %183 {offsets = [17, 0], sizes = [24, 64], strides = [1, 1]} : vector<48x64xbf16> to vector<24x64xbf16>
    %224 = vector.extract_strided_slice %184 {offsets = [7, 0, 0], sizes = [1, 64, 64], strides = [1, 1, 1]} : vector<9x64x64xbf16> to vector<1x64x64xbf16>
    %225 = vector.shape_cast %224 : vector<1x64x64xbf16> to vector<64x64xbf16>
    %cst_80 = arith.constant dense<0.000000e+00> : vector<24x64xf32>
    %226 = tpu.matmul %223, %225, %cst_80 {dimension_numbers = #tpu.dot_dimension_numbers<[1], [0], [0], [1], [0, 0, 1, 1], [], []>} : vector<24x64xbf16>, vector<64x64xbf16>, vector<24x64xf32> -> vector<24x64xf32>
    %227 = arith.addf %222, %226 : vector<24x64xf32>
    %228 = vector.extract_strided_slice %183 {offsets = [18, 0], sizes = [24, 64], strides = [1, 1]} : vector<48x64xbf16> to vector<24x64xbf16>
    %229 = vector.extract_strided_slice %184 {offsets = [8, 0, 0], sizes = [1, 64, 64], strides = [1, 1, 1]} : vector<9x64x64xbf16> to vector<1x64x64xbf16>
    %230 = vector.shape_cast %229 : vector<1x64x64xbf16> to vector<64x64xbf16>
    %cst_81 = arith.constant dense<0.000000e+00> : vector<24x64xf32>
    %231 = tpu.matmul %228, %230, %cst_81 {dimension_numbers = #tpu.dot_dimension_numbers<[1], [0], [0], [1], [0, 0, 1, 1], [], []>} : vector<24x64xbf16>, vector<64x64xbf16>, vector<24x64xf32> -> vector<24x64xf32>
    %232 = arith.addf %227, %231 : vector<24x64xf32>
    %233 = vector.broadcast %185 : vector<1x64xf32> to vector<24x64xf32>
    %234 = arith.mulf %232, %233 : vector<24x64xf32>
    %235 = vector.broadcast %186 : vector<1x64xf32> to vector<24x64xf32>
    %236 = arith.addf %234, %235 : vector<24x64xf32>
    %cst_82 = arith.constant 0.000000e+00 : f32
    %237 = vector.broadcast %cst_82 : f32 to vector<24x64xf32>
    %238 = arith.maximumf %236, %237 : vector<24x64xf32>
    %239 = vector.shape_cast %238 : vector<24x64xf32> to vector<3x8x64xf32>
    %240 = vector.extract_strided_slice %239 {offsets = [0, 0, 0], sizes = [3, 3, 64], strides = [1, 1, 1]} : vector<3x8x64xf32> to vector<3x3x64xf32>
    %c0_83 = arith.constant 0 : index
    %c0_84 = arith.constant 0 : index
    %c0_85 = arith.constant 0 : index
    %c0_86 = arith.constant 0 : index
    %241 = vector.load %arg16[%c0_83, %c0_84, %c0_85, %c0_86] : memref<1x3x3x64xf32, #tpu.memory_space<vmem>>, vector<1x3x3x64xf32>
    %242 = vector.shape_cast %241 : vector<1x3x3x64xf32> to vector<3x3x64xf32>
    %243 = vector.shape_cast %240 : vector<3x3x64xf32> to vector<1x3x3x64xf32>
    tpu.vector_store %arg16[%c0_83, %c0_84, %c0_85, %c0_86], %243 {strides = array<i32>} : memref<1x3x3x64xf32, #tpu.memory_space<vmem>>, vector<1x3x3x64xf32>,
    return
  }
  func.func @transform_0(%arg0: i32) -> (i32, i32, i32) {
    %c0_i32 = arith.constant 0 : i32
    %c0_i32_0 = arith.constant 0 : i32
    %c0_i32_1 = arith.constant 0 : i32
    return %arg0, %c0_i32, %c0_i32_0 : i32, i32, i32
  }
  func.func @transform_1(%arg0: i32) -> (i32, i32, i32) {
    %c0_i32 = arith.constant 0 : i32
    %c0_i32_0 = arith.constant 0 : i32
    %c0_i32_1 = arith.constant 0 : i32
    %c0_i32_2 = arith.constant 0 : i32
    return %c0_i32, %c0_i32_0, %c0_i32_1 : i32, i32, i32
  }
  func.func @transform_2(%arg0: i32) -> (i32, i32, i32) {
    %c0_i32 = arith.constant 0 : i32
    %c0_i32_0 = arith.constant 0 : i32
    %c0_i32_1 = arith.constant 0 : i32
    %c0_i32_2 = arith.constant 0 : i32
    return %c0_i32, %c0_i32_0, %c0_i32_1 : i32, i32, i32
  }
  func.func @transform_3(%arg0: i32) -> (i32, i32) {
    %c0_i32 = arith.constant 0 : i32
    %c0_i32_0 = arith.constant 0 : i32
    %c0_i32_1 = arith.constant 0 : i32
    return %c0_i32, %c0_i32_0 : i32, i32
  }
  func.func @transform_4(%arg0: i32) -> (i32, i32) {
    %c0_i32 = arith.constant 0 : i32
    %c0_i32_0 = arith.constant 0 : i32
    %c0_i32_1 = arith.constant 0 : i32
    return %c0_i32, %c0_i32_0 : i32, i32
  }
  func.func @transform_5(%arg0: i32) -> (i32, i32, i32) {
    %c0_i32 = arith.constant 0 : i32
    %c0_i32_0 = arith.constant 0 : i32
    %c0_i32_1 = arith.constant 0 : i32
    %c0_i32_2 = arith.constant 0 : i32
    return %c0_i32, %c0_i32_0, %c0_i32_1 : i32, i32, i32
  }
  func.func @transform_6(%arg0: i32) -> (i32, i32, i32) {
    %c0_i32 = arith.constant 0 : i32
    %c0_i32_0 = arith.constant 0 : i32
    %c0_i32_1 = arith.constant 0 : i32
    %c0_i32_2 = arith.constant 0 : i32
    return %c0_i32, %c0_i32_0, %c0_i32_1 : i32, i32, i32
  }
  func.func @transform_7(%arg0: i32) -> (i32, i32) {
    %c0_i32 = arith.constant 0 : i32
    %c0_i32_0 = arith.constant 0 : i32
    %c0_i32_1 = arith.constant 0 : i32
    return %c0_i32, %c0_i32_0 : i32, i32
  }
  func.func @transform_8(%arg0: i32) -> (i32, i32) {
    %c0_i32 = arith.constant 0 : i32
    %c0_i32_0 = arith.constant 0 : i32
    %c0_i32_1 = arith.constant 0 : i32
    return %c0_i32, %c0_i32_0 : i32, i32
  }
  func.func @transform_9(%arg0: i32) -> (i32, i32, i32) {
    %c0_i32 = arith.constant 0 : i32
    %c0_i32_0 = arith.constant 0 : i32
    %c0_i32_1 = arith.constant 0 : i32
    %c0_i32_2 = arith.constant 0 : i32
    return %c0_i32, %c0_i32_0, %c0_i32_1 : i32, i32, i32
  }
  func.func @transform_10(%arg0: i32) -> (i32, i32) {
    %c0_i32 = arith.constant 0 : i32
    %c0_i32_0 = arith.constant 0 : i32
    %c0_i32_1 = arith.constant 0 : i32
    return %c0_i32, %c0_i32_0 : i32, i32
  }
  func.func @transform_11(%arg0: i32) -> (i32, i32) {
    %c0_i32 = arith.constant 0 : i32
    %c0_i32_0 = arith.constant 0 : i32
    %c0_i32_1 = arith.constant 0 : i32
    return %c0_i32, %c0_i32_0 : i32, i32
  }
  func.func @transform_12(%arg0: i32) -> (i32, i32, i32) {
    %c0_i32 = arith.constant 0 : i32
    %c0_i32_0 = arith.constant 0 : i32
    %c0_i32_1 = arith.constant 0 : i32
    %c0_i32_2 = arith.constant 0 : i32
    return %c0_i32, %c0_i32_0, %c0_i32_1 : i32, i32, i32
  }
  func.func @transform_13(%arg0: i32) -> (i32, i32) {
    %c0_i32 = arith.constant 0 : i32
    %c0_i32_0 = arith.constant 0 : i32
    %c0_i32_1 = arith.constant 0 : i32
    return %c0_i32, %c0_i32_0 : i32, i32
  }
  func.func @transform_14(%arg0: i32) -> (i32, i32) {
    %c0_i32 = arith.constant 0 : i32
    %c0_i32_0 = arith.constant 0 : i32
    %c0_i32_1 = arith.constant 0 : i32
    return %c0_i32, %c0_i32_0 : i32, i32
  }
  func.func @transform_15(%arg0: i32) -> (i32, i32, i32, i32) {
    %c0_i32 = arith.constant 0 : i32
    %c0_i32_0 = arith.constant 0 : i32
    %c0_i32_1 = arith.constant 0 : i32
    %c0_i32_2 = arith.constant 0 : i32
    return %arg0, %c0_i32, %c0_i32_0, %c0_i32_1 : i32, i32, i32, i32
  }
}

</mosaic_0001>

<bundles_post_ra>
// kernel: tile.23
= control target key start
LH: loop header
LB: loop body
LE: loop exit
PB: predicated region body
PF: predicated region fallthrough
CT: control target
= control target key end

     0   :  { %s22_s0 = inlined_call_operand.vmem [shape: f32[64], index: 0, kind: input, shape index: {}]   ;;  %s23_s1 = inlined_call_operand.vmem [shape: f32[4,64], index: 1, kind: output, shape index: {}]  }
   0x1   :  { %v4_v0 = vld [vmem:[%s22_s0] ss:$0 sm:$0xff] }
   0x2   :  { %5 = vst [vmem:[%s23_s1] sm:$0xf] %v4_v0 }

// kernel: tile.24
= control target key start
LH: loop header
LB: loop body
LE: loop exit
PB: predicated region body
PF: predicated region fallthrough
CT: control target
= control target key end

     0   :  { %s7_s8 = smov 3  ;;  %vm9_vm0 = vcmask 523264   ;;  %s34_s9 = smov 64   ;;  %vm16_vm1 = vcmask 1048064   ;;  %s54_s0 = inlined_call_operand.vmem [shape: f32[4,64], index: 0, kind: input, shape index: {}]   ;;  %s55_s1 = inlined_call_operand.vmem [shape: f32[1,256], index: 1, kind: output, shape index: {}]  }
   0x1   :  { %v5_v0 = vld [vmem:[%s54_s0] sm:$0xf]  ;;  %s12_s0 = smov 3 }
   0x2   :  { %6 = vst [vmem:[#allocation1] sm:$0xf] %v5_v0 }
   0x9   :  { %v13_v1 = vld [vmem:[#allocation1 + $0x1] ss:$2 sm:%s12_s0]   ;;  %v8_v2 = vld [vmem:[#allocation1] ss:$2 sm:%s7_s8]  }
   0xa   :  { %14 = vrot.lane.b32.xlu0 %v13_v1, %s34_s9  ;;  %10 = vst.msk [vmem:[#allocation0] ss:$8 sm:$0x3] %vm9_vm0, %v8_v2  }
  0x7c   :  { %v15_v3 = vpop.permute.xlu0 %14  }
  0x7d   :  { %17 = vst.msk [vmem:[#allocation0] ss:$8 sm:$0x3] %vm16_vm1, %v15_v3  }
  0x84   :  { %v22_v4 = vld [vmem:[#allocation0] sm:$0x1]  ;;  %v27_v5 = vld [vmem:[#allocation0 + $0x8] sm:$0x1] }
  0x85   :  { %25 = vst [vmem:[%s55_s1] sm:$0x1] %v22_v4  ;;  %32 = vst [vmem:[%s55_s1 + $0x1] sm:$0x1] %v27_v5 }

// kernel: tile.33
= control target key start
LH: loop header
LB: loop body
LE: loop exit
PB: predicated region body
PF: predicated region fallthrough
CT: control target
= control target key end

     0   :  { %s22_s0 = inlined_call_operand.vmem [shape: f32[64], index: 0, kind: input, shape index: {}]   ;;  %s23_s1 = inlined_call_operand.vmem [shape: f32[2,64], index: 1, kind: output, shape index: {}]  }
   0x1   :  { %v4_v0 = vld [vmem:[%s22_s0] ss:$0 sm:$0xff] }
   0x2   :  { %5 = vst [vmem:[%s23_s1] sm:$0x3] %v4_v0 }

// kernel: tile.34
= control target key start
LH: loop header
LB: loop body
LE: loop exit
PB: predicated region body
PF: predicated region fallthrough
CT: control target
= control target key end

     0   :  { %vm8_vm0 = vcmask 523264   ;;  %vm14_vm1 = vcmask 1048064   ;;  %s42_s0 = inlined_call_operand.vmem [shape: f32[2,64], index: 0, kind: input, shape index: {}]   ;;  %s43_s1 = inlined_call_operand.vmem [shape: f32[1,128], index: 1, kind: output, shape index: {}]  }
   0x1   :  { %v5_v0 = vld [vmem:[%s42_s0] sm:$0x3]  ;;  %s25_s0 = smov 64  }
   0x2   :  { %6 = vst [vmem:[#allocation1] sm:$0x3] %v5_v0 }
   0x9   :  { %v11_v1 = vld [vmem:[#allocation1 + $0x1] sm:$0x1]   ;;  %v7_v2 = vld [vmem:[#allocation1] sm:$0x1]  }
   0xa   :  { %12 = vrot.lane.b32.xlu0 %v11_v1, %s25_s0  ;;  %9 = vst.msk [vmem:[#allocation0] sm:$0x1] %vm8_vm0, %v7_v2  }
  0x7c   :  { %v13_v3 = vpop.permute.xlu0 %12  }
  0x7d   :  { %15 = vst.msk [vmem:[#allocation0] sm:$0x1] %vm14_vm1, %v13_v3  }
  0x84   :  { %v20_v4 = vld [vmem:[#allocation0] sm:$0x1] }
  0x85   :  { %23 = vst [vmem:[%s43_s1] sm:$0x1] %v20_v4 }

// kernel: cnn_encoder_forward.1
= control target key start
LH: loop header
LB: loop body
LE: loop exit
PB: predicated region body
PF: predicated region fallthrough
CT: control target
= control target key end

     0   :  { %s5871_s18 = smov 0   ;;  %s7389_s0 = inlined_call_operand.vmem [shape: bf16[2,144,32], index: 0, kind: input, shape index: {}]   ;;  %s7390_s1 = inlined_call_operand.vmem [shape: bf16[3,32,256], index: 1, kind: input, shape index: {}]   ;;  %s7391_s2 = inlined_call_operand.vmem [shape: bf16[3,32,256], index: 2, kind: input, shape index: {}]   ;;  %s7392_s3 = inlined_call_operand.vmem [shape: f32[1,256], index: 3, kind: input, shape index: {}]   ;;  %s7393_s4 = inlined_call_operand.vmem [shape: f32[1,256], index: 4, kind: input, shape index: {}]   ;;  %s7394_s5 = inlined_call_operand.vmem [shape: bf16[3,128,128], index: 5, kind: input, shape index: {}]   ;;  %s7395_s6 = inlined_call_operand.vmem [shape: bf16[3,128,128], index: 6, kind: input, shape index: {}]   ;;  %s7396_s7 = inlined_call_operand.vmem [shape: f32[1,128], index: 7, kind: input, shape index: {}]   ;;  %s7397_s8 = inlined_call_operand.vmem [shape: f32[1,128], index: 8, kind: input, shape index: {}]   ;;  %s7398_s9 = inlined_call_operand.vmem [shape: bf16[9,64,64], index: 9, kind: input, shape index: {}]   ;;  %s7399_s10 = inlined_call_operand.vmem [shape: f32[1,64], index: 10, kind: input, shape index: {}]   ;;  %s7400_s11 = inlined_call_operand.vmem [shape: f32[1,64], index: 11, kind: input, shape index: {}]   ;;  %s7401_s12 = inlined_call_operand.vmem [shape: bf16[9,64,64], index: 12, kind: input, shape index: {}]   ;;  %s7402_s13 = inlined_call_operand.vmem [shape: f32[1,64], index: 13, kind: input, shape index: {}]   ;;  %s7403_s14 = inlined_call_operand.vmem [shape: f32[1,64], index: 14, kind: input, shape index: {}]   ;;  %s7404_s15 = inlined_call_operand.vmem [shape: f32[2,3,3,64], index: 15, kind: output, shape index: {}]  }
   0x1 LB: > { %s4696_s19 = sadd.s32 4294967295, %s5785_s18   ;;  %p4700_p0 = scmp.ge.s32.totalorder %s5785_s18, 1  ;;  %s5785_s18 = sphi %s5871_s18, %s25_s18  }
   0x2   : > { %p437_p1 = scmp.lt.s32.totalorder %s5785_s18, 3 }
   0x4   : > { %p438_p2 = pnand %p4700_p0, %p437_p1 }
   0x6   : > { %441 = sbr.rel (%p438_p2) target bundleno = 1631 (0x65f), region = 80 }
   0xb   : > { %v5606_v0 = vld [vmem:[%s7390_s1 + $0x14] ss:$8 sps:$4 sm:$0xff]   ;;  %p485_p3 = scmp.lt.s32.totalorder %s4696_s19, 1  ;;  %v5608_v1 = vld [vmem:[%s7390_s1 + $0x10] ss:$8 sps:$4 sm:$0xff]   ;;  %v7405_v2 = vmov 0  }
   0xc   : > { %887 = vmatprep.mubr.bf16.mxu1 %v7405_v2  ;;  %738 = vmatprep.mubr.bf16.mxu0 %v7405_v2  ;;  %v5609_v3 = vld [vmem:[%s7391_s2 + $0x14] ss:$8 sps:$4 sm:$0xff]   ;;  %v5611_v4 = vld [vmem:[%s7391_s2 + $0x10] ss:$8 sps:$4 sm:$0xff]   ;;  %v5612_v5 = vld [vmem:[%s7390_s1 + $0x4] ss:$8 sps:$4 sm:$0xff]  }
   0xd   : > { %867 = vmatprep.subr.bf16.mxu1 %v5606_v0  ;;  %s7440_s19 = smov (!%p485_p3, %s4696_s19), 1  ;;  %v5614_v6 = vld [vmem:[%s7390_s1] ss:$8 sps:$4 sm:$0xff]   ;;  %718 = vmatprep.subr.bf16.mxu0 %v5609_v3  ;;  %v5615_v7 = vld [vmem:[%s7391_s2 + $0x4] ss:$8 sps:$4 sm:$0xff]   ;;  %vm681_vm0 = vcmask 261120  }
   0xe   : > { %868 = vmatpush1.bf16.msra.mxu1 %v5608_v1  ;;  %s5527_s21 = smul.u32 72, %s7440_s19  ;;  %719 = vmatpush1.bf16.msra.mxu0 %v5611_v4  ;;  %v5617_v8 = vld [vmem:[%s7391_s2] ss:$8 sps:$4 sm:$0xff]   ;;  %v5623_v9 = vld [vmem:[%s7390_s1 + $0x34] ss:$8 sps:$4 sm:$0xff]   ;;  %vm1166_vm2 = vcmask 1043456  }
   0xf   : > { %869 = vmatprep.subr.bf16.mxu1 %v5612_v5  ;;  %720 = vmatprep.subr.bf16.mxu0 %v5615_v7  ;;  %v5624_v16 = vld [vmem:[%s7391_s2 + $0x30] ss:$8 sps:$4 sm:$0xff]   ;;  %v5626_v18 = vld [vmem:[%s7391_s2 + $0x34] ss:$8 sps:$4 sm:$0xff]   ;;  %vm585_vm1 = vsmask.f32 7424 }
  0x10   : > { %s5911_s26 = scalar_lea.vmem %s7389_s0, %s5527_s21  ;;  %v5621_v37 = vld [vmem:[%s7390_s1 + $0x30] ss:$8 sps:$4 sm:$0xff]   ;;  %v5632_v44 = vld [vmem:[%s7390_s1 + $0x24] ss:$8 sps:$4 sm:$0xff]   ;;  %v5634_v53 = vld [vmem:[%s7391_s2 + $0x20] ss:$8 sps:$4 sm:$0xff]  }
  0x11   : > { %v496_v10 = vld [vmem:[%s5911_s26] sm:$0xf]  ;;  %v5918_v11 = vld [vmem:[%s5911_s26 + $0x4] sm:$0xf]  ;;  %v5921_v12 = vld [vmem:[%s5911_s26 + $0x8] sm:$0xf] }
  0x12   : > { %870 = vmatpush1.bf16.msra.mxu1 %v5614_v6  ;;  %v5924_v13 = vld [vmem:[%s5911_s26 + $0xc] sm:$0xf]  ;;  %v4703_v14 = vcombine.low %v496_v10, %v5918_v11  ;;  %v4736_v15 = vcombine.low %v5918_v11, %v5921_v12  ;;  %721 = vmatpush1.bf16.msra.mxu0 %v5617_v8  ;;  %v5940_v19 = vld [vmem:[%s5911_s26 + $0x10] sm:$0xf]  ;;  %v5943_v20 = vld [vmem:[%s5911_s26 + $0x14] sm:$0xf] }
  0x13   : > { %v5934_v17 = vcombine.low %v5921_v12, %v5924_v13  ;;  %1032 = vmatprep.subr.bf16.mxu0 %v5623_v9  ;;  %v5948_v23 = vcombine.low %v5940_v19, %v5943_v20  ;;  %v5951_v24 = vld [vmem:[%s5911_s26 + $0x18] sm:$0xf]  ;;  %v5954_v25 = vld [vmem:[%s5911_s26 + $0x1c] sm:$0xf]  ;;  %v4737_v26 = vcombine.low %v5924_v13, %v5940_v19  ;;  %1240 = vmatprep.subr.bf16.mxu1 %v5626_v18  ;;  %v5965_v29 = vld [vmem:[%s5911_s26 + $0x20] sm:$0xf] }
  0x14   : > { %v587_v21 = vshrl.u32 %v4703_v14, 16  ;;  %v589_v22 = vshll.u32 %v4703_v14, 16  ;;  %v5962_v28 = vcombine.low %v5951_v24, %v5954_v25  ;;  %v5968_v30 = vld [vmem:[%s5911_s26 + $0x24] sm:$0xf]  ;;  %v4738_v31 = vcombine.low %v5943_v20, %v5951_v24  ;;  %v5985_v41 = vld [vmem:[%s5911_s26 + $0x28] sm:$0xf] }
  0x15   : > { %4728 = vmatmul.mubr.msk.bf16.vlgmr.msra.gmra.mxu1 %vm681_vm0, %v4703_v14  ;;  %v594_v27 = vshll.u32 %v5934_v17, 16  ;;  %v5974_v33 = vcombine.low %v5965_v29, %v5968_v30  ;;  %v602_v35 = vshll.u32 %v5948_v23, 16  ;;  %v4739_v36 = vcombine.low %v5954_v25, %v5965_v29  ;;  %v5993_v45 = vld [vmem:[%s5911_s26 + $0x2c] sm:$0xf]  ;;  %v6009_v51 = vld [vmem:[%s5911_s26 + $0x30] sm:$0xf] }
  0x16   : > { %897 = vmatprep.mubr.bf16.mxu1 %v7405_v2  ;;  %v591_v32 = vrot.slane %v589_v22, 1  ;;  %1241 = vmatpush1.bf16.msra.mxu1 %v5624_v16  ;;  %v598_v39 = vshrl.u32 %v5934_v17, 16  ;;  %v606_v40 = vshrl.u32 %v5948_v23, 16  ;;  %v610_v42 = vshll.u32 %v5962_v28, 16  ;;  %v5636_v50 = vld [vmem:[%s7391_s2 + $0x24] ss:$8 sps:$4 sm:$0xff]  }
  0x17   : > { %v596_v34 = vrot.slane %v594_v27, 1  ;;  %v614_v43 = vshrl.u32 %v5962_v28, 16  ;;  %v4740_v46 = vcombine.low %v5968_v30, %v5985_v41  ;;  %v618_v48 = vshll.u32 %v5974_v33, 16  ;;  %v6017_v54 = vld [vmem:[%s5911_s26 + $0x34] sm:$0xf]  ;;  %1242 = vmatprep.subr.bf16.mxu1 %v5636_v50  ;;  %s5788_s24 = smov 64  }
  0x18   : > { %v592_v38 = vor.u32 %v591_v32, %v587_v21  ;;  %v6003_v49 = vcombine.low %v5985_v41, %v5993_v45  ;;  %v604_v52 = vrot.slane %v602_v35, 1  ;;  %v4741_v55 = vcombine.low %v5993_v45, %v6009_v51  ;;  %v5630_v57 = vld [vmem:[%s7390_s1 + $0x20] ss:$8 sps:$4 sm:$0xff]   ;;  %v6027_v58 = vld [vmem:[%s5911_s26 + $0x38] sm:$0xf] }
  0x19   : > { %v600_v56 = vor.u32 %v598_v39, %v596_v34  ;;  %v6030_v59 = vld [vmem:[%s5911_s26 + $0x3c] sm:$0xf]  ;;  %v612_v61 = vrot.slane %v610_v42, 1  ;;  %v6037_v63 = vcombine.low %v6009_v51, %v6017_v54  ;;  %v6040_v0 = vld [vmem:[%s5911_s26 + $0x40] sm:$0xf]  ;;  %v620_v3 = vrot.slane %v618_v48, 1 }
  0x1a   : > { %v5998_v47 = vsel %vm585_vm1, %v592_v38, %v596_v34  ;;  %v608_v60 = vor.u32 %v606_v40, %v604_v52  ;;  %v626_v62 = vshll.u32 %v6003_v49, 16  ;;  %v513_v1 = vld [vmem:[%s5911_s26 + $0x44] sm:$0xf]  ;;  %v622_v4 = vshrl.u32 %v5974_v33, 16  ;;  %v5642_v5 = vld [vmem:[%s7390_s1 + $0x54] ss:$8 sps:$4 sm:$0xff]   ;;  %1243 = vmatpush1.bf16.msra.mxu1 %v5634_v53 }
  0x1b   : > { %4716 = vmatmul.mubr.msk.bf16.vlgmr.msra.gmra.mxu0 %vm681_vm0, %v5998_v47  ;;  %v616_v6 = vor.u32 %v614_v43, %v612_v61  ;;  %v630_v7 = vshrl.u32 %v6003_v49, 16  ;;  %v634_v8 = vshll.u32 %v6037_v63, 16  ;;  %v6051_v9 = vcombine.low %v6027_v58, %v6030_v59  ;;  %v5645_v10 = vld [vmem:[%s7391_s2 + $0x54] ss:$8 sps:$4 sm:$0xff]  }
  0x1c   : > { %1033 = vmatpush1.bf16.msra.mxu0 %v5621_v37  ;;  %748 = vmatprep.mubr.bf16.mxu0 %v7405_v2  ;;  %v6057_v14 = vsel %vm585_vm1, %v600_v56, %v604_v52  ;;  %v6060_v16 = vcombine.low %v6040_v0, %v513_v1  ;;  %v1167_v18 = vrot.slane %v5998_v47, 4  ;;  %v6065_v22 = vsel %vm585_vm1, %v608_v60, %v612_v61 }
  0x1d   : > { %4729 = vmatmul.mubr.msk.bf16.gmra.mxu1 %vm681_vm0, %v5934_v17  ;;  %1034 = vmatprep.subr.bf16.mxu0 %v5632_v44  ;;  %v1168_v21 = vrot.slane %v6057_v14, 4  ;;  %v628_v27 = vrot.slane %v626_v62, 1  ;;  %v1170_v32 = vrot.slane %v6065_v22, 4  ;;  %v624_v34 = vor.u32 %v622_v4, %v620_v3 }
  0x1e   : > { %907 = vmatprep.mubr.bf16.mxu1 %v7405_v2  ;;  %1575 = vmatprep.subr.bf16.mxu1 %v5645_v10  ;;  %v4742_v35 = vcombine.low %v6017_v54, %v6027_v58  ;;  %v4743_v37 = vcombine.low %v6030_v59, %v6040_v0  ;;  %v6075_v38 = vsel %vm585_vm1, %v616_v6, %v620_v3  ;;  %v636_v40 = vrot.slane %v634_v8, 1  ;;  %v5643_v3 = vld [vmem:[%s7391_s2 + $0x50] ss:$8 sps:$4 sm:$0xff]   ;;  %v5651_v10 = vld [vmem:[%s7390_s1 + $0x44] ss:$8 sps:$4 sm:$0xff]  }
  0x1f   : > { %v632_v39 = vor.u32 %v630_v7, %v628_v27  ;;  %v642_v42 = vshll.u32 %v6051_v9, 16  ;;  %v1172_v43 = vrot.slane %v6075_v38, 4  ;;  %v650_v44 = vshll.u32 %v6060_v16, 16  ;;  %v5653_v7 = vld [vmem:[%s7391_s2 + $0x40] ss:$8 sps:$4 sm:$0xff]  }
  0x20   : > { %1035 = vmatpush1.bf16.msra.mxu0 %v5630_v57  ;;  %v6085_v47 = vsel %vm585_vm1, %v624_v34, %v628_v27  ;;  %v638_v48 = vshrl.u32 %v6037_v63, 16  ;;  %v646_v50 = vshrl.u32 %v6051_v9, 16  ;;  %v1169_v6 = vsel %vm1166_vm2, %v1167_v18, %v1168_v21  ;;  %v5640_v8 = vld [vmem:[%s7390_s1 + $0x50] ss:$8 sps:$4 sm:$0xff]   ;;  %v5649_v27 = vld [vmem:[%s7390_s1 + $0x40] ss:$8 sps:$4 sm:$0xff]  }
  0x21   : > { %1407 = vmatprep.subr.bf16.mxu0 %v5642_v5  ;;  %v1174_v52 = vrot.slane %v6085_v47, 4  ;;  %v6091_v53 = vsel %vm585_vm1, %v632_v39, %v636_v40  ;;  %v644_v56 = vrot.slane %v642_v42, 1  ;;  %v6094_v60 = vrot.slane %v650_v44, 1  ;;  %v5655_v5 = vld [vmem:[%s7391_s2 + $0x44] ss:$8 sps:$4 sm:$0xff]  }
  0x22   : > { %v1176_v57 = vrot.slane %v6091_v53, 4  ;;  %v640_v61 = vor.u32 %v638_v48, %v636_v40  ;;  %v1171_v18 = vsel %vm1166_vm2, %v1168_v21, %v1170_v32  ;;  %v1173_v21 = vsel %vm1166_vm2, %v1170_v32, %v1172_v43 }
  0x23   : > { %4717 = vmatmul.mubr.msk.bf16.gmra.mxu0 %vm681_vm0, %v6057_v14  ;;  %v648_v1 = vor.u32 %v646_v50, %v644_v56  ;;  %v1175_v11 = vsel %vm1166_vm2, %v1172_v43, %v1174_v52  ;;  %v654_v19 = vshrl.u32 %v6060_v16, 16  ;;  %vm658_vm3 = vcmask 1047552  }
  0x24   : > { %758 = vmatprep.mubr.bf16.mxu0 %v7405_v2  ;;  %v6121_v62 = vsel %vm585_vm1, %v640_v61, %v644_v56  ;;  %v1177_v12 = vsel %vm1166_vm2, %v1174_v52, %v1176_v57  ;;  %vm6222_vm4 = vmand %vm658_vm3, %vm585_vm1  ;;  %v7408_v25 = vmov 0  ;;  %vm5790_vm5 = vmmov 0  }
  0x25   : > { %4730 = vmatmul.mubr.msk.bf16.gmra.mxu1 %vm681_vm0, %v5948_v23  ;;  %v6134_v4 = vsel %vm585_vm1, %v648_v1, %v6094_v60  ;;  %v1178_v13 = vrot.slane %v6121_v62, 4  ;;  %v656_v24 = vor.u32 %v654_v19, %v6094_v60  ;;  %v7409_v25 = vsel %vm6222_vm4, 4294967295, %v7408_v25 }
  0x26   : > { %917 = vmatprep.mubr.bf16.mxu1 %v7405_v2  ;;  %v1180_v20 = vrot.slane %v6134_v4, 4  ;;  %7410 = vst [vmem:[#allocation2_spill] sm:$0xff] %v7409_v25  ;;  %vm1954_vm6 = vcmask 523264   ;;  %vm2855_vm7 = vcmask 1040384   ;;  %vm2856_vm8 = vsmask.f32 256 }
  0x27   : > { %v660_v29 = vsel %vm6222_vm4, %v656_v24, 0  ;;  %vm7040_vm9 = vmand %vm2855_vm7, %vm2856_vm8  ;;  %vm2861_vm10 = vcmask 1041408   ;;  %vm3124_vm11 = vcmask 1046528   ;;  %vm4637_vm12 = vcmask 518144  }
  0x28   : > { %v1182_v30 = vrot.slane %v660_v29, 4 }
  0x2b   : > { %4718 = vmatmul.mubr.msk.bf16.gmra.mxu0 %vm681_vm0, %v6065_v22 }
  0x2c   : > { %768 = vmatprep.mubr.bf16.mxu0 %v7405_v2 }
  0x2d   : > { %4731 = vmatmul.mubr.msk.bf16.gmra.mxu1 %vm681_vm0, %v5962_v28 }
  0x2e   : > { %927 = vmatprep.mubr.bf16.mxu1 %v7405_v2 }
  0x33   : > { %4719 = vmatmul.mubr.msk.bf16.gmra.mxu0 %vm681_vm0, %v6075_v38 }
  0x34   : > { %778 = vmatprep.mubr.bf16.mxu0 %v7405_v2 }
  0x35   : > { %4732 = vmatmul.mubr.msk.bf16.gmra.mxu1 %vm681_vm0, %v5974_v33 }
  0x36   : > { %937 = vmatprep.mubr.bf16.mxu1 %v7405_v2 }
  0x3b   : > { %4720 = vmatmul.mubr.msk.bf16.gmra.mxu0 %vm681_vm0, %v6085_v47 }
  0x3c   : > { %788 = vmatprep.mubr.bf16.mxu0 %v7405_v2 }
  0x3d   : > { %4733 = vmatmul.mubr.msk.bf16.gmra.mxu1 %vm681_vm0, %v6003_v49 }
  0x3e   : > { %947 = vmatprep.mubr.bf16.mxu1 %v7405_v2 }
  0x43   : > { %4721 = vmatmul.mubr.msk.bf16.gmra.mxu0 %vm681_vm0, %v6091_v53 }
  0x44   : > { %798 = vmatprep.mubr.bf16.mxu0 %v7405_v2 }
  0x45   : > { %4734 = vmatmul.mubr.msk.bf16.gmra.mxu1 %vm681_vm0, %v6037_v63 }
  0x46   : > { %957 = vmatprep.mubr.bf16.mxu1 %v7405_v2 }
  0x4b   : > { %4722 = vmatmul.mubr.msk.bf16.gmra.mxu0 %vm681_vm0, %v6121_v62 }
  0x4c   : > { %808 = vmatprep.mubr.bf16.mxu0 %v7405_v2 }
  0x4d   : > { %4735 = vmatmul.mubr.msk.bf16.gmra.mxu1 %vm681_vm0, %v6051_v9 }
  0x4e   : > { %1260 = vmatprep.mubr.bf16.mxu1 %v7405_v2 }
  0x53   : > { %4723 = vmatmul.mubr.msk.bf16.gmra.mxu0 %vm681_vm0, %v6134_v4 }
  0x54   : > { %1052 = vmatprep.mubr.bf16.mxu0 %v7405_v2 }
  0x55   : > { %4760 = vmatmul.mubr.msk.bf16.vlgmr.msra.gmra.mxu1 %vm681_vm0, %v1169_v6 }
  0x56   : > { %1576 = vmatpush1.bf16.msra.mxu1 %v5643_v3  ;;  %1270 = vmatprep.mubr.bf16.mxu1 %v7405_v2 }
  0x57   : > { %1577 = vmatprep.subr.bf16.mxu1 %v5655_v5 }
  0x5a   : > { %1578 = vmatpush1.bf16.msra.mxu1 %v5653_v7 }
  0x5b   : > { %4748 = vmatmul.mubr.msk.bf16.vlgmr.msra.gmra.mxu0 %vm681_vm0, %v4736_v15  ;;  %v1179_v15 = vsel %vm1166_vm2, %v1176_v57, %v1178_v13 }
  0x5c   : > { %1408 = vmatpush1.bf16.msra.mxu0 %v5640_v8  ;;  %1062 = vmatprep.mubr.bf16.mxu0 %v7405_v2 }
  0x5d   : > { %4761 = vmatmul.mubr.msk.bf16.gmra.mxu1 %vm681_vm0, %v1171_v18  ;;  %1409 = vmatprep.subr.bf16.mxu0 %v5651_v10 }
  0x5e   : > { %1280 = vmatprep.mubr.bf16.mxu1 %v7405_v2 }
  0x60   : > { %1410 = vmatpush1.bf16.msra.mxu0 %v5649_v27 }
  0x63   : > { %4749 = vmatmul.mubr.msk.bf16.gmra.mxu0 %vm681_vm0, %v4737_v26  ;;  %v1181_v26 = vsel %vm1166_vm2, %v1178_v13, %v1180_v20 }
  0x64   : > { %1072 = vmatprep.mubr.bf16.mxu0 %v7405_v2 }
  0x65   : > { %4762 = vmatmul.mubr.msk.bf16.gmra.mxu1 %vm681_vm0, %v1173_v21 }
  0x66   : > { %1290 = vmatprep.mubr.bf16.mxu1 %v7405_v2 }
  0x6b   : > { %4750 = vmatmul.mubr.msk.bf16.gmra.mxu0 %vm681_vm0, %v4738_v31  ;;  %v1183_v31 = vsel %vm1166_vm2, %v1180_v20, %v1182_v30 }
  0x6c   : > { %1082 = vmatprep.mubr.bf16.mxu0 %v7405_v2 }
  0x6d   : > { %4763 = vmatmul.mubr.msk.bf16.gmra.mxu1 %vm681_vm0, %v1175_v11 }
  0x6e   : > { %1300 = vmatprep.mubr.bf16.mxu1 %v7405_v2 }
  0x73   : > { %4751 = vmatmul.mubr.msk.bf16.gmra.mxu0 %vm681_vm0, %v4739_v36 }
  0x74   : > { %1092 = vmatprep.mubr.bf16.mxu0 %v7405_v2 }
  0x75   : > { %4764 = vmatmul.mubr.msk.bf16.gmra.mxu1 %vm681_vm0, %v1177_v12 }
  0x76   : > { %1310 = vmatprep.mubr.bf16.mxu1 %v7405_v2 }
  0x7b   : > { %4752 = vmatmul.mubr.msk.bf16.gmra.mxu0 %vm681_vm0, %v4740_v46 }
  0x7c   : > { %1102 = vmatprep.mubr.bf16.mxu0 %v7405_v2 }
  0x7d   : > { %4765 = vmatmul.mubr.msk.bf16.gmra.mxu1 %vm681_vm0, %v1179_v15 }
  0x7e   : > { %1320 = vmatprep.mubr.bf16.mxu1 %v7405_v2 }
  0x83   : > { %4753 = vmatmul.mubr.msk.bf16.gmra.mxu0 %vm681_vm0, %v4741_v55 }
  0x84   : > { %1112 = vmatprep.mubr.bf16.mxu0 %v7405_v2 }
  0x85   : > { %4766 = vmatmul.mubr.msk.bf16.gmra.mxu1 %vm681_vm0, %v1181_v26 }
  0x86   : > { %1330 = vmatprep.mubr.bf16.mxu1 %v7405_v2 }
  0x8b   : > { %4754 = vmatmul.mubr.msk.bf16.gmra.mxu0 %vm681_vm0, %v4742_v35 }
  0x8c   : > { %1122 = vmatprep.mubr.bf16.mxu0 %v7405_v2 }
  0x8d   : > { %4767 = vmatmul.mubr.msk.bf16.gmra.mxu1 %vm681_vm0, %v1183_v31 }
  0x8e   : > { %1595 = vmatprep.mubr.bf16.mxu1 %v7405_v2 }
  0x93   : > { %4755 = vmatmul.mubr.msk.bf16.gmra.mxu0 %vm681_vm0, %v4743_v37 }
  0x94   : > { %1427 = vmatprep.mubr.bf16.mxu0 %v7405_v2 }
  0x95   : > { %4784 = vmatmul.mubr.msk.bf16.vlgmr.msra.gmra.mxu1 %vm681_vm0, %v6057_v14 }
  0x96   : > { %1605 = vmatprep.mubr.bf16.mxu1 %v7405_v2 }
  0x9b   : > { %4772 = vmatmul.mubr.msk.bf16.vlgmr.msra.gmra.mxu0 %vm681_vm0, %v5934_v17 }
  0x9c   : > { %1437 = vmatprep.mubr.bf16.mxu0 %v7405_v2 }
  0x9d   : > { %4785 = vmatmul.mubr.msk.bf16.gmra.mxu1 %vm681_vm0, %v6065_v22 }
  0x9e   : > { %1615 = vmatprep.mubr.bf16.mxu1 %v7405_v2 }
  0xa3   : > { %4773 = vmatmul.mubr.msk.bf16.gmra.mxu0 %vm681_vm0, %v5948_v23 }
  0xa4   : > { %1447 = vmatprep.mubr.bf16.mxu0 %v7405_v2 }
  0xa5   : > { %4786 = vmatmul.mubr.msk.bf16.gmra.mxu1 %vm681_vm0, %v6075_v38 }
  0xa6   : > { %1625 = vmatprep.mubr.bf16.mxu1 %v7405_v2 }
  0xab   : > { %4774 = vmatmul.mubr.msk.bf16.gmra.mxu0 %vm681_vm0, %v5962_v28 }
  0xac   : > { %1457 = vmatprep.mubr.bf16.mxu0 %v7405_v2 }
  0xad   : > { %4787 = vmatmul.mubr.msk.bf16.gmra.mxu1 %vm681_vm0, %v6085_v47 }
  0xae   : > { %1635 = vmatprep.mubr.bf16.mxu1 %v7405_v2 }
  0xb3   : > { %4775 = vmatmul.mubr.msk.bf16.gmra.mxu0 %vm681_vm0, %v5974_v33 }
  0xb4   : > { %1467 = vmatprep.mubr.bf16.mxu0 %v7405_v2 }
  0xb5   : > { %4788 = vmatmul.mubr.msk.bf16.gmra.mxu1 %vm681_vm0, %v6091_v53 }
  0xb6   : > { %1645 = vmatprep.mubr.bf16.mxu1 %v7405_v2 }
  0xbb   : > { %4776 = vmatmul.mubr.msk.bf16.gmra.mxu0 %vm681_vm0, %v6003_v49 }
  0xbc   : > { %1477 = vmatprep.mubr.bf16.mxu0 %v7405_v2 }
  0xbd   : > { %4789 = vmatmul.mubr.msk.bf16.gmra.mxu1 %vm681_vm0, %v6121_v62 }
  0xbe   : > { %1655 = vmatprep.mubr.bf16.mxu1 %v7405_v2 }
  0xc3   : > { %4777 = vmatmul.mubr.msk.bf16.gmra.mxu0 %vm681_vm0, %v6037_v63 }
  0xc4   : > { %1487 = vmatprep.mubr.bf16.mxu0 %v7405_v2 }
  0xc5   : > { %4790 = vmatmul.mubr.msk.bf16.gmra.mxu1 %vm681_vm0, %v6134_v4 }
  0xc6   : > { %1665 = vmatprep.mubr.bf16.mxu1 %v7405_v2 }
  0xcb   : > { %4778 = vmatmul.mubr.msk.bf16.gmra.mxu0 %vm681_vm0, %v6051_v9 }
  0xcc   : > { %1497 = vmatprep.mubr.bf16.mxu0 %v7405_v2 }
  0xcd   : > { %4791 = vmatmul.mubr.msk.bf16.gmra.mxu1 %vm681_vm0, %v660_v29 }
  0xd3   : > { %4779 = vmatmul.mubr.msk.bf16.gmra.mxu0 %vm681_vm0, %v6060_v16 }
  0xd5   : > { %v889_v17 = vpop.f32.mrf.mxu1 }
  0xd7   : > { %v891_v23 = vpop.f32.mrf.mxu1 }
  0xd9   : > { %v893_v28 = vpop.f32.mrf.mxu1 }
  0xdb   : > { %v6294_v33 = vpop.f32.mrf.mxu1  ;;  %v740_v36 = vpop.f32.mrf.mxu0 }
  0xdc   : > { %v6296_v41 = vadd.f32 %v889_v17, %v740_v36 }
  0xdd   : > { %v899_v45 = vpop.f32.mrf.mxu1  ;;  %v742_v46 = vpop.f32.mrf.mxu0 }
  0xde   : > { %v6298_v49 = vadd.f32 %v891_v23, %v742_v46 }
  0xdf   : > { %v901_v51 = vpop.f32.mrf.mxu1  ;;  %v744_v54 = vpop.f32.mrf.mxu0 }
  0xe0   : > { %v6300_v55 = vadd.f32 %v893_v28, %v744_v54 }
  0xe1   : > { %v903_v58 = vpop.f32.mrf.mxu1  ;;  %v6302_v59 = vpop.f32.mrf.mxu0 }
  0xe3   : > { %v6304_v63 = vpop.f32.mrf.mxu1  ;;  %v750_v0 = vpop.f32.mrf.mxu0 }
  0xe4   : > { %v6306_v9 = vadd.f32 %v899_v45, %v750_v0 }
  0xe5   : > { %v909_v14 = vpop.f32.mrf.mxu1  ;;  %v752_v16 = vpop.f32.mrf.mxu0 }
  0xe6   : > { %v6308_v22 = vadd.f32 %v901_v51, %v752_v16 }
  0xe7   : > { %v911_v32 = vpop.f32.mrf.mxu1  ;;  %v754_v34 = vpop.f32.mrf.mxu0 }
  0xe8   : > { %v6310_v35 = vadd.f32 %v903_v58, %v754_v34 }
  0xe9   : > { %v913_v37 = vpop.f32.mrf.mxu1  ;;  %v6312_v38 = vpop.f32.mrf.mxu0 }
  0xeb   : > { %v6314_v39 = vpop.f32.mrf.mxu1  ;;  %v760_v40 = vpop.f32.mrf.mxu0 }
  0xec   : > { %v6316_v42 = vadd.f32 %v909_v14, %v760_v40 }
  0xed   : > { %v919_v43 = vpop.f32.mrf.mxu1  ;;  %v762_v44 = vpop.f32.mrf.mxu0 }
  0xee   : > { %v6318_v47 = vadd.f32 %v911_v32, %v762_v44 }
  0xef   : > { %v921_v48 = vpop.f32.mrf.mxu1  ;;  %v764_v50 = vpop.f32.mrf.mxu0 }
  0xf0   : > { %v6320_v52 = vadd.f32 %v913_v37, %v764_v50 }
  0xf1   : > { %v923_v53 = vpop.f32.mrf.mxu1  ;;  %v6322_v56 = vpop.f32.mrf.mxu0 }
  0xf3   : > { %v6324_v57 = vpop.f32.mrf.mxu1  ;;  %v770_v60 = vpop.f32.mrf.mxu0 }
  0xf4   : > { %v6326_v61 = vadd.f32 %v919_v43, %v770_v60 }
  0xf5   : > { %v929_v62 = vpop.f32.mrf.mxu1  ;;  %v772_v1 = vpop.f32.mrf.mxu0 }
  0xf6   : > { %v6328_v3 = vadd.f32 %v921_v48, %v772_v1 }
  0xf7   : > { %v931_v4 = vpop.f32.mrf.mxu1  ;;  %v774_v5 = vpop.f32.mrf.mxu0 }
  0xf8   : > { %v6330_v6 = vadd.f32 %v923_v53, %v774_v5 }
  0xf9   : > { %v933_v7 = vpop.f32.mrf.mxu1  ;;  %v6332_v8 = vpop.f32.mrf.mxu0 }
  0xfb   : > { %v6334_v10 = vpop.f32.mrf.mxu1  ;;  %v780_v18 = vpop.f32.mrf.mxu0 }
  0xfc   : > { %v6336_v27 = vadd.f32 %v929_v62, %v780_v18 }
  0xfd   : > { %v939_v21 = vpop.f32.mrf.mxu1  ;;  %v782_v11 = vpop.f32.mrf.mxu0 }
  0xfe   : > { %v6338_v12 = vadd.f32 %v931_v4, %v782_v11 }
  0xff   : > { %v941_v13 = vpop.f32.mrf.mxu1  ;;  %v784_v15 = vpop.f32.mrf.mxu0 }
 0x100   : > { %v6340_v19 = vadd.f32 %v933_v7, %v784_v15 }
 0x101   : > { %v943_v20 = vpop.f32.mrf.mxu1  ;;  %v6342_v24 = vpop.f32.mrf.mxu0 }
 0x103   : > { %v6344_v26 = vpop.f32.mrf.mxu1  ;;  %v790_v29 = vpop.f32.mrf.mxu0 }
 0x104   : > { %v6346_v30 = vadd.f32 %v939_v21, %v790_v29 }
 0x105   : > { %v949_v31 = vpop.f32.mrf.mxu1  ;;  %v792_v17 = vpop.f32.mrf.mxu0 }
 0x106   : > { %v6348_v23 = vadd.f32 %v941_v13, %v792_v17 }
 0x107   : > { %v951_v28 = vpop.f32.mrf.mxu1  ;;  %v794_v36 = vpop.f32.mrf.mxu0 }
 0x108   : > { %v6350_v45 = vadd.f32 %v943_v20, %v794_v36 }
 0x109   : > { %v953_v46 = vpop.f32.mrf.mxu1  ;;  %v6352_v51 = vpop.f32.mrf.mxu0 }
 0x10b   : > { %v6354_v54 = vpop.f32.mrf.mxu1  ;;  %v800_v58 = vpop.f32.mrf.mxu0 }
 0x10c   : > { %v6356_v0 = vadd.f32 %v949_v31, %v800_v58 }
 0x10d   : > { %v959_v14 = vpop.f32.mrf.mxu1  ;;  %v802_v16 = vpop.f32.mrf.mxu0 }
 0x10e   : > { %v6358_v32 = vadd.f32 %v951_v28, %v802_v16 }
 0x10f   : > { %v961_v34 = vpop.f32.mrf.mxu1  ;;  %v804_v37 = vpop.f32.mrf.mxu0 }
 0x110   : > { %v6360_v40 = vadd.f32 %v953_v46, %v804_v37 }
 0x111   : > { %v963_v43 = vpop.f32.mrf.mxu1  ;;  %v6362_v44 = vpop.f32.mrf.mxu0 }
 0x113   : > { %v6364_v48 = vpop.f32.mrf.mxu1  ;;  %v810_v50 = vpop.f32.mrf.mxu0 }
 0x114   : > { %7411 = vst [vmem:[#allocation3_spill] sm:$0xff] %v6364_v48  ;;  %v6366_v53 = vadd.f32 %v959_v14, %v810_v50 }
 0x115   : > { %v1262_v60 = vpop.f32.mrf.mxu1  ;;  %v812_v62 = vpop.f32.mrf.mxu0 }
 0x116   : > { %v6368_v1 = vadd.f32 %v961_v34, %v812_v62 }
 0x117   : > { %v1264_v4 = vpop.f32.mrf.mxu1  ;;  %v814_v5 = vpop.f32.mrf.mxu0 }
 0x118   : > { %v6370_v7 = vadd.f32 %v963_v43, %v814_v5 }
 0x119   : > { %v1266_v18 = vpop.f32.mrf.mxu1  ;;  %v6372_v21 = vpop.f32.mrf.mxu0 }
 0x11a   : > { %7412 = vst [vmem:[#allocation4_spill] sm:$0xff] %v6372_v21 }
 0x11b   : > { %v6374_v11 = vpop.f32.mrf.mxu1  ;;  %v1054_v13 = vpop.f32.mrf.mxu0 }
 0x11c   : > { %v1133_v15 = vadd.f32 %v1054_v13, %v6296_v41 }
 0x11d   : > { %v1272_v20 = vpop.f32.mrf.mxu1  ;;  %v1056_v29 = vpop.f32.mrf.mxu0 }
 0x11e   : > { %v1134_v31 = vadd.f32 %v1056_v29, %v6298_v49  ;;  %v6378_v28 = vadd.f32 %v1262_v60, %v1133_v15 }
 0x11f   : > { %v1274_v17 = vpop.f32.mrf.mxu1  ;;  %v1058_v36 = vpop.f32.mrf.mxu0 }
 0x120   : > { %v1135_v46 = vadd.f32 %v1058_v36, %v6300_v55  ;;  %v6381_v14 = vadd.f32 %v1264_v4, %v1134_v31 }
 0x121   : > { %v1276_v58 = vpop.f32.mrf.mxu1  ;;  %v6383_v16 = vpop.f32.mrf.mxu0 }
 0x122   : > { %v6387_v37 = vadd.f32 %v1266_v18, %v1135_v46 }
 0x123   : > { %v6385_v34 = vpop.f32.mrf.mxu1  ;;  %v1064_v41 = vpop.f32.mrf.mxu0 }
 0x124   : > { %v1137_v43 = vadd.f32 %v1064_v41, %v6306_v9 }
 0x125   : > { %v1282_v50 = vpop.f32.mrf.mxu1  ;;  %v1066_v49 = vpop.f32.mrf.mxu0 }
 0x126   : > { %v1138_v60 = vadd.f32 %v1066_v49, %v6308_v22  ;;  %v6391_v5 = vadd.f32 %v1272_v20, %v1137_v43 }
 0x127   : > { %v1284_v62 = vpop.f32.mrf.mxu1  ;;  %v1068_v55 = vpop.f32.mrf.mxu0 }
 0x128   : > { %v1139_v4 = vadd.f32 %v1068_v55, %v6310_v35  ;;  %v6394_v15 = vadd.f32 %v1274_v17, %v1138_v60 }
 0x129   : > { %v1286_v13 = vpop.f32.mrf.mxu1  ;;  %v6396_v29 = vpop.f32.mrf.mxu0 }
 0x12a   : > { %v6400_v31 = vadd.f32 %v1276_v58, %v1139_v4 }
 0x12b   : > { %v6398_v18 = vpop.f32.mrf.mxu1  ;;  %v1074_v9 = vpop.f32.mrf.mxu0 }
 0x12c   : > { %v1141_v36 = vadd.f32 %v1074_v9, %v6316_v42 }
 0x12d   : > { %v1292_v46 = vpop.f32.mrf.mxu1  ;;  %v1076_v22 = vpop.f32.mrf.mxu0 }
 0x12e   : > { %v1142_v20 = vadd.f32 %v1076_v22, %v6318_v47  ;;  %v6404_v43 = vadd.f32 %v1282_v50, %v1141_v36 }
 0x12f   : > { %v1294_v41 = vpop.f32.mrf.mxu1  ;;  %v1078_v35 = vpop.f32.mrf.mxu0 }
 0x130   : > { %v1143_v17 = vadd.f32 %v1078_v35, %v6320_v52  ;;  %v6407_v60 = vadd.f32 %v1284_v62, %v1142_v20 }
 0x131   : > { %v1296_v49 = vpop.f32.mrf.mxu1  ;;  %v6409_v55 = vpop.f32.mrf.mxu0 }
 0x132   : > { %v6413_v4 = vadd.f32 %v1286_v13, %v1143_v17 }
 0x133   : > { %v6411_v58 = vpop.f32.mrf.mxu1  ;;  %v1084_v42 = vpop.f32.mrf.mxu0 }
 0x134   : > { %v1145_v9 = vadd.f32 %v1084_v42, %v6326_v61 }
 0x135   : > { %v1302_v2 = vpop.f32.mrf.mxu1  ;;  %v1086_v47 = vpop.f32.mrf.mxu0 }
 0x136   : > { %v1146_v50 = vadd.f32 %v1086_v47, %v6328_v3  ;;  %v6417_v22 = vadd.f32 %v1292_v46, %v1145_v9 }
 0x137   : > { %v1304_v36 = vpop.f32.mrf.mxu1  ;;  %v1088_v52 = vpop.f32.mrf.mxu0 }
 0x138   : > { %v1147_v62 = vadd.f32 %v1088_v52, %v6330_v6  ;;  %v6420_v35 = vadd.f32 %v1294_v41, %v1146_v50 }
 0x139   : > { %v1306_v20 = vpop.f32.mrf.mxu1  ;;  %v6422_v25 = vpop.f32.mrf.mxu0 }
 0x13a   : > { %v6426_v17 = vadd.f32 %v1296_v49, %v1147_v62 }
 0x13b   : > { %v6424_v13 = vpop.f32.mrf.mxu1  ;;  %v1094_v61 = vpop.f32.mrf.mxu0 }
 0x13c   : > { %7413 = vst [vmem:[#allocation5_spill] sm:$0xff] %v6424_v13  ;;  %v1149_v42 = vadd.f32 %v1094_v61, %v6336_v27 }
 0x13d   : > { %v1312_v48 = vpop.f32.mrf.mxu1  ;;  %v1096_v3 = vpop.f32.mrf.mxu0 }
 0x13e   : > { %v1150_v46 = vadd.f32 %v1096_v3, %v6338_v12  ;;  %v6430_v47 = vadd.f32 %v1302_v2, %v1149_v42 }
 0x13f   : > { %v1314_v9 = vpop.f32.mrf.mxu1  ;;  %v1098_v6 = vpop.f32.mrf.mxu0 }
 0x140   : > { %v1151_v41 = vadd.f32 %v1098_v6, %v6340_v19  ;;  %v6433_v52 = vadd.f32 %v1304_v36, %v1150_v46 }
 0x141   : > { %v1316_v50 = vpop.f32.mrf.mxu1  ;;  %v6435_v21 = vpop.f32.mrf.mxu0 }
 0x142   : > { %7414 = vst [vmem:[#allocation6_spill] sm:$0xff] %v6433_v52  ;;  %v6439_v62 = vadd.f32 %v1306_v20, %v1151_v41 }
 0x143   : > { %v6437_v49 = vpop.f32.mrf.mxu1  ;;  %v1104_v27 = vpop.f32.mrf.mxu0 }
 0x144   : > { %7415 = vst [vmem:[#allocation7_spill] sm:$0xff] %v6437_v49  ;;  %7416 = vst [vmem:[#allocation8_spill] sm:$0xff] %v6439_v62  ;;  %v1153_v61 = vadd.f32 %v1104_v27, %v6346_v30 }
 0x145   : > { %v1322_v13 = vpop.f32.mrf.mxu1  ;;  %v1106_v12 = vpop.f32.mrf.mxu0 }
 0x146   : > { %v1154_v2 = vadd.f32 %v1106_v12, %v6348_v23  ;;  %v6443_v3 = vadd.f32 %v1312_v48, %v1153_v61 }
 0x147   : > { %v1324_v42 = vpop.f32.mrf.mxu1  ;;  %v1108_v19 = vpop.f32.mrf.mxu0 }
 0x148   : > { %v1155_v36 = vadd.f32 %v1108_v19, %v6350_v45  ;;  %v6446_v6 = vadd.f32 %v1314_v9, %v1154_v2  ;;  %v956_v45 = vadd.f32 %v6354_v54, %v6362_v44 }
 0x149   : > { %v1326_v46 = vpop.f32.mrf.mxu1  ;;  %v6448_v52 = vpop.f32.mrf.mxu0 }
 0x14a   : > { %v6450_v41 = vadd.f32 %v1316_v50, %v1155_v36  ;;  %v1709_v36 = vlaneseq }
 0x14b   : > { %v1328_v20 = vpop.f32.mrf.mxu1  ;;  %v1114_v49 = vpop.f32.mrf.mxu0 }
 0x14c   : > { %7417 = vst [vmem:[#allocation9_spill] sm:$0xff] %v6450_v41  ;;  %v1157_v30 = vadd.f32 %v1114_v49, %v6356_v0  ;;  %v6468_v54 = vshrl.u32 %v1709_v36, 7 }
 0x14d   : > { %v1332_v27 = vpop.f32.mrf.mxu1  ;;  %v1116_v62 = vpop.f32.mrf.mxu0 }
 0x14e   : > { %v1158_v23 = vadd.f32 %v1116_v62, %v6358_v32  ;;  %v6454_v61 = vadd.f32 %v1322_v13, %v1157_v30 }
 0x14f   : > { %v1334_v48 = vpop.f32.mrf.mxu1  ;;  %v1118_v12 = vpop.f32.mrf.mxu0 }
 0x150   : > { %7418 = vst [vmem:[#allocation10_spill] sm:$0xff] %v6454_v61  ;;  %v1159_v9 = vadd.f32 %v1118_v12, %v6360_v40  ;;  %v6459_v19 = vadd.f32 %v1324_v42, %v1158_v23 }
 0x151   : > { %v1336_v2 = vpop.f32.mrf.mxu1  ;;  %v1120_v50 = vpop.f32.mrf.mxu0 }
 0x152   : > { %v1160_v41 = vadd.f32 %v1120_v50, %v956_v45  ;;  %v6463_v49 = vadd.f32 %v1326_v46, %v1159_v9 }
 0x153   : > { %v6461_v0 = vpop.f32.mrf.mxu1  ;;  %v1124_v32 = vpop.f32.mrf.mxu0 }
 0x154   : > { %7419 = vst [vmem:[#allocation11_spill] sm:$0xff] %v6461_v0  ;;  %v1161_v13 = vadd.f32 %v1124_v32, %v6366_v53  ;;  %v6466_v30 = vadd.f32 %v1328_v20, %v1160_v41  ;;  %v1711_v53 = vsub.s32 0, %v6468_v54  ;;  %v896_v20 = vadd.f32 %v6294_v33, %v6302_v59  ;;  %v539_v33 = vld [vmem:[%s7393_s4] sm:$0x3] }
 0x155   : > { %v1597_v62 = vpop.f32.mrf.mxu1  ;;  %v1126_v61 = vpop.f32.mrf.mxu0 }
 0x156   : > { %v1162_v40 = vadd.f32 %v1126_v61, %v6368_v1  ;;  %v6471_v42 = vadd.f32 %v1332_v27, %v1161_v13  ;;  %v538_v1 = vld [vmem:[%s7392_s3] sm:$0x3] }
 0x157   : > { %v1599_v44 = vpop.f32.mrf.mxu1  ;;  %v1128_v23 = vpop.f32.mrf.mxu0  ;;  %v6488_v36 = vrot.slane %v538_v1, %v1711_v53 }
 0x158   : > { %7420 = vst [vmem:[#allocation12_spill] sm:$0xff] %v6471_v42  ;;  %v1163_v12 = vadd.f32 %v1128_v23, %v6370_v7  ;;  %v6474_v46 = vadd.f32 %v1334_v48, %v1162_v40  ;;  %v1136_v7 = vadd.f32 %v6383_v16, %v896_v20  ;;  %v906_v16 = vadd.f32 %v6304_v63, %v6312_v38 }
 0x159   : > { %v1601_v45 = vpop.f32.mrf.mxu1  ;;  %v6476_v9 = vpop.f32.mrf.mxu0  ;;  %v6498_v20 = vrot.slane %v539_v33, %v1711_v53 }
 0x15a   : > { %7421 = vst [vmem:[#allocation13_spill] sm:$0xff] %v6474_v46  ;;  %v6484_v27 = vadd.f32 %v1336_v2, %v1163_v12  ;;  %v1344_v2 = vadd.f32 %v6374_v11, %v1136_v7 }
 0x15b   : > { %v1603_v41 = vpop.f32.mrf.mxu1  ;;  %v1429_v61 = vpop.f32.mrf.mxu0 }
 0x15c   : > { %7422 = vst [vmem:[#allocation14_spill] sm:$0xff] %v6484_v27  ;;  %v1508_v48 = vadd.f32 %v1429_v61, %v6378_v28  ;;  %v1715_v61 = vsub.s32 1, %v6468_v54 }
 0x15d   : > { %v1607_v50 = vpop.f32.mrf.mxu1  ;;  %v1431_v32 = vpop.f32.mrf.mxu0 }
 0x15e   : > { %v1676_v59 = vadd.f32 %v1597_v62, %v1508_v48  ;;  %v1509_v0 = vadd.f32 %v1431_v32, %v6381_v14 }
 0x15f   : > { %v1609_v13 = vpop.f32.mrf.mxu1  ;;  %v1433_v40 = vpop.f32.mrf.mxu0 }
 0x160   : > { %v1510_v23 = vadd.f32 %v1433_v40, %v6387_v37  ;;  %v1719_v28 = vmul.f32 %v6488_v36, %v1676_v59  ;;  %v1140_v37 = vadd.f32 %v6396_v29, %v906_v16  ;;  %v6506_v59 = vrot.slane %v538_v1, %v1715_v61 }
 0x161   : > { %v1611_v12 = vpop.f32.mrf.mxu1  ;;  %v1435_v27 = vpop.f32.mrf.mxu0  ;;  %v1677_v42 = vadd.f32 %v1599_v44, %v1509_v0  ;;  %v916_v0 = vadd.f32 %v6314_v39, %v6322_v56 }
 0x162   : > { %v1678_v62 = vadd.f32 %v1601_v45, %v1510_v23  ;;  %v1511_v48 = vadd.f32 %v1435_v27, %v1344_v2  ;;  %v1762_v53 = vadd.f32 %v6498_v20, %v1719_v28  ;;  %v1348_v23 = vadd.f32 %v6385_v34, %v1140_v37 }
 0x163   : > { %v1613_v46 = vpop.f32.mrf.mxu1  ;;  %v1439_v40 = vpop.f32.mrf.mxu0  ;;  %v1144_v37 = vadd.f32 %v6409_v55, %v916_v0 }
 0x164   : > { %v1721_v11 = vmul.f32 %v6488_v36, %v1678_v62  ;;  %v1679_v7 = vadd.f32 %v1603_v41, %v1511_v48  ;;  %v1512_v63 = vadd.f32 %v1439_v40, %v6391_v5  ;;  %v1794_v44 = vmax.f32 %v1762_v53, 0.0 }
 0x165   : > { %v1617_v38 = vpop.f32.mrf.mxu1  ;;  %v1441_v54 = vpop.f32.mrf.mxu0  ;;  %v6519_v40 = vrot.slane %v539_v33, %v1715_v61 }
 0x166   : > { %v1764_v14 = vadd.f32 %v6498_v20, %v1721_v11  ;;  %v1680_v45 = vadd.f32 %v1607_v50, %v1512_v63  ;;  %v1513_v27 = vadd.f32 %v1441_v54, %v6394_v15  ;;  %v1722_v5 = vmul.f32 %v6506_v59, %v1679_v7 }
 0x167   : > { %v6510_v32 = vpop.f32.mrf.mxu1  ;;  %v1443_v29 = vpop.f32.mrf.mxu0  ;;  %v1720_v15 = vmul.f32 %v6506_v59, %v1677_v42 }
 0x168   : > { %v1796_v41 = vmax.f32 %v1764_v14, 0.0  ;;  %v1681_v2 = vadd.f32 %v1609_v13, %v1513_v27  ;;  %v1514_v16 = vadd.f32 %v1443_v29, %v6400_v31  ;;  %v1723_v50 = vmul.f32 %v6488_v36, %v1680_v45 }
 0x169   : > { %v1621_v1 = vpop.f32.mrf.mxu1  ;;  %v1445_v28 = vpop.f32.mrf.mxu0  ;;  %v1765_v42 = vadd.f32 %v6519_v40, %v1722_v5  ;;  %v1763_v14 = vadd.f32 %v6519_v40, %v1720_v15  ;;  %v1352_v29 = vadd.f32 %v6398_v18, %v1144_v37 }
 0x16a   : > { %v1682_v62 = vadd.f32 %v1611_v12, %v1514_v16  ;;  %v1515_v48 = vadd.f32 %v1445_v28, %v1348_v23  ;;  %v1724_v13 = vmul.f32 %v6506_v59, %v1681_v2  ;;  %v6523_v11 = vmax.f32 %v1794_v44, %v1796_v41 }
 0x16b   : > { %v1623_v34 = vpop.f32.mrf.mxu1  ;;  %v1449_v31 = vpop.f32.mrf.mxu0  ;;  %v1766_v12 = vadd.f32 %v6498_v20, %v1723_v50  ;;  %v1797_v41 = vmax.f32 %v1765_v42, 0.0  ;;  %v1795_v15 = vmax.f32 %v1763_v14, 0.0 }
 0x16c   : > { %v1725_v39 = vmul.f32 %v6488_v36, %v1682_v62  ;;  %v1683_v56 = vadd.f32 %v1613_v46, %v1515_v48  ;;  %v1516_v7 = vadd.f32 %v1449_v31, %v6404_v43  ;;  %v1767_v27 = vadd.f32 %v6519_v40, %v1724_v13 }
 0x16d   : > { %v1627_v63 = vpop.f32.mrf.mxu1  ;;  %v1451_v33 = vpop.f32.mrf.mxu0  ;;  %v1798_v5 = vmax.f32 %v1766_v12, 0.0 }
 0x16e   : > { %v1768_v61 = vadd.f32 %v6498_v20, %v1725_v39  ;;  %v1726_v55 = vmul.f32 %v6506_v59, %v1683_v56  ;;  %v1684_v53 = vadd.f32 %v1617_v38, %v1516_v7  ;;  %v926_v38 = vadd.f32 %v6324_v57, %v6332_v8 }
 0x16f   : > { %v1629_v54 = vpop.f32.mrf.mxu1  ;;  %v1453_v45 = vpop.f32.mrf.mxu0  ;;  %v1517_v62 = vadd.f32 %v1451_v33, %v6407_v60  ;;  %v1799_v48 = vmax.f32 %v1767_v27, 0.0  ;;  %v6544_v56 = vmax.f32 %v1795_v15, %v1797_v41 }
 0x170   : > { %v1800_v46 = vmax.f32 %v1768_v61, 0.0  ;;  %v1518_v43 = vadd.f32 %v1453_v45, %v6413_v4  ;;  %v1727_v2 = vmul.f32 %v6488_v36, %v1684_v53  ;;  %v1769_v0 = vadd.f32 %v6519_v40, %v1726_v55 }
 0x171   : > { %v1631_v23 = vpop.f32.mrf.mxu1  ;;  %v1455_v16 = vpop.f32.mrf.mxu0  ;;  %v1148_v13 = vadd.f32 %v6422_v25, %v926_v38  ;;  %v1685_v25 = vadd.f32 %v6510_v32, %v1517_v62 }
 0x172   : > { %v1686_v44 = vadd.f32 %v1621_v1, %v1518_v43  ;;  %v1519_v50 = vadd.f32 %v1455_v16, %v1352_v29  ;;  %v1801_v18 = vmax.f32 %v1769_v0, 0.0  ;;  %v6540_v37 = vmax.f32 %v1798_v5, %v1800_v46 }
 0x173   : > { %v1633_v28 = vpop.f32.mrf.mxu1  ;;  %v1459_v4 = vpop.f32.mrf.mxu0  ;;  %v1770_v57 = vadd.f32 %v6498_v20, %v1727_v2  ;;  %v1356_v45 = vadd.f32 %v6411_v58, %v1148_v13  ;;  %v936_v46 = vadd.f32 %v6334_v10, %v6342_v24  ;;  %v1728_v58 = vmul.f32 %v6506_v59, %v1685_v25  ;;  %v7423_v13 = vld [vmem:[#allocation5_spill] sm:$0xff] }
 0x174   : > { %v1729_v31 = vmul.f32 %v6488_v36, %v1686_v44  ;;  %v1687_v8 = vadd.f32 %v1623_v34, %v1519_v50  ;;  %v1520_v1 = vadd.f32 %v1459_v4, %v6417_v22  ;;  %v6548_v42 = vmax.f32 %v1799_v48, %v1801_v18 }
 0x175   : > { %v1637_v39 = vpop.f32.mrf.mxu1  ;;  %v1461_v7 = vpop.f32.mrf.mxu0  ;;  %v946_v48 = vadd.f32 %v6344_v26, %v6352_v51  ;;  %v1771_v18 = vadd.f32 %v6519_v40, %v1728_v58 }
 0x176   : > { %v1772_v60 = vadd.f32 %v6498_v20, %v1729_v31  ;;  %v1521_v12 = vadd.f32 %v1461_v7, %v6420_v35  ;;  %v1688_v61 = vadd.f32 %v1627_v63, %v1520_v1  ;;  %v5541_v53 = vpack.i.bf16 %v6548_v42, %v6544_v56  ;;  %v7424_v7 = vld [vmem:[#allocation8_spill] sm:$0xff] }
 0x177   : > { %v6552_v33 = vpop.f32.mrf.mxu1  ;;  %v1463_v55 = vpop.f32.mrf.mxu0  ;;  %v1802_v35 = vmax.f32 %v1770_v57, 0.0  ;;  %v1730_v43 = vmul.f32 %v6506_v59, %v1687_v8 }
 0x178   : > { %v1804_v14 = vmax.f32 %v1772_v60, 0.0  ;;  %v1689_v34 = vadd.f32 %v1629_v54, %v1521_v12  ;;  %v1522_v22 = vadd.f32 %v1463_v55, %v6426_v17  ;;  %v1731_v32 = vmul.f32 %v6488_v36, %v1688_v61  ;;  %5542 = vrot.lane.b32.xlu0 %v5541_v53, %s5788_s24 }
 0x179   : > { %v1641_v27 = vpop.f32.mrf.mxu1  ;;  %v1465_v63 = vpop.f32.mrf.mxu0  ;;  %v1152_v17 = vadd.f32 %v6435_v21, %v936_v46  ;;  %v1773_v44 = vadd.f32 %v6519_v40, %v1730_v43  ;;  %v7425_v46 = vld [vmem:[#allocation6_spill] sm:$0xff] }
 0x17a   : > { %v1690_v29 = vadd.f32 %v1631_v23, %v1522_v22  ;;  %v1523_v41 = vadd.f32 %v1465_v63, %v1356_v45  ;;  %v1732_v5 = vmul.f32 %v6506_v59, %v1689_v34  ;;  %v6567_v10 = vmax.f32 %v1802_v35, %v1804_v14 }
 0x17b   : > { %v1643_v54 = vpop.f32.mrf.mxu1  ;;  %v1469_v2 = vpop.f32.mrf.mxu0  ;;  %v1774_v23 = vadd.f32 %v6498_v20, %v1731_v32  ;;  %v1360_v31 = vadd.f32 %v7423_v13, %v1152_v17  ;;  %v1805_v25 = vmax.f32 %v1773_v44, 0.0  ;;  %v1803_v22 = vmax.f32 %v1771_v18, 0.0 }
 0x17c   : > { %v1733_v24 = vmul.f32 %v6488_v36, %v1690_v29  ;;  %v1691_v16 = vadd.f32 %v1633_v28, %v1523_v41  ;;  %v1524_v0 = vadd.f32 %v1469_v2, %v6430_v47  ;;  %v1775_v28 = vadd.f32 %v6519_v40, %v1732_v5 }
 0x17d   : > { %v1647_v38 = vpop.f32.mrf.mxu1  ;;  %v1471_v50 = vpop.f32.mrf.mxu0  ;;  %v1806_v61 = vmax.f32 %v1774_v23, 0.0  ;;  %v6590_v58 = vmax.f32 %v1803_v22, %v1805_v25  ;;  %v7428_v25 = vld [vmem:[#allocation10_spill] sm:$0xff]  ;;  %v7429_v22 = vld [vmem:[#allocation4_spill] sm:$0xff] }
 0x17e   : > { %v1776_v21 = vadd.f32 %v6498_v20, %v1733_v24  ;;  %v1734_v15 = vmul.f32 %v6506_v59, %v1691_v16  ;;  %v1692_v62 = vadd.f32 %v1637_v39, %v1524_v0  ;;  %v1156_v39 = vadd.f32 %v6448_v52, %v946_v48 }
 0x17f   : > { %v1649_v4 = vpop.f32.mrf.mxu1  ;;  %v1473_v47 = vpop.f32.mrf.mxu0  ;;  %v1807_v45 = vmax.f32 %v1775_v28, 0.0  ;;  %v1525_v35 = vadd.f32 %v1471_v50, %v7425_v46 }
 0x180   : > { %v1808_v57 = vmax.f32 %v1776_v21, 0.0  ;;  %v1777_v8 = vadd.f32 %v6519_v40, %v1734_v15  ;;  %v1735_v1 = vmul.f32 %v6488_v36, %v1692_v62  ;;  %v1526_v60 = vadd.f32 %v1473_v47, %v7424_v7  ;;  %v7427_v62 = vld [vmem:[#allocation9_spill] sm:$0xff] }
 0x181   : > { %v1651_v12 = vpop.f32.mrf.mxu1  ;;  %v1475_v26 = vpop.f32.mrf.mxu0  ;;  %v1693_v0 = vadd.f32 %v6552_v33, %v1525_v35 }
 0x182   : > { %v1809_v51 = vmax.f32 %v1777_v8, 0.0  ;;  %v1778_v55 = vadd.f32 %v6498_v20, %v1735_v1  ;;  %v1694_v53 = vadd.f32 %v1641_v27, %v1526_v60  ;;  %v1527_v14 = vadd.f32 %v1475_v26, %v1360_v31 }
 0x183   : > { %v1653_v34 = vpop.f32.mrf.mxu1  ;;  %v1479_v43 = vpop.f32.mrf.mxu0  ;;  %v6586_v32 = vmax.f32 %v1806_v61, %v1808_v57  ;;  %v1736_v31 = vmul.f32 %v6506_v59, %v1693_v0 }
 0x184   : > { %v1737_v63 = vmul.f32 %v6488_v36, %v1694_v53  ;;  %v1528_v52 = vadd.f32 %v1479_v43, %v6443_v3  ;;  %v1695_v41 = vadd.f32 %v1643_v54, %v1527_v14  ;;  %v6592_v5 = vmax.f32 %v1807_v45, %v1809_v51  ;;  %v7426_v3 = vld [vmem:[#allocation7_spill] sm:$0xff] }
 0x185   : > { %v1657_v29 = vpop.f32.mrf.mxu1  ;;  %v1481_v17 = vpop.f32.mrf.mxu0  ;;  %v1364_v50 = vadd.f32 %v7426_v3, %v1156_v39  ;;  %v1810_v28 = vmax.f32 %v1778_v55, 0.0  ;;  %v7430_v45 = vld [vmem:[#allocation3_spill] sm:$0xff] }
 0x186   : > { %v1780_v27 = vadd.f32 %v6498_v20, %v1737_v63  ;;  %v1696_v2 = vadd.f32 %v1647_v38, %v1528_v52  ;;  %v1529_v24 = vadd.f32 %v1481_v17, %v6446_v6  ;;  %v5546_v23 = vpack.i.bf16 %v6592_v5, %v6590_v58 }
 0x187   : > { %v1659_v16 = vpop.f32.mrf.mxu1  ;;  %v1483_v44 = vpop.f32.mrf.mxu0  ;;  %v1738_v38 = vmul.f32 %v6506_v59, %v1695_v41  ;;  %v966_v46 = vadd.f32 %v7430_v45, %v7429_v22 }
 0x188   : > { %v1812_v54 = vmax.f32 %v1780_v27, 0.0  ;;  %v1739_v21 = vmul.f32 %v6488_v36, %v1696_v2  ;;  %v1697_v15 = vadd.f32 %v1649_v4, %v1529_v24  ;;  %v1530_v48 = vadd.f32 %v1483_v44, %v7427_v62  ;;  %5547 = vrot.lane.b32.xlu0 %v5546_v23, %s5788_s24 }
 0x189   : > { %v1661_v18 = vpop.f32.mrf.mxu1  ;;  %v1485_v6 = vpop.f32.mrf.mxu0  ;;  %v5561_v4 = vpack.i.bf16 %v6540_v37, %v6523_v11  ;;  %v1781_v26 = vadd.f32 %v6519_v40, %v1738_v38  ;;  %v1164_v2 = vadd.f32 %v6476_v9, %v966_v46  ;;  %v7431_v38 = vld [vmem:[#allocation12_spill] sm:$0xff] }
 0x18a   : > { %v1782_v33 = vadd.f32 %v6498_v20, %v1739_v21  ;;  %v1698_v47 = vadd.f32 %v1651_v12, %v1530_v48  ;;  %v1531_v13 = vadd.f32 %v1485_v6, %v1364_v50  ;;  %v1740_v57 = vmul.f32 %v6506_v59, %v1697_v15 }
 0x18b   : > { %v1489_v8 = vpop.f32.mrf.mxu0  ;;  %v1663_v1 = vpop.f32.mrf.mxu1  ;;  %v6609_v7 = vmax.f32 %v1810_v28, %v1812_v54  ;;  %v1813_v0 = vmax.f32 %v1781_v26, 0.0 }
 0x18c   : > { %v1741_v60 = vmul.f32 %v6488_v36, %v1698_v47  ;;  %v1699_v39 = vadd.f32 %v1653_v34, %v1531_v13  ;;  %v1532_v61 = vadd.f32 %v1489_v8, %v7428_v25  ;;  %5562 = vrot.lane.b32.xlu0 %v5561_v4, %s5788_s24  ;;  %v1779_v34 = vadd.f32 %v6519_v40, %v1736_v31  ;;  %v7432_v31 = vld [vmem:[#allocation13_spill] sm:$0xff] }
 0x18d   : > { %v1491_v12 = vpop.f32.mrf.mxu0  ;;  %v1667_v43 = vpop.f32.mrf.mxu1  ;;  %v1783_v63 = vadd.f32 %v6519_v40, %v1740_v57 }
 0x18e   : > { %v1784_v51 = vadd.f32 %v6498_v20, %v1741_v60  ;;  %v1742_v55 = vmul.f32 %v6506_v59, %v1699_v39  ;;  %v1700_v53 = vadd.f32 %v1657_v29, %v1532_v61  ;;  %v1533_v14 = vadd.f32 %v1491_v12, %v6459_v19  ;;  %v7433_v39 = vld [vmem:[#allocation11_spill] sm:$0xff] }
 0x18f   : > { %v1493_v35 = vpop.f32.mrf.mxu0  ;;  %v1814_v29 = vmax.f32 %v1782_v33, 0.0  ;;  %v1669_v54 = vpop.f32.mrf.mxu1  ;;  %v1811_v15 = vmax.f32 %v1779_v34, 0.0  ;;  %v1372_v25 = vadd.f32 %v7433_v39, %v1164_v2  ;;  %v5672_v39 = vld [vmem:[%s7395_s6 + $0x10] sm:$0xff]  }
 0x190   : > { %v1816_v52 = vmax.f32 %v1784_v51, 0.0  ;;  %v1743_v41 = vmul.f32 %v6488_v36, %v1700_v53  ;;  %v1701_v17 = vadd.f32 %v1659_v16, %v1533_v14  ;;  %v1534_v27 = vadd.f32 %v1493_v35, %v6463_v49  ;;  %v7434_v51 = vld [vmem:[#allocation14_spill] sm:$0xff] }
 0x191   : > { %v1495_v24 = vpop.f32.mrf.mxu0  ;;  %v1785_v19 = vadd.f32 %v6519_v40, %v1742_v55  ;;  %v1815_v16 = vmax.f32 %v1783_v63, 0.0  ;;  %v6634_v47 = vmax.f32 %v1811_v15, %v1813_v0  ;;  %v1671_v4 = vpop.f32.mrf.mxu1  ;;  %v5789_v15 = vmov 0.0  }
 0x192   : > { %v1786_v44 = vadd.f32 %v6498_v20, %v1743_v41  ;;  %v1744_v23 = vmul.f32 %v6506_v59, %v1701_v17  ;;  %v1702_v3 = vadd.f32 %v1661_v18, %v1534_v27  ;;  %v1535_v50 = vadd.f32 %v1495_v24, %v6466_v30  ;;  %5143 = vmatprep.subr.bf16.mxu0 %v5789_v15 }
 0x193   : > { %v1499_v21 = vpop.f32.mrf.mxu0  ;;  %v1817_v62 = vmax.f32 %v1785_v19, 0.0  ;;  %v6629_v49 = vmax.f32 %v1814_v29, %v1816_v52  ;;  %v1673_v52 = vpop.f32.mrf.mxu1  ;;  %5171 = vmatprep.subr.bf16.mxu1 %v5789_v15  ;;  %5187 = vmatprep.mubr.msk.bf16.mxu1 %vm5790_vm5, %v5789_v15 }
 0x194   : > { %v1745_v9 = vmul.f32 %v6488_v36, %v1702_v3  ;;  %v1703_v48 = vadd.f32 %v1663_v1, %v1535_v50  ;;  %v1787_v28 = vadd.f32 %v6519_v40, %v1744_v23  ;;  %v1536_v6 = vadd.f32 %v1499_v21, %v7431_v38  ;;  %v5659_v3 = vld [vmem:[%s7395_s6 + $0x38] sm:$0xff]   ;;  %v5667_v38 = vld [vmem:[%s7395_s6 + $0x20] sm:$0xff]   ;;  %5159 = vmatprep.mubr.msk.bf16.mxu0 %vm5790_vm5, %v5789_v15 }
 0x195   : > { %v1501_v33 = vpop.f32.mrf.mxu0  ;;  %v6636_v18 = vmax.f32 %v1815_v16, %v1817_v62  ;;  %v1818_v53 = vmax.f32 %v1786_v44, 0.0  ;;  %5144 = vmatpush3.bf16.msra.mxu0 %v5659_v3  ;;  %v5663_v62 = vld [vmem:[%s7394_s5 + $0x28] sm:$0xff]  }
 0x196   : > { %v1788_v30 = vadd.f32 %v6498_v20, %v1745_v9  ;;  %v1746_v13 = vmul.f32 %v6506_v59, %v1703_v48  ;;  %v1537_v57 = vadd.f32 %v1501_v33, %v7432_v31  ;;  %v1704_v8 = vadd.f32 %v1667_v43, %v1536_v6  ;;  %5145 = vmatprep.subr.bf16.mxu0 %v5789_v15  ;;  %v5664_v9 = vld [vmem:[%s7395_s6 + $0x28] sm:$0xff]   ;;  %v5666_v6 = vld [vmem:[%s7394_s5 + $0x18] sm:$0xff]   ;;  %v5668_v33 = vld [vmem:[%s7394_s5 + $0x10] sm:$0xff]  }
 0x197   : > { %v1503_v60 = vpop.f32.mrf.mxu0  ;;  %v5551_v1 = vpack.i.bf16 %v6636_v18, %v6634_v47  ;;  %v1819_v14 = vmax.f32 %v1787_v28, 0.0  ;;  %v5566_v48 = vpack.i.bf16 %v6586_v32, %v6567_v10  ;;  %v5665_v28 = vld [vmem:[%s7394_s5 + $0x20] sm:$0xff]   ;;  %v5670_v31 = vld [vmem:[%s7395_s6 + $0x18] sm:$0xff]  }
 0x198   : > { %v1820_v61 = vmax.f32 %v1788_v30, 0.0  ;;  %v1789_v12 = vadd.f32 %v6519_v40, %v1746_v13  ;;  %v1705_v26 = vadd.f32 %v1669_v54, %v1537_v57  ;;  %v1538_v55 = vadd.f32 %v1503_v60, %v7434_v51  ;;  %v5669_v30 = vld [vmem:[%s7394_s5 + $0x8] sm:$0xff]   ;;  %v5671_v13 = vld [vmem:[%s7394_s5] sm:$0xff]  }
 0x199   : > { %v1747_v22 = vmul.f32 %v6488_v36, %v1704_v8  ;;  %5552 = vrot.lane.b32.xlu1 %v5551_v1, %s5788_s24  ;;  %v1505_v45 = vpop.f32.mrf.mxu0 }
 0x19a   : > { %v1821_v46 = vmax.f32 %v1789_v12, 0.0  ;;  %v1748_v35 = vmul.f32 %v6506_v59, %v1705_v26  ;;  %v1706_v43 = vadd.f32 %v1671_v4, %v1538_v55  ;;  %v1539_v34 = vadd.f32 %v1505_v45, %v1372_v25  ;;  %v5677_v12 = vld [vmem:[%s7395_s6] sm:$0xff]  }
 0x19b   : > { %v1790_v63 = vadd.f32 %v6498_v20, %v1747_v22  ;;  %v6650_v41 = vmax.f32 %v1818_v53, %v1820_v61  ;;  %v5581_v61 = vpack.i.bf16 %v6629_v49, %v6609_v7 }
 0x19c   : > { %v1749_v17 = vmul.f32 %v6488_v36, %v1706_v43  ;;  %v1707_v27 = vadd.f32 %v1673_v52, %v1539_v34  ;;  %v6653_v2 = vmax.f32 %v1819_v14, %v1821_v46  ;;  %v1791_v29 = vadd.f32 %v6519_v40, %v1748_v35  ;;  %v5660_v36 = vld [vmem:[%s7394_s5 + $0x38] sm:$0xff]  }
 0x19d   : > { %v1822_v0 = vmax.f32 %v1790_v63, 0.0  ;;  %5172 = vmatpush3.bf16.msra.mxu1 %v5660_v36 }
 0x19e   : > { %v1792_v24 = vadd.f32 %v6498_v20, %v1749_v17  ;;  %v1750_v19 = vmul.f32 %v6506_v59, %v1707_v27  ;;  %v1823_v50 = vmax.f32 %v1791_v29, 0.0  ;;  %v5661_v20 = vld [vmem:[%s7395_s6 + $0x30] sm:$0xff]   ;;  %5173 = vmatprep.subr.bf16.mxu1 %v5789_v15 }
 0x19f   : > { %v5662_v59 = vld [vmem:[%s7394_s5 + $0x30] sm:$0xff]   ;;  %5146 = vmatpush3.bf16.msra.mxu0 %v5661_v20  ;;  %v5676_v20 = vld [vmem:[%s7395_s6 + $0x68] sm:$0xff]  }
 0x1a0   : > { %v1824_v44 = vmax.f32 %v1792_v24, 0.0  ;;  %v1793_v23 = vadd.f32 %v6519_v40, %v1750_v19  ;;  %5147 = vmatprep.subr.bf16.mxu0 %v5789_v15 }
 0x1a1   : > { %5174 = vmatpush3.bf16.msra.mxu1 %v5662_v59 }
 0x1a2   : > { %v1825_v54 = vmax.f32 %v1793_v23, 0.0  ;;  %v6665_v21 = vmax.f32 %v1822_v0, %v1824_v44  ;;  %5175 = vmatprep.subr.bf16.mxu1 %v5789_v15 }
 0x1a3   : > { %5148 = vmatpush3.bf16.msra.mxu0 %v5664_v9 }
 0x1a4   : > { %v6675_v40 = vmax.f32 %v1823_v50, %v1825_v54  ;;  %5149 = vmatprep.subr.bf16.mxu0 %v5789_v15 }
 0x1a5   : > { %5176 = vmatpush3.bf16.msra.mxu1 %v5663_v62 }
 0x1a6   : > { %v5556_v16 = vpack.i.bf16 %v6675_v40, %v6653_v2  ;;  %5177 = vmatprep.subr.bf16.mxu1 %v5789_v15 }
 0x1a7   : > { %5150 = vmatpush3.bf16.msra.mxu0 %v5667_v38 }
 0x1a8   : > { %5557 = vrot.lane.b32.xlu1 %v5556_v16, %s5788_s24  ;;  %5151 = vmatprep.subr.bf16.mxu0 %v5789_v15  ;;  %v5678_v16 = vld [vmem:[%s7395_s6 + $0x60] sm:$0xff]  }
 0x1a9   : > { %5178 = vmatpush3.bf16.msra.mxu1 %v5665_v28 }
 0x1aa   : > { %5179 = vmatprep.subr.bf16.mxu1 %v5789_v15 }
 0x1ab   : > { %5152 = vmatpush3.bf16.msra.mxu0 %v5670_v31 }
 0x1ac   : > { %5567 = vrot.lane.b32.xlu1 %v5566_v48, %s5788_s24  ;;  %5153 = vmatprep.subr.bf16.mxu0 %v5789_v15 }
 0x1ad   : > { %5180 = vmatpush3.bf16.msra.mxu1 %v5666_v6 }
 0x1ae   : > { %5181 = vmatprep.subr.bf16.mxu1 %v5789_v15 }
 0x1af   : > { %5154 = vmatpush3.bf16.msra.mxu0 %v5672_v39 }
 0x1b0   : > { %5155 = vmatprep.subr.bf16.mxu0 %v5789_v15 }
 0x1b1   : > { %5182 = vmatpush3.bf16.msra.mxu1 %v5668_v33 }
 0x1b2   : > { %5183 = vmatprep.subr.bf16.mxu1 %v5789_v15 }
 0x1b5   : > { %5184 = vmatpush3.bf16.msra.mxu1 %v5669_v30 }
 0x1b6   : > { %5185 = vmatprep.subr.bf16.mxu1 %v5789_v15 }
 0x1b9   : > { %5186 = vmatpush3.bf16.msra.mxu1 %v5671_v13  ;;  %v5679_v13 = vld [vmem:[%s7395_s6 + $0x58] sm:$0xff]  }
 0x1ba   : > { %5227 = vmatprep.subr.bf16.mxu1 %v5789_v15 }
 0x1ea   : > { %v5543_v57 = vpop.permute.xlu0 %5542 }
 0x1eb   : > { %v5545_v8 = vunpack.i.h.bf16 %v5543_v57  ;;  %v5544_v4 = vunpack.i.l.bf16 %v5543_v57 }
 0x1ed   : > { %v1915_v60 = vmax.f32 %v6548_v42, %v5545_v8  ;;  %v1914_v1 = vmax.f32 %v6544_v56, %v5544_v4  ;;  %v5674_v42 = vld [vmem:[%s7395_s6 + $0x8] sm:$0xff]   ;;  %v5591_v56 = vpack.i.bf16 %v6665_v21, %v6650_v41  ;;  %v5681_v8 = vld [vmem:[%s7395_s6 + $0x50] sm:$0xff]  }
 0x1ee   : > { %5156 = vmatpush3.bf16.msra.mxu0 %v5674_v42  ;;  %v5682_v42 = vld [vmem:[%s7394_s5 + $0x70] sm:$0xff]  }
 0x1ef   : > { %v5571_v25 = vpack.i.bf16 %v1915_v60, %v1914_v1  ;;  %5157 = vmatprep.subr.bf16.mxu0 %v5789_v15  ;;  %v5680_v1 = vld [vmem:[%s7394_s5 + $0x78] sm:$0xff]  }
 0x1f1   : > { %5572 = vrot.lane.b32.xlu0 %v5571_v25, %s5788_s24 }
 0x1f2   : > { %5158 = vmatpush3.bf16.msra.mxu0 %v5677_v12 }
 0x1f3   : > { %5199 = vmatprep.subr.bf16.mxu0 %v5789_v15 }
 0x1f5   : > { %5582 = vrot.lane.b32.xlu0 %v5581_v61, %s5788_s24  ;;  %v5683_v61 = vld [vmem:[%s7395_s6 + $0x48] sm:$0xff]  }
 0x1f9   : > { %5592 = vrot.lane.b32.xlu0 %v5591_v56, %s5788_s24 }
 0x1fa   : > { %v5548_v26 = vpop.permute.xlu0 %5547 }
 0x1fb   : > { %v5550_v51 = vunpack.i.h.bf16 %v5548_v26  ;;  %v5549_v55 = vunpack.i.l.bf16 %v5548_v26  ;;  %v5685_v26 = vld [vmem:[%s7395_s6 + $0x40] sm:$0xff]  }
 0x1fd   : > { %v1917_v53 = vmax.f32 %v6592_v5, %v5550_v51  ;;  %v1916_v14 = vmax.f32 %v6590_v58, %v5549_v55  ;;  %v5684_v55 = vld [vmem:[%s7394_s5 + $0x68] sm:$0xff]  }
 0x1fe   : > { %v5563_v24 = vpop.permute.xlu0 %5562 }
 0x1ff   : > { %v5576_v22 = vpack.i.bf16 %v1917_v53, %v1916_v14  ;;  %v5565_v19 = vunpack.i.h.bf16 %v5563_v24  ;;  %v5564_v0 = vunpack.i.l.bf16 %v5563_v24  ;;  %v5687_v24 = vld [vmem:[%s7395_s6 + $0xb8] sm:$0xff]  }
 0x201   : > { %5577 = vrot.lane.b32.xlu1 %v5576_v22, %s5788_s24  ;;  %v1874_v44 = vmax.f32 %v6523_v11, %v5564_v0 }
 0x20b   : > { %v5553_v45 = vpop.permute.xlu1 %5552 }
 0x20c   : > { %v5555_v46 = vunpack.i.h.bf16 %v5553_v45  ;;  %v5554_v35 = vunpack.i.l.bf16 %v5553_v45 }
 0x20e   : > { %v1919_v43 = vmax.f32 %v6636_v18, %v5555_v46  ;;  %v1918_v34 = vmax.f32 %v6634_v47, %v5554_v35  ;;  %v1875_v47 = vmax.f32 %v6540_v37, %v5565_v19  ;;  %v5675_v37 = vld [vmem:[%s7395_s6 + $0x70] sm:$0xff]  }
 0x210   : > { %v5586_v63 = vpack.i.bf16 %v1919_v43, %v1918_v34 }
 0x212   : > { %5587 = vrot.lane.b32.xlu1 %v5586_v63, %s5788_s24 }
 0x21a   : > { %v5558_v52 = vpop.permute.xlu1 %5557 }
 0x21b   : > { %v5560_v17 = vunpack.i.h.bf16 %v5558_v52  ;;  %v5559_v27 = vunpack.i.l.bf16 %v5558_v52 }
 0x21d   : > { %v1921_v5 = vmax.f32 %v6675_v40, %v5560_v17  ;;  %v1920_v58 = vmax.f32 %v6653_v2, %v5559_v27  ;;  %v5673_v2 = vld [vmem:[%s7395_s6 + $0x78] sm:$0xff]  }
 0x21e   : > { %v5568_v11 = vpop.permute.xlu1 %5567  ;;  %v5688_v17 = vld [vmem:[%s7394_s5 + $0x58] sm:$0xff]  }
 0x21f   : > { %v5596_v29 = vpack.i.bf16 %v1921_v5, %v1920_v58  ;;  %v5570_v59 = vunpack.i.h.bf16 %v5568_v11  ;;  %v5569_v40 = vunpack.i.l.bf16 %v5568_v11 }
 0x221   : > { %5597 = vrot.lane.b32.xlu1 %v5596_v29, %s5788_s24  ;;  %v1877_v48 = vmax.f32 %v6586_v32, %v5570_v59  ;;  %v1876_v28 = vmax.f32 %v6567_v10, %v5569_v40 }
 0x263   : > { %v5573_v18 = vpop.permute.xlu0 %5572 }
 0x264   : > { %v5575_v23 = vunpack.i.h.bf16 %v5573_v18  ;;  %v5574_v3 = vunpack.i.l.bf16 %v5573_v18  ;;  %v5690_v18 = vld [vmem:[%s7394_s5 + $0x50] sm:$0xff]  }
 0x266   : > { %v1955_v36 = vsel %vm1954_vm6, %v1874_v44, %v5574_v3  ;;  %v1956_v50 = vsel %vm1954_vm6, %v1875_v47, %v5575_v23  ;;  %v5689_v23 = vld [vmem:[%s7395_s6 + $0xb0] sm:$0xff]  }
 0x267   : > { %v6764_v54 = vpack.c.bf16 %v1956_v50, %v1955_v36  ;;  %v5583_v39 = vpop.permute.xlu0 %5582 }
 0x268   : > { %v5585_v56 = vunpack.i.h.bf16 %v5583_v39  ;;  %v5584_v12 = vunpack.i.l.bf16 %v5583_v39 }
 0x269   : > { %5188 = vmatmul.mubr.bf16.vlgmr.msra.gmra.mxu1 %v6764_v54  ;;  %v2068_v9 = vshll.u32 %v6764_v54, 16  ;;  %v2066_v10 = vshrl.u32 %v6764_v54, 16 }
 0x26a   : > { %5228 = vmatpush3.bf16.msra.mxu1 %v5673_v2  ;;  %5191 = vmatprep.mubr.msk.bf16.mxu1 %vm5790_vm5, %v5789_v15  ;;  %v1879_v53 = vmax.f32 %v6629_v49, %v5585_v56  ;;  %v1878_v14 = vmax.f32 %v6609_v7, %v5584_v12  ;;  %v5686_v49 = vld [vmem:[%s7394_s5 + $0x60] sm:$0xff]   ;;  %v5700_v56 = vld [vmem:[%s7394_s5 + $0xa8] sm:$0xff]  }
 0x26b   : > { %5229 = vmatprep.subr.bf16.mxu1 %v5789_v15  ;;  %v2070_v57 = vrot.slane %v2068_v9, 1  ;;  %v5593_v27 = vpop.permute.xlu0 %5592  ;;  %v5701_v12 = vld [vmem:[%s7395_s6 + $0x80] sm:$0xff]  }
 0x26c   : > { %v5595_v19 = vunpack.i.h.bf16 %v5593_v27  ;;  %v5594_v0 = vunpack.i.l.bf16 %v5593_v27 }
 0x26d   : > { %v2071_v4 = vor.u32 %v2070_v57, %v2066_v10 }
 0x26e   : > { %5230 = vmatpush3.bf16.msra.mxu1 %v5675_v37  ;;  %v1881_v3 = vmax.f32 %v6665_v21, %v5595_v19  ;;  %v1880_v36 = vmax.f32 %v6650_v41, %v5594_v0  ;;  %v5692_v37 = vld [vmem:[%s7394_s5 + $0x48] sm:$0xff]   ;;  %v5694_v21 = vld [vmem:[%s7394_s5 + $0x40] sm:$0xff]  }
 0x26f   : > { %5231 = vmatprep.subr.bf16.mxu1 %v5789_v15  ;;  %v5691_v41 = vld [vmem:[%s7395_s6 + $0xa8] sm:$0xff]  }
 0x272   : > { %5232 = vmatpush3.bf16.msra.mxu1 %v5676_v20 }
 0x273   : > { %v5578_v62 = vpop.permute.xlu1 %5577  ;;  %5233 = vmatprep.subr.bf16.mxu1 %v5789_v15 }
 0x274   : > { %v5580_v38 = vunpack.i.h.bf16 %v5578_v62  ;;  %v5579_v6 = vunpack.i.l.bf16 %v5578_v62 }
 0x276   : > { %v1957_v33 = vsel %vm1954_vm6, %v1876_v28, %v5579_v6  ;;  %v1958_v30 = vsel %vm1954_vm6, %v1877_v48, %v5580_v38  ;;  %5234 = vmatpush3.bf16.msra.mxu1 %v5678_v16  ;;  %v5693_v28 = vld [vmem:[%s7395_s6 + $0xa0] sm:$0xff]  }
 0x277   : > { %v6789_v31 = vpack.c.bf16 %v1958_v30, %v1957_v33  ;;  %5235 = vmatprep.subr.bf16.mxu1 %v5789_v15  ;;  %v5695_v30 = vld [vmem:[%s7395_s6 + $0x98] sm:$0xff]  }
 0x279   : > { %5192 = vmatmul.mubr.bf16.gmra.mxu1 %v6789_v31  ;;  %v2073_v32 = vshll.u32 %v6789_v31, 16  ;;  %v2077_v7 = vshrl.u32 %v6789_v31, 16  ;;  %v2316_v57 = vrot.slane %v6789_v31, 4 }
 0x27a   : > { %5236 = vmatpush3.bf16.msra.mxu1 %v5679_v13  ;;  %5195 = vmatprep.mubr.msk.bf16.mxu1 %vm5790_vm5, %v5789_v15 }
 0x27b   : > { %v2075_v60 = vrot.slane %v2073_v32, 1  ;;  %5237 = vmatprep.subr.bf16.mxu1 %v5789_v15 }
 0x27d   : > { %v2076_v25 = vsel %vm585_vm1, %v2071_v4, %v2075_v60  ;;  %v2079_v63 = vor.u32 %v2077_v7, %v2075_v60  ;;  %v5696_v4 = vld [vmem:[%s7394_s5 + $0xb8] sm:$0xff]   ;;  %v5697_v60 = vld [vmem:[%s7395_s6 + $0x90] sm:$0xff]  }
 0x27e   : > { %5160 = vmatmul.mubr.bf16.vlgmr.msra.gmra.mxu0 %v2076_v25  ;;  %5238 = vmatpush3.bf16.msra.mxu1 %v5681_v8  ;;  %v2437_v58 = vrot.slane %v2076_v25, 4  ;;  %v2315_v8 = vrot.slane %v6764_v54, 4  ;;  %v5698_v54 = vld [vmem:[%s7394_s5 + $0xb0] sm:$0xff]   ;;  %v5699_v25 = vld [vmem:[%s7395_s6 + $0x88] sm:$0xff]  }
 0x27f   : > { %5200 = vmatpush3.bf16.msra.mxu0 %v5680_v1  ;;  %5239 = vmatprep.subr.bf16.mxu1 %v5789_v15 }
 0x280   : > { %5201 = vmatprep.subr.bf16.mxu0 %v5789_v15  ;;  %5163 = vmatprep.mubr.msk.bf16.mxu0 %vm5790_vm5, %v5789_v15  ;;  %v2317_v39 = vsel %vm1166_vm2, %v2315_v8, %v2316_v57 }
 0x282   : > { %5240 = vmatpush3.bf16.msra.mxu1 %v5683_v61 }
 0x283   : > { %5202 = vmatpush3.bf16.msra.mxu0 %v5682_v42  ;;  %5241 = vmatprep.subr.bf16.mxu1 %v5789_v15 }
 0x284   : > { %v5588_v51 = vpop.permute.xlu1 %5587  ;;  %5203 = vmatprep.subr.bf16.mxu0 %v5789_v15 }
 0x285   : > { %v5590_v22 = vunpack.i.h.bf16 %v5588_v51  ;;  %v5589_v45 = vunpack.i.l.bf16 %v5588_v51  ;;  %v5702_v51 = vld [vmem:[%s7394_s5 + $0xa0] sm:$0xff]  }
 0x286   : > { %5242 = vmatpush3.bf16.msra.mxu1 %v5685_v26 }
 0x287   : > { %v1960_v46 = vsel %vm1954_vm6, %v1879_v53, %v5590_v22  ;;  %v1959_v35 = vsel %vm1954_vm6, %v1878_v14, %v5589_v45  ;;  %5204 = vmatpush3.bf16.msra.mxu0 %v5684_v55  ;;  %5283 = vmatprep.subr.bf16.mxu1 %v5789_v15  ;;  %v5703_v53 = vld [vmem:[%s7394_s5 + $0x98] sm:$0xff]   ;;  %v5704_v22 = vld [vmem:[%s7394_s5 + $0x90] sm:$0xff]   ;;  %v5705_v45 = vld [vmem:[%s7394_s5 + $0x88] sm:$0xff]  }
 0x288   : > { %v6827_v43 = vpack.c.bf16 %v1960_v46, %v1959_v35  ;;  %5205 = vmatprep.subr.bf16.mxu0 %v5789_v15  ;;  %v5706_v46 = vld [vmem:[%s7394_s5 + $0x80] sm:$0xff]  }
 0x28a   : > { %5196 = vmatmul.mubr.bf16.gmra.mxu1 %v6827_v43  ;;  %v2081_v34 = vshll.u32 %v6827_v43, 16  ;;  %v2085_v40 = vshrl.u32 %v6827_v43, 16  ;;  %v2318_v42 = vrot.slane %v6827_v43, 4 }
 0x28b   : > { %5243 = vmatprep.mubr.msk.bf16.mxu1 %vm5790_vm5, %v5789_v15  ;;  %5206 = vmatpush3.bf16.msra.mxu0 %v5686_v49 }
 0x28c   : > { %v2083_v52 = vrot.slane %v2081_v34, 1  ;;  %5207 = vmatprep.subr.bf16.mxu0 %v5789_v15  ;;  %v2319_v26 = vsel %vm1166_vm2, %v2316_v57, %v2318_v42 }
 0x28e   : > { %v6844_v5 = vsel %vm585_vm1, %v2079_v63, %v2083_v52  ;;  %v2087_v62 = vor.u32 %v2085_v40, %v2083_v52 }
 0x28f   : > { %5164 = vmatmul.mubr.bf16.gmra.mxu0 %v6844_v5  ;;  %v2438_v29 = vrot.slane %v6844_v5, 4 }
 0x290   : > { %5208 = vmatpush3.bf16.msra.mxu0 %v5688_v17  ;;  %5167 = vmatprep.mubr.msk.bf16.mxu0 %vm5790_vm5, %v5789_v15 }
 0x291   : > { %v2439_v47 = vsel %vm1166_vm2, %v2437_v58, %v2438_v29  ;;  %5209 = vmatprep.subr.bf16.mxu0 %v5789_v15 }
 0x292   : > { %5244 = vmatmul.mubr.bf16.vlgmr.msra.gmra.mxu1 %v2439_v47 }
 0x293   : > { %5284 = vmatpush3.bf16.msra.mxu1 %v5687_v24  ;;  %v5598_v44 = vpop.permute.xlu1 %5597  ;;  %5247 = vmatprep.mubr.msk.bf16.mxu1 %vm5790_vm5, %v5789_v15 }
 0x294   : > { %v5600_v50 = vunpack.i.h.bf16 %v5598_v44  ;;  %v5599_v2 = vunpack.i.l.bf16 %v5598_v44  ;;  %5285 = vmatprep.subr.bf16.mxu1 %v5789_v15  ;;  %5210 = vmatpush3.bf16.msra.mxu0 %v5690_v18 }
 0x295   : > { %5211 = vmatprep.subr.bf16.mxu0 %v5789_v15 }
 0x296   : > { %v1962_v11 = vsel %vm1954_vm6, %v1881_v3, %v5600_v50  ;;  %v1961_v20 = vsel %vm1954_vm6, %v1880_v36, %v5599_v2 }
 0x297   : > { %v6872_v59 = vpack.c.bf16 %v1962_v11, %v1961_v20  ;;  %5286 = vmatpush3.bf16.msra.mxu1 %v5689_v23 }
 0x298   : > { %5287 = vmatprep.subr.bf16.mxu1 %v5789_v15  ;;  %5212 = vmatpush3.bf16.msra.mxu0 %v5692_v37 }
 0x299   : > { %v2089_v16 = vshll.u32 %v6872_v59, 16  ;;  %5213 = vmatprep.subr.bf16.mxu0 %v5789_v15  ;;  %v2093_v48 = vshrl.u32 %v6872_v59, 16  ;;  %v2320_v55 = vrot.slane %v6872_v59, 4 }
 0x29b   : > { %5288 = vmatpush3.bf16.msra.mxu1 %v5691_v41  ;;  %v2091_v9 = vrot.slane %v2089_v16, 1  ;;  %v2321_v14 = vsel %vm1166_vm2, %v2318_v42, %v2320_v55 }
 0x29c   : > { %5289 = vmatprep.subr.bf16.mxu1 %v5789_v15  ;;  %5214 = vmatpush3.bf16.msra.mxu0 %v5694_v21 }
 0x29d   : > { %v2092_v38 = vsel %vm585_vm1, %v2087_v62, %v2091_v9  ;;  %v2095_v6 = vor.u32 %v2093_v48, %v2091_v9  ;;  %5255 = vmatprep.subr.bf16.mxu0 %v5789_v15 }
 0x29e   : > { %5168 = vmatmul.mubr.bf16.gmra.mxu0 %v2092_v38  ;;  %v2440_v33 = vrot.slane %v2092_v38, 4 }
 0x29f   : > { %5290 = vmatpush3.bf16.msra.mxu1 %v5693_v28  ;;  %5215 = vmatprep.mubr.msk.bf16.mxu0 %vm5790_vm5, %v5789_v15  ;;  %v2100_v32 = vsel %vm6222_vm4, %v2095_v6, 0 }
 0x2a0   : > { %v2441_v13 = vsel %vm1166_vm2, %v2438_v29, %v2440_v33  ;;  %5291 = vmatprep.subr.bf16.mxu1 %v5789_v15  ;;  %v2442_v1 = vrot.slane %v2100_v32, 4 }
 0x2a1   : > { %5248 = vmatmul.mubr.bf16.gmra.mxu1 %v2441_v13 }
 0x2a2   : > { %5251 = vmatprep.mubr.msk.bf16.mxu1 %vm5790_vm5, %v5789_v15  ;;  %v2443_v61 = vsel %vm1166_vm2, %v2440_v33, %v2442_v1 }
 0x2a3   : > { %5292 = vmatpush3.bf16.msra.mxu1 %v5695_v30 }
 0x2a4   : > { %5293 = vmatprep.subr.bf16.mxu1 %v5789_v15 }
 0x2a6   : > { %5216 = vmatmul.mubr.bf16.vlgmr.msra.gmra.mxu0 %v2317_v39 }
 0x2a7   : > { %5256 = vmatpush3.bf16.msra.mxu0 %v5696_v4  ;;  %5294 = vmatpush3.bf16.msra.mxu1 %v5697_v60 }
 0x2a8   : > { %5257 = vmatprep.subr.bf16.mxu0 %v5789_v15  ;;  %5295 = vmatprep.subr.bf16.mxu1 %v5789_v15 }
 0x2a9   : > { %5252 = vmatmul.mubr.bf16.gmra.mxu1 %v2443_v61  ;;  %5219 = vmatprep.mubr.msk.bf16.mxu0 %vm5790_vm5, %v5789_v15 }
 0x2aa   : > { %5299 = vmatprep.mubr.msk.bf16.mxu1 %vm5790_vm5, %v5789_v15 }
 0x2ab   : > { %5258 = vmatpush3.bf16.msra.mxu0 %v5698_v54  ;;  %5296 = vmatpush3.bf16.msra.mxu1 %v5699_v25 }
 0x2ac   : > { %5259 = vmatprep.subr.bf16.mxu0 %v5789_v15  ;;  %5297 = vmatprep.subr.bf16.mxu1 %v5789_v15 }
 0x2ae   : > { %5220 = vmatmul.mubr.bf16.gmra.mxu0 %v2319_v26 }
 0x2af   : > { %5260 = vmatpush3.bf16.msra.mxu0 %v5700_v56  ;;  %5298 = vmatpush3.bf16.msra.mxu1 %v5701_v12 }
 0x2b0   : > { %5261 = vmatprep.subr.bf16.mxu0 %v5789_v15  ;;  %5223 = vmatprep.mubr.msk.bf16.mxu0 %vm5790_vm5, %v5789_v15 }
 0x2b2   : > { %5300 = vmatmul.mubr.bf16.vlgmr.msra.gmra.mxu1 %v6844_v5 }
 0x2b3   : > { %5262 = vmatpush3.bf16.msra.mxu0 %v5702_v51  ;;  %5303 = vmatprep.mubr.msk.bf16.mxu1 %vm5790_vm5, %v5789_v15 }
 0x2b4   : > { %5263 = vmatprep.subr.bf16.mxu0 %v5789_v15 }
 0x2b6   : > { %5224 = vmatmul.mubr.bf16.gmra.mxu0 %v2321_v14 }
 0x2b7   : > { %5264 = vmatpush3.bf16.msra.mxu0 %v5703_v53  ;;  %5271 = vmatprep.mubr.msk.bf16.mxu0 %vm5790_vm5, %v5789_v15 }
 0x2b8   : > { %5265 = vmatprep.subr.bf16.mxu0 %v5789_v15 }
 0x2ba   : > { %5304 = vmatmul.mubr.bf16.gmra.mxu1 %v2092_v38 }
 0x2bb   : > { %5266 = vmatpush3.bf16.msra.mxu0 %v5704_v22  ;;  %5307 = vmatprep.mubr.msk.bf16.mxu1 %vm5790_vm5, %v5789_v15 }
 0x2bc   : > { %5267 = vmatprep.subr.bf16.mxu0 %v5789_v15 }
 0x2bf   : > { %5268 = vmatpush3.bf16.msra.mxu0 %v5705_v45 }
 0x2c0   : > { %5269 = vmatprep.subr.bf16.mxu0 %v5789_v15 }
 0x2c2   : > { %5308 = vmatmul.mubr.bf16.gmra.mxu1 %v2100_v32 }
 0x2c3   : > { %5270 = vmatpush3.bf16.msra.mxu0 %v5706_v46 }
 0x2c6   : > { %5272 = vmatmul.mubr.bf16.vlgmr.msra.gmra.mxu0 %v6789_v31 }
 0x2c7   : > { %5275 = vmatprep.mubr.msk.bf16.mxu0 %vm5790_vm5, %v5789_v15 }
 0x2ce   : > { %5276 = vmatmul.mubr.bf16.gmra.mxu0 %v6827_v43 }
 0x2cf   : > { %5279 = vmatprep.mubr.msk.bf16.mxu0 %vm5790_vm5, %v5789_v15 }
 0x2d6   : > { %5280 = vmatmul.mubr.bf16.gmra.mxu0 %v6872_v59 }
 0x329   : > { %v2288_v35 = vpop.f32.mrf.mxu1 }
 0x32b   : > { %v5189_v49 = vpop.f32.mrf.mxu1 }
 0x32d   : > { %v2291_v7 = vpop.f32.mrf.mxu1 }
 0x32f   : > { %v5190_v34 = vpop.f32.mrf.mxu1 }
 0x330   : > { %v6988_v34 = vld [vmem:[%s7396_s7] ss:$0 sm:$0xff] }
 0x339   : > { %v2296_v63 = vpop.f32.mrf.mxu1 }
 0x33b   : > { %v5193_v52 = vpop.f32.mrf.mxu1 }
 0x33d   : > { %v6973_v17 = vpop.f32.mrf.mxu1 }
 0x33e   : > { %v2183_v27 = vpop.f32.mrf.mxu0 }
 0x33f   : > { %v2289_v31 = vadd.f32 %v2288_v35, %v2183_v27  ;;  %v5194_v5 = vpop.f32.mrf.mxu1 }
 0x340   : > { %v5161_v58 = vpop.f32.mrf.mxu0 }
 0x342   : > { %v2186_v29 = vpop.f32.mrf.mxu0 }
 0x343   : > { %v2292_v24 = vadd.f32 %v2291_v7, %v2186_v29 }
 0x344   : > { %v5162_v43 = vpop.f32.mrf.mxu0 }
 0x34a   : > { %v6975_v19 = vpop.f32.mrf.mxu1 }
 0x34c   : > { %v5197_v15 = vpop.f32.mrf.mxu1 }
 0x34e   : > { %v6977_v0 = vpop.f32.mrf.mxu1 }
 0x34f   : > { %v2191_v18 = vpop.f32.mrf.mxu0 }
 0x350   : > { %v5198_v47 = vpop.f32.mrf.mxu1  ;;  %v2297_v49 = vadd.f32 %v2296_v63, %v2191_v18  ;;  %v4841_v63 = vld [vmem:[%s7397_s8] ss:$0 sm:$0xff] }
 0x351   : > { %v5165_v44 = vpop.f32.mrf.mxu0 }
 0x352   : > { %v2529_v23 = vpop.f32.mrf.mxu1 }
 0x353   : > { %v2194_v3 = vpop.f32.mrf.mxu0 }
 0x354   : > { %v5245_v36 = vpop.f32.mrf.mxu1 }
 0x355   : > { %v5166_v50 = vpop.f32.mrf.mxu0 }
 0x356   : > { %v2532_v2 = vpop.f32.mrf.mxu1 }
 0x358   : > { %v5246_v37 = vpop.f32.mrf.mxu1 }
 0x35e   : > { %v2199_v11 = vpop.f32.mrf.mxu0 }
 0x35f   : > { %v2305_v50 = vadd.f32 %v6975_v19, %v2199_v11 }
 0x360   : > { %v5169_v20 = vpop.f32.mrf.mxu0 }
 0x361   : > { %v2537_v59 = vpop.f32.mrf.mxu1 }
 0x362   : > { %v6979_v41 = vpop.f32.mrf.mxu0 }
 0x363   : > { %v5249_v21 = vpop.f32.mrf.mxu1 }
 0x364   : > { %v5170_v40 = vpop.f32.mrf.mxu0 }
 0x365   : > { %v2540_v16 = vpop.f32.mrf.mxu1 }
 0x366   : > { %v2407_v62 = vpop.f32.mrf.mxu0 }
 0x367   : > { %v5250_v9 = vpop.f32.mrf.mxu1  ;;  %v2430_v55 = vadd.f32 %v2407_v62, %v2289_v31  ;;  %v2300_v31 = vadd.f32 %v6973_v17, %v2194_v3 }
 0x368   : > { %v5217_v48 = vpop.f32.mrf.mxu0  ;;  %v2308_v9 = vadd.f32 %v6977_v0, %v6979_v41  ;;  %v5709_v0 = vld [vmem:[%s7398_s9 + $0x10] sm:$0xff]  }
 0x369   : > { %v6981_v28 = vpop.f32.mrf.mxu1  ;;  %v2552_v45 = vadd.f32 %v2529_v23, %v2430_v55 }
 0x36a   : > { %v2410_v38 = vpop.f32.mrf.mxu0 }
 0x36b   : > { %v5253_v6 = vpop.f32.mrf.mxu1  ;;  %v2431_v22 = vadd.f32 %v2410_v38, %v2292_v24 }
 0x36c   : > { %v5218_v33 = vpop.f32.mrf.mxu0 }
 0x36d   : > { %v6983_v30 = vpop.f32.mrf.mxu1  ;;  %v2553_v29 = vadd.f32 %v2532_v2, %v2431_v22 }
 0x36e   : > { %v2415_v13 = vpop.f32.mrf.mxu0 }
 0x36f   : > { %v5254_v57 = vpop.f32.mrf.mxu1  ;;  %v2432_v5 = vadd.f32 %v2415_v13, %v2297_v49 }
 0x370   : > { %v5221_v10 = vpop.f32.mrf.mxu0 }
 0x371   : > { %v2554_v23 = vadd.f32 %v2537_v59, %v2432_v5  ;;  %v5707_v59 = vld [vmem:[%s7398_s9 + $0x18] sm:$0xff]   ;;  %v5715_v5 = vld [vmem:[%s7398_s9 + $0x20] sm:$0xff]  }
 0x372   : > { %v2751_v32 = vpop.f32.mrf.mxu1  ;;  %v2418_v8 = vpop.f32.mrf.mxu0  ;;  %5323 = vmatprep.subr.bf16.mxu1 %v5707_v59 }
 0x373   : > { %v2433_v47 = vadd.f32 %v2418_v8, %v2300_v31  ;;  %5324 = vmatpush3.bf16.msra.mxu1 %v5707_v59 }
 0x374   : > { %v5301_v4 = vpop.f32.mrf.mxu1  ;;  %v5222_v60 = vpop.f32.mrf.mxu0  ;;  %5325 = vmatprep.subr.bf16.mxu1 %v5709_v0 }
 0x375   : > { %v2555_v62 = vadd.f32 %v2540_v16, %v2433_v47 }
 0x376   : > { %v2754_v1 = vpop.f32.mrf.mxu1  ;;  %v2423_v39 = vpop.f32.mrf.mxu0 }
 0x377   : > { %v2434_v17 = vadd.f32 %v2423_v39, %v2305_v50  ;;  %5326 = vmatpush3.bf16.msra.mxu1 %v5709_v0 }
 0x378   : > { %v5302_v54 = vpop.f32.mrf.mxu1  ;;  %v5225_v25 = vpop.f32.mrf.mxu0 }
 0x379   : > { %v2556_v10 = vadd.f32 %v6981_v28, %v2434_v17 }
 0x37a   : > { %v2759_v61 = vpop.f32.mrf.mxu1  ;;  %v2426_v42 = vpop.f32.mrf.mxu0 }
 0x37b   : > { %v2435_v13 = vadd.f32 %v2426_v42, %v2308_v9 }
 0x37c   : > { %v5305_v56 = vpop.f32.mrf.mxu1  ;;  %v5226_v12 = vpop.f32.mrf.mxu0 }
 0x37d   : > { %v2557_v54 = vadd.f32 %v6983_v30, %v2435_v13  ;;  %v5708_v12 = vld [vmem:[%s7398_s9 + $0x38] sm:$0xff]  }
 0x37e   : > { %v2762_v26 = vpop.f32.mrf.mxu1  ;;  %5311 = vmatprep.subr.bf16.mxu0 %v5708_v12 }
 0x37f   : > { %5312 = vmatpush3.bf16.msra.mxu0 %v5708_v12 }
 0x380   : > { %v5306_v51 = vpop.f32.mrf.mxu1 }
 0x382   : > { %v2767_v53 = vpop.f32.mrf.mxu1 }
 0x384   : > { %v5309_v14 = vpop.f32.mrf.mxu1 }
 0x386   : > { %v2640_v46 = vpop.f32.mrf.mxu0  ;;  %v2770_v35 = vpop.f32.mrf.mxu1 }
 0x387   : > { %v2663_v7 = vadd.f32 %v2640_v46, %v2552_v45  ;;  %v5712_v45 = vld [vmem:[%s7398_s9] sm:$0xff]   ;;  %v5710_v46 = vld [vmem:[%s7398_s9 + $0x30] sm:$0xff]  }
 0x388   : > { %v5273_v52 = vpop.f32.mrf.mxu0  ;;  %v5310_v27 = vpop.f32.mrf.mxu1  ;;  %5313 = vmatprep.subr.bf16.mxu0 %v5710_v46 }
 0x389   : > { %v2774_v58 = vadd.f32 %v2751_v32, %v2663_v7  ;;  %5314 = vmatpush3.bf16.msra.mxu0 %v5710_v46  ;;  %v5713_v52 = vld [vmem:[%s7398_s9 + $0x28] sm:$0xff]  }
 0x38a   : > { %v2643_v43 = vpop.f32.mrf.mxu0  ;;  %5315 = vmatprep.subr.bf16.mxu0 %v5713_v52 }
 0x38b   : > { %v2786_v24 = vmul.f32 %v6988_v34, %v2774_v58  ;;  %v2664_v15 = vadd.f32 %v2643_v43, %v2553_v29  ;;  %v7037_v58 = vld [vmem:[%s7398_s9 + $0x58] sm:$0xff]  }
 0x38c   : > { %v5274_v18 = vpop.f32.mrf.mxu0 }
 0x38d   : > { %v2775_v44 = vadd.f32 %v2754_v1, %v2664_v15  ;;  %v2798_v37 = vadd.f32 %v4841_v63, %v2786_v24  ;;  %5316 = vmatpush3.bf16.msra.mxu0 %v5713_v52  ;;  %v5725_v52 = vld [vmem:[%s7398_s9 + $0xa8] sm:$0xff]  }
 0x38e   : > { %v2648_v36 = vpop.f32.mrf.mxu0  ;;  %5317 = vmatprep.subr.bf16.mxu0 %v5715_v5 }
 0x38f   : > { %v2787_v2 = vmul.f32 %v6988_v34, %v2775_v44  ;;  %v2665_v20 = vadd.f32 %v2648_v36, %v2554_v23  ;;  %v2804_v38 = vmax.f32 %v2798_v37, 0.0 }
 0x390   : > { %v5277_v21 = vpop.f32.mrf.mxu0 }
 0x391   : > { %v2799_v3 = vadd.f32 %v4841_v63, %v2787_v2  ;;  %v2776_v40 = vadd.f32 %v2759_v61, %v2665_v20  ;;  %5318 = vmatpush3.bf16.msra.mxu0 %v5715_v5  ;;  %v5726_v5 = vld [vmem:[%s7398_s9 + $0x98] sm:$0xff]  }
 0x392   : > { %v2651_v48 = vpop.f32.mrf.mxu0  ;;  %5335 = vmatprep.subr.bf16.mxu0 %v7037_v58 }
 0x393   : > { %v2805_v6 = vmax.f32 %v2799_v3, 0.0  ;;  %v2788_v19 = vmul.f32 %v6988_v34, %v2776_v40  ;;  %v2666_v11 = vadd.f32 %v2651_v48, %v2555_v62 }
 0x394   : > { %v5278_v33 = vpop.f32.mrf.mxu0 }
 0x395   : > { %v2777_v57 = vadd.f32 %v2762_v26, %v2666_v11  ;;  %v2810_v16 = vmax.f32 %v2804_v38, %v2805_v6  ;;  %v2800_v41 = vadd.f32 %v4841_v63, %v2788_v19  ;;  %v5711_v26 = vld [vmem:[%s7398_s9 + $0x8] sm:$0xff]   ;;  %v7438_v33 = vmov 0  }
 0x396   : > { %v2656_v32 = vpop.f32.mrf.mxu0  ;;  %5327 = vmatprep.subr.bf16.mxu1 %v5711_v26 }
 0x397   : > { %v2789_v8 = vmul.f32 %v6988_v34, %v2777_v57  ;;  %v2667_v4 = vadd.f32 %v2656_v32, %v2556_v10  ;;  %v2806_v28 = vmax.f32 %v2800_v41, 0.0  ;;  %5328 = vmatpush3.bf16.msra.mxu1 %v5711_v26  ;;  %v5716_v10 = vld [vmem:[%s7398_s9 + $0x70] sm:$0xff]  }
 0x398   : > { %v5281_v60 = vpop.f32.mrf.mxu0  ;;  %5329 = vmatprep.subr.bf16.mxu1 %v5712_v45 }
 0x399   : > { %v2801_v1 = vadd.f32 %v4841_v63, %v2789_v8  ;;  %v2778_v39 = vadd.f32 %v2767_v53, %v2667_v4  ;;  %v5717_v4 = vld [vmem:[%s7398_s9 + $0x68] sm:$0xff]  }
 0x39a   : > { %v2659_v25 = vpop.f32.mrf.mxu0 }
 0x39b   : > { %v2807_v61 = vmax.f32 %v2801_v1, 0.0  ;;  %v2790_v42 = vmul.f32 %v6988_v34, %v2778_v39  ;;  %v2668_v56 = vadd.f32 %v2659_v25, %v2557_v54  ;;  %5330 = vmatpush3.bf16.msra.mxu1 %v5712_v45 }
 0x39c   : > { %v5282_v51 = vpop.f32.mrf.mxu0 }
 0x39d   : > { %v2779_v55 = vadd.f32 %v2770_v35, %v2668_v56  ;;  %v2811_v53 = vmax.f32 %v2806_v28, %v2807_v61  ;;  %v2802_v22 = vadd.f32 %v4841_v63, %v2790_v42  ;;  %v5719_v42 = vld [vmem:[%s7398_s9 + $0x60] sm:$0xff]  }
 0x39f   : > { %v2791_v30 = vmul.f32 %v6988_v34, %v2779_v55  ;;  %v5601_v14 = vpack.i.bf16 %v2811_v53, %v2810_v16  ;;  %v2808_v49 = vmax.f32 %v2802_v22, 0.0  ;;  %v5714_v34 = vld [vmem:[%s7398_s9 + $0x78] sm:$0xff]   ;;  %v5720_v55 = vld [vmem:[%s7398_s9 + $0x50] sm:$0xff]  }
 0x3a0   : > { %5347 = vmatprep.subr.bf16.mxu1 %v5714_v34 }
 0x3a1   : > { %5602 = vrot.lane.b32.xlu0 %v5601_v14, %s5788_s24  ;;  %v2803_v35 = vadd.f32 %v4841_v63, %v2791_v30  ;;  %v5721_v30 = vld [vmem:[%s7398_s9 + $0xb8] sm:$0xff]   ;;  %v5722_v14 = vld [vmem:[%s7398_s9 + $0x48] sm:$0xff]  }
 0x3a3   : > { %v2809_v7 = vmax.f32 %v2803_v35, 0.0  ;;  %v5723_v35 = vld [vmem:[%s7398_s9 + $0xb0] sm:$0xff]  }
 0x3a5   : > { %v2812_v27 = vmax.f32 %v2808_v49, %v2809_v7  ;;  %v5724_v7 = vld [vmem:[%s7398_s9 + $0x40] sm:$0xff]  }
 0x3a7   : > { %2820 = vrot.lane.b32.xlu1 %v2812_v27, %s5788_s24  ;;  %s5528_s24 = smul.u32 12, %s7440_s19 }
 0x3a9   : > { %s494_s30 = scalar_lea.vmem %s7404_s15, %s5528_s24 }
 0x413   : > { %v5603_v29 = vpop.permute.xlu0 %5602 }
 0x414   : > { %v5605_v43 = vunpack.i.h.bf16 %v5603_v29  ;;  %v5604_v31 = vunpack.i.l.bf16 %v5603_v29 }
 0x416   : > { %v2826_v24 = vmax.f32 %v2811_v53, %v5605_v43  ;;  %v2825_v15 = vmax.f32 %v2810_v16, %v5604_v31  ;;  %v5727_v31 = vld [vmem:[%s7398_s9 + $0xa0] sm:$0xff]  }
 0x418   : > { %v2829_v63 = vpack.c.bf16 %v2826_v24, %v2826_v24  ;;  %v2828_v18 = vpack.c.bf16 %v2825_v15, %v2825_v15  ;;  %v7120_v24 = vcombine.low %v7438_v33, %v7438_v33 }
 0x419   : > { %v2821_v47 = vpop.permute.xlu1 %2820 }
 0x41a   : > { %v2839_v44 = vshrl.u32 %v2829_v63, 16  ;;  %v2832_v23 = vshrl.u32 %v2828_v18, 16  ;;  %v2827_v36 = vmax.f32 %v2812_v27, %v2821_v47  ;;  %v2842_v37 = vshll.u32 %v2829_v63, 16  ;;  %v5728_v63 = vld [vmem:[%s7398_s9 + $0x90] sm:$0xff]  }
 0x41b   : > { %v2835_v20 = vshll.u32 %v2828_v18, 16  ;;  %v3553_v18 = vshll.u32 %v7120_v24, 16 }
 0x41c   : > { %v2841_v50 = vrot.slane %v2839_v44, 7  ;;  %v2834_v2 = vrot.slane %v2832_v23, 7  ;;  %v2830_v17 = vpack.c.bf16 %v2827_v36, %v2827_v36  ;;  %v5732_v44 = vld [vmem:[%s7398_s9 + $0xf8] sm:$0xff]   ;;  %v5729_v23 = vld [vmem:[%s7398_s9 + $0x88] sm:$0xff]  }
 0x41d   : > { %v7136_v36 = vrot.slane %v3553_v18, 1 }
 0x41e   : > { %v2844_v3 = vor.u32 %v2842_v37, %v2841_v50  ;;  %v2837_v40 = vor.u32 %v2835_v20, %v2834_v2  ;;  %v2846_v62 = vshrl.u32 %v2830_v17, 16  ;;  %v2849_v6 = vshll.u32 %v2830_v17, 16  ;;  %v5734_v50 = vld [vmem:[%s7398_s9 + $0xf0] sm:$0xff]   ;;  %v5730_v2 = vld [vmem:[%s7398_s9 + $0x80] sm:$0xff]   ;;  %v5736_v20 = vld [vmem:[%s7398_s9 + $0xe8] sm:$0xff]  }
 0x41f   : > { %v5731_v17 = vld [vmem:[%s7398_s9 + $0xd8] sm:$0xff]  }
 0x420   : > { %v2859_v9 = vsel %vm7040_vm9, 0, %v2844_v3  ;;  %v2858_v48 = vsel %vm7040_vm9, 0, %v2837_v40  ;;  %v2848_v38 = vrot.slane %v2846_v62, 7  ;;  %v5738_v40 = vld [vmem:[%s7398_s9 + $0xe0] sm:$0xff]  }
 0x421   : > { %v2866_v59 = vsel %vm2861_vm10, %v2859_v9, 0  ;;  %v2864_v19 = vsel %vm2861_vm10, %v2858_v48, 0  ;;  %v3557_v9 = vshrl.u32 %v7120_v24, 16  ;;  %v5733_v48 = vld [vmem:[%s7398_s9 + $0xd0] sm:$0xff]  }
 0x422   : > { %v4850_v11 = vcombine.low %v2866_v59, %v2866_v59  ;;  %v4842_v13 = vcombine.low %v7438_v33, %v2864_v19  ;;  %v2851_v57 = vor.u32 %v2849_v6, %v2848_v38  ;;  %v7055_v16 = vcombine.low %v2864_v19, %v2866_v59  ;;  %v5735_v38 = vld [vmem:[%s7398_s9 + $0xc8] sm:$0xff]   ;;  %v5737_v6 = vld [vmem:[%s7398_s9 + $0xc0] sm:$0xff]   ;;  %v5739_v19 = vld [vmem:[%s7398_s9 + $0x118] sm:$0xff]  }
 0x424   : > { %5331 = vmatprep.mubr.msk.bf16.mxu1 %vm1954_vm6, %v4842_v13  ;;  %v2956_v32 = vshll.u32 %v4842_v13, 16  ;;  %v2860_v0 = vsel %vm7040_vm9, 0, %v2851_v57  ;;  %v2954_v1 = vshrl.u32 %v4842_v13, 16  ;;  %v3125_v51 = vrot.slane %v4842_v13, 1  ;;  %v5740_v13 = vld [vmem:[%s7398_s9 + $0x110] sm:$0xff]  }
 0x425   : > { %5332 = vmatmul.mubr.msk.bf16.vlgmr.msra.gmra.mxu1 %vm1954_vm6, %v4850_v11  ;;  %v2868_v41 = vsel %vm2861_vm10, %v2860_v0, 0  ;;  %v3388_v46 = vrot.slane %v7055_v16, 1  ;;  %v3293_v29 = vshrl.u32 %v7055_v16, 16  ;;  %v7180_v11 = vrot.slane %v7120_v24, 1  ;;  %v5744_v0 = vld [vmem:[%s7401_s12 + $0x10] sm:$0xff]  }
 0x426   : > { %5348 = vmatpush3.bf16.msra.mxu1 %v5714_v34  ;;  %5355 = vmatprep.mubr.msk.bf16.mxu1 %vm1954_vm6, %v7055_v16  ;;  %v7063_v8 = vcombine.low %v2866_v59, %v2868_v41  ;;  %v2958_v60 = vrot.slane %v2956_v32, 1  ;;  %v7077_v56 = vcombine.low %v2868_v41, %v7438_v33  ;;  %v4864_v45 = vcombine.low %v2868_v41, %v2868_v41  ;;  %v5743_v32 = vld [vmem:[%s7401_s12 + $0x18] sm:$0xff]  }
 0x427   : > { %5349 = vmatprep.subr.bf16.mxu1 %v5716_v10  ;;  %v3295_v34 = vshll.u32 %v7055_v16, 16  ;;  %v7166_v59 = vor.u32 %v3557_v9, %v7136_v36  ;;  %v5742_v16 = vld [vmem:[%s7398_s9 + $0x100] sm:$0xff]   ;;  %v5745_v41 = vld [vmem:[%s7401_s12 + $0x38] sm:$0xff]  }
 0x428   : > { %v2961_v39 = vshll.u32 %v7063_v8, 16  ;;  %v2959_v54 = vor.u32 %v2958_v60, %v2954_v1  ;;  %v2965_v28 = vshrl.u32 %v7063_v8, 16  ;;  %v7071_v61 = vrot.slane %v7063_v8, 1  ;;  %v5748_v60 = vld [vmem:[%s7401_s12] sm:$0xff]   ;;  %v5749_v1 = vld [vmem:[%s7401_s12 + $0x28] sm:$0xff]  }
 0x429   : > { %v3389_v22 = vrot.slane %v7077_v56, 1  ;;  %v3300_v27 = vshll.u32 %v7077_v56, 16  ;;  %v3304_v3 = vshrl.u32 %v7077_v56, 16 }
 0x42a   : > { %5350 = vmatpush3.bf16.msra.mxu1 %v5716_v10  ;;  %v2963_v25 = vrot.slane %v2961_v39, 1  ;;  %v3127_v53 = vsel %vm3124_vm11, %v3125_v51, %v7071_v61  ;;  %v3642_v57 = vsel %vm3124_vm11, %v7071_v61, %v7180_v11  ;;  %v5741_v10 = vld [vmem:[%s7398_s9 + $0x108] sm:$0xff]   ;;  %v7223_v39 = vld [vmem:[%s7401_s12 + $0x78] sm:$0xff]  }
 0x42b   : > { %5351 = vmatprep.subr.bf16.mxu1 %v5717_v4  ;;  %v3390_v49 = vsel %vm3124_vm11, %v3388_v46, %v3389_v22  ;;  %v3302_v43 = vrot.slane %v3300_v27, 1 }
 0x42c   : > { %v2964_v12 = vsel %vm585_vm1, %v2959_v54, %v2963_v25  ;;  %v2967_v26 = vor.u32 %v2965_v28, %v2963_v25  ;;  %v5751_v54 = vld [vmem:[%s7401_s12 + $0x20] sm:$0xff]   ;;  %v7232_v25 = vld [vmem:[%s7401_s12 + $0x58] sm:$0xff]  }
 0x42d   : > { %5319 = vmatprep.mubr.msk.bf16.mxu0 %vm1954_vm6, %v2964_v12  ;;  %v3306_v62 = vor.u32 %v3304_v3, %v3302_v43 }
 0x42e   : > { %5352 = vmatpush3.bf16.msra.mxu1 %v5717_v4  ;;  %5320 = vmatmul.mubr.msk.bf16.vlgmr.msra.gmra.mxu0 %vm1954_vm6, %v2967_v26  ;;  %v3556_v37 = vsel %vm585_vm1, %v2967_v26, %v7136_v36  ;;  %v5747_v4 = vld [vmem:[%s7401_s12 + $0x30] sm:$0xff]  }
 0x42f   : > { %5353 = vmatprep.subr.bf16.mxu1 %v5719_v42  ;;  %5336 = vmatpush3.bf16.msra.mxu0 %v7037_v58  ;;  %v3297_v58 = vrot.slane %v3295_v34, 1 }
 0x430   : > { %5343 = vmatprep.mubr.msk.bf16.mxu0 %vm1954_vm6, %v3127_v53  ;;  %5337 = vmatprep.subr.bf16.mxu0 %v5720_v55 }
 0x431   : > { %v3298_v15 = vor.u32 %v3297_v58, %v3293_v29 }
 0x432   : > { %5354 = vmatpush3.bf16.msra.mxu1 %v5719_v42 }
 0x433   : > { %5371 = vmatprep.subr.bf16.mxu1 %v5721_v30  ;;  %5338 = vmatpush3.bf16.msra.mxu0 %v5720_v55  ;;  %v3303_v47 = vsel %vm585_vm1, %v3298_v15, %v3302_v43 }
 0x434   : > { %5339 = vmatprep.subr.bf16.mxu0 %v5722_v14 }
 0x435   : > { %5356 = vmatmul.mubr.msk.bf16.vlgmr.msra.gmra.mxu1 %vm1954_vm6, %v4864_v45 }
 0x436   : > { %5372 = vmatpush3.bf16.msra.mxu1 %v5721_v30  ;;  %5379 = vmatprep.mubr.msk.bf16.mxu1 %vm1954_vm6, %v3390_v49 }
 0x437   : > { %5373 = vmatprep.subr.bf16.mxu1 %v5723_v35  ;;  %5340 = vmatpush3.bf16.msra.mxu0 %v5722_v14 }
 0x438   : > { %5341 = vmatprep.subr.bf16.mxu0 %v5724_v7 }
 0x43a   : > { %5374 = vmatpush3.bf16.msra.mxu1 %v5723_v35 }
 0x43b   : > { %5375 = vmatprep.subr.bf16.mxu1 %v5725_v52  ;;  %5342 = vmatpush3.bf16.msra.mxu0 %v5724_v7 }
 0x43c   : > { %5359 = vmatprep.subr.bf16.mxu0 %v5726_v5 }
 0x43e   : > { %5376 = vmatpush3.bf16.msra.mxu1 %v5725_v52  ;;  %5344 = vmatmul.mubr.msk.bf16.vlgmr.msra.gmra.mxu0 %vm1954_vm6, %v7071_v61 }
 0x43f   : > { %5377 = vmatprep.subr.bf16.mxu1 %v5727_v31  ;;  %5360 = vmatpush3.bf16.msra.mxu0 %v5726_v5 }
 0x440   : > { %5367 = vmatprep.mubr.msk.bf16.mxu0 %vm1954_vm6, %v3303_v47  ;;  %5361 = vmatprep.subr.bf16.mxu0 %v5728_v63 }
 0x442   : > { %5378 = vmatpush3.bf16.msra.mxu1 %v5727_v31 }
 0x443   : > { %5395 = vmatprep.subr.bf16.mxu1 %v5732_v44  ;;  %5362 = vmatpush3.bf16.msra.mxu0 %v5728_v63 }
 0x444   : > { %5363 = vmatprep.subr.bf16.mxu0 %v5729_v23 }
 0x445   : > { %5380 = vmatmul.mubr.msk.bf16.vlgmr.msra.gmra.mxu1 %vm1954_vm6, %v3389_v22 }
 0x446   : > { %5403 = vmatprep.mubr.msk.bf16.mxu1 %vm1954_vm6, %v3556_v37  ;;  %5396 = vmatpush3.bf16.msra.mxu1 %v5732_v44 }
 0x447   : > { %5397 = vmatprep.subr.bf16.mxu1 %v5734_v50  ;;  %5364 = vmatpush3.bf16.msra.mxu0 %v5729_v23 }
 0x448   : > { %5365 = vmatprep.subr.bf16.mxu0 %v5730_v2 }
 0x44a   : > { %5398 = vmatpush3.bf16.msra.mxu1 %v5734_v50 }
 0x44b   : > { %5399 = vmatprep.subr.bf16.mxu1 %v5736_v20  ;;  %5366 = vmatpush3.bf16.msra.mxu0 %v5730_v2 }
 0x44c   : > { %5383 = vmatprep.subr.bf16.mxu0 %v5731_v17 }
 0x44e   : > { %5400 = vmatpush3.bf16.msra.mxu1 %v5736_v20  ;;  %5368 = vmatmul.mubr.msk.bf16.vlgmr.msra.gmra.mxu0 %vm1954_vm6, %v3306_v62 }
 0x44f   : > { %5401 = vmatprep.subr.bf16.mxu1 %v5738_v40  ;;  %5384 = vmatpush3.bf16.msra.mxu0 %v5731_v17 }
 0x450   : > { %5391 = vmatprep.mubr.msk.bf16.mxu0 %vm1954_vm6, %v7063_v8  ;;  %5385 = vmatprep.subr.bf16.mxu0 %v5733_v48  ;;  %v5746_v8 = vld [vmem:[%s7401_s12 + $0x8] sm:$0xff]  }
 0x452   : > { %5402 = vmatpush3.bf16.msra.mxu1 %v5738_v40 }
 0x453   : > { %5386 = vmatpush3.bf16.msra.mxu0 %v5733_v48  ;;  %5419 = vmatprep.subr.bf16.mxu1 %v5745_v41 }
 0x454   : > { %5387 = vmatprep.subr.bf16.mxu0 %v5735_v38 }
 0x455   : > { %5404 = vmatmul.mubr.msk.bf16.vlgmr.msra.gmra.mxu1 %vm1954_vm6, %v7166_v59 }
 0x456   : > { %5420 = vmatpush3.bf16.msra.mxu1 %v5745_v41 }
 0x457   : > { %5388 = vmatpush3.bf16.msra.mxu0 %v5735_v38  ;;  %5421 = vmatprep.subr.bf16.mxu1 %v5747_v4 }
 0x458   : > { %5389 = vmatprep.subr.bf16.mxu0 %v5737_v6 }
 0x45a   : > { %5422 = vmatpush3.bf16.msra.mxu1 %v5747_v4 }
 0x45b   : > { %5390 = vmatpush3.bf16.msra.mxu0 %v5737_v6  ;;  %5423 = vmatprep.subr.bf16.mxu1 %v5749_v1 }
 0x45c   : > { %5407 = vmatprep.subr.bf16.mxu0 %v5739_v19 }
 0x45e   : > { %5392 = vmatmul.mubr.msk.bf16.vlgmr.msra.gmra.mxu0 %vm1954_vm6, %v7120_v24  ;;  %5424 = vmatpush3.bf16.msra.mxu1 %v5749_v1 }
 0x45f   : > { %5408 = vmatpush3.bf16.msra.mxu0 %v5739_v19  ;;  %5415 = vmatprep.mubr.msk.bf16.mxu0 %vm1954_vm6, %v3642_v57 }
 0x460   : > { %5409 = vmatprep.subr.bf16.mxu0 %v5740_v13  ;;  %5425 = vmatprep.subr.bf16.mxu1 %v5751_v54 }
 0x462   : > { %5426 = vmatpush3.bf16.msra.mxu1 %v5751_v54  ;;  %v4904_v54 = vld [vmem:[%s7400_s11] ss:$0 sm:$0xff] }
 0x463   : > { %5410 = vmatpush3.bf16.msra.mxu0 %v5740_v13  ;;  %5443 = vmatprep.subr.bf16.mxu1 %v7232_v25 }
 0x464   : > { %5411 = vmatprep.subr.bf16.mxu0 %v5741_v10 }
 0x467   : > { %5412 = vmatpush3.bf16.msra.mxu0 %v5741_v10 }
 0x468   : > { %5413 = vmatprep.subr.bf16.mxu0 %v5742_v16 }
 0x46b   : > { %5414 = vmatpush3.bf16.msra.mxu0 %v5742_v16 }
 0x46c   : > { %5431 = vmatprep.subr.bf16.mxu0 %v5743_v32 }
 0x46e   : > { %5416 = vmatmul.mubr.msk.bf16.vlgmr.msra.gmra.mxu0 %vm1954_vm6, %v7180_v11 }
 0x46f   : > { %5432 = vmatpush3.bf16.msra.mxu0 %v5743_v32 }
 0x470   : > { %5433 = vmatprep.subr.bf16.mxu0 %v5744_v0 }
 0x473   : > { %5434 = vmatpush3.bf16.msra.mxu0 %v5744_v0  ;;  %v4903_v0 = vld [vmem:[%s7399_s10] ss:$0 sm:$0xff] }
 0x474   : > { %5435 = vmatprep.subr.bf16.mxu0 %v5746_v8 }
 0x477   : > { %5436 = vmatpush3.bf16.msra.mxu0 %v5746_v8 }
 0x478   : > { %5437 = vmatprep.subr.bf16.mxu0 %v5748_v60 }
 0x47b   : > { %5438 = vmatpush3.bf16.msra.mxu0 %v5748_v60 }
 0x47c   : > { %5455 = vmatprep.subr.bf16.mxu0 %v7223_v39 }
 0x4e5   : > { %v5333_v28 = vpop.f32.mrf.mxu1 }
 0x4e7   : > { %v3110_v61 = vpop.f32.mrf.mxu1 }
 0x4e9   : > { %v5334_v42 = vpop.f32.mrf.mxu1 }
 0x4eb   : > { %v3113_v26 = vpop.f32.mrf.mxu1 }
 0x4ee   : > { %v5321_v56 = vpop.f32.mrf.mxu0 }
 0x4ef   : > { %v3119_v63 = vadd.f32 %v5333_v28, %v5321_v56 }
 0x4f0   : > { %v3032_v12 = vpop.f32.mrf.mxu0 }
 0x4f1   : > { %v3111_v47 = vadd.f32 %v3110_v61, %v3032_v12 }
 0x4f2   : > { %v5322_v51 = vpop.f32.mrf.mxu0 }
 0x4f4   : > { %v3035_v14 = vpop.f32.mrf.mxu0 }
 0x4f5   : > { %v5357_v55 = vpop.f32.mrf.mxu1  ;;  %v3114_v2 = vadd.f32 %v3113_v26, %v3035_v14 }
 0x4f7   : > { %v3275_v53 = vpop.f32.mrf.mxu1 }
 0x4f9   : > { %v5358_v30 = vpop.f32.mrf.mxu1 }
 0x4fb   : > { %v3278_v46 = vpop.f32.mrf.mxu1 }
 0x4fe   : > { %v5345_v22 = vpop.f32.mrf.mxu0 }
 0x4ff   : > { %v3208_v44 = vadd.f32 %v5345_v22, %v3119_v63 }
 0x500   : > { %v3192_v45 = vpop.f32.mrf.mxu0 }
 0x501   : > { %v3206_v50 = vadd.f32 %v3192_v45, %v3111_v47  ;;  %v3291_v20 = vadd.f32 %v5357_v55, %v3208_v44 }
 0x502   : > { %v5346_v35 = vpop.f32.mrf.mxu0 }
 0x503   : > { %v3289_v62 = vadd.f32 %v3275_v53, %v3206_v50 }
 0x504   : > { %v3195_v52 = vpop.f32.mrf.mxu0 }
 0x505   : > { %v5381_v49 = vpop.f32.mrf.mxu1  ;;  %v3207_v3 = vadd.f32 %v3195_v52, %v3114_v2 }
 0x507   : > { %v3455_v7 = vpop.f32.mrf.mxu1  ;;  %v3290_v48 = vadd.f32 %v3278_v46, %v3207_v3 }
 0x509   : > { %v5382_v34 = vpop.f32.mrf.mxu1 }
 0x50b   : > { %v3458_v58 = vpop.f32.mrf.mxu1 }
 0x50e   : > { %v5369_v27 = vpop.f32.mrf.mxu0 }
 0x50f   : > { %v3387_v40 = vadd.f32 %v5369_v27, %v3291_v20 }
 0x510   : > { %v3371_v5 = vpop.f32.mrf.mxu0 }
 0x511   : > { %v3385_v9 = vadd.f32 %v3371_v5, %v3289_v62  ;;  %v3471_v38 = vadd.f32 %v5381_v49, %v3387_v40 }
 0x512   : > { %v5370_v29 = vpop.f32.mrf.mxu0 }
 0x513   : > { %v3469_v13 = vadd.f32 %v3455_v7, %v3385_v9 }
 0x514   : > { %v3374_v18 = vpop.f32.mrf.mxu0 }
 0x515   : > { %v5405_v43 = vpop.f32.mrf.mxu1  ;;  %v3386_v6 = vadd.f32 %v3374_v18, %v3290_v48 }
 0x517   : > { %v3624_v31 = vpop.f32.mrf.mxu1  ;;  %v3470_v32 = vadd.f32 %v3458_v58, %v3386_v6 }
 0x519   : > { %v5406_v15 = vpop.f32.mrf.mxu1 }
 0x51b   : > { %v3627_v1 = vpop.f32.mrf.mxu1 }
 0x51e   : > { %v5393_v23 = vpop.f32.mrf.mxu0 }
 0x51f   : > { %v3552_v19 = vadd.f32 %v5393_v23, %v3471_v38  ;;  %v5752_v38 = vld [vmem:[%s7401_s12 + $0x70] sm:$0xff]  }
 0x520   : > { %v3536_v37 = vpop.f32.mrf.mxu0 }
 0x521   : > { %v3550_v57 = vadd.f32 %v3536_v37, %v3469_v13  ;;  %v3640_v16 = vadd.f32 %v5405_v43, %v3552_v19 }
 0x522   : > { %v5394_v17 = vpop.f32.mrf.mxu0 }
 0x523   : > { %v3638_v8 = vadd.f32 %v3624_v31, %v3550_v57 }
 0x524   : > { %v3539_v10 = vpop.f32.mrf.mxu0 }
 0x525   : > { %v3551_v4 = vadd.f32 %v3539_v10, %v3470_v32  ;;  %v5754_v32 = vld [vmem:[%s7401_s12 + $0x68] sm:$0xff]  }
 0x527   : > { %v3639_v12 = vadd.f32 %v3627_v1, %v3551_v4  ;;  %v5757_v1 = vld [vmem:[%s7401_s12 + $0x48] sm:$0xff]  }
 0x52e   : > { %v5417_v41 = vpop.f32.mrf.mxu0 }
 0x52f   : > { %v3723_v60 = vadd.f32 %v5417_v41, %v3640_v16 }
 0x530   : > { %v3707_v28 = vpop.f32.mrf.mxu0 }
 0x531   : > { %v3732_v61 = vmul.f32 %v4903_v0, %v3723_v60  ;;  %v3721_v42 = vadd.f32 %v3707_v28, %v3638_v8  ;;  %v5756_v60 = vld [vmem:[%s7401_s12 + $0x60] sm:$0xff]  }
 0x532   : > { %v5418_v56 = vpop.f32.mrf.mxu0 }
 0x533   : > { %v3741_v26 = vadd.f32 %v4904_v54, %v3732_v61  ;;  %v3730_v51 = vmul.f32 %v4903_v0, %v3721_v42 }
 0x534   : > { %v3710_v55 = vpop.f32.mrf.mxu0 }
 0x535   : > { %v3744_v53 = vmax.f32 %v3741_v26, 0.0  ;;  %v3739_v30 = vadd.f32 %v4904_v54, %v3730_v51  ;;  %v3722_v14 = vadd.f32 %v3710_v55, %v3639_v12  ;;  %v5760_v26 = vld [vmem:[%s7401_s12 + $0xb0] sm:$0xff]   ;;  %v5761_v55 = vld [vmem:[%s7401_s12 + $0x98] sm:$0xff]  }
 0x537   : > { %v3747_v22 = vpack.c.bf16 %v3744_v53, %v3744_v53  ;;  %v3742_v45 = vmax.f32 %v3739_v30, 0.0  ;;  %v3731_v46 = vmul.f32 %v4903_v0, %v3722_v14 }
 0x539   : > { %v3763_v35 = vshrl.u32 %v3747_v22, 16  ;;  %v3745_v49 = vpack.c.bf16 %v3742_v45, %v3742_v45  ;;  %v3740_v7 = vadd.f32 %v4904_v54, %v3731_v46  ;;  %v3766_v5 = vshll.u32 %v3747_v22, 16  ;;  %v5758_v54 = vld [vmem:[%s7401_s12 + $0xb8] sm:$0xff]   ;;  %v5762_v22 = vld [vmem:[%s7401_s12 + $0xa8] sm:$0xff]   ;;  %v5763_v46 = vld [vmem:[%s7401_s12 + $0x90] sm:$0xff]  }
 0x53b   : > { %v3765_v34 = vrot.slane %v3763_v35, 7  ;;  %v3749_v52 = vshrl.u32 %v3745_v49, 16  ;;  %v3743_v27 = vmax.f32 %v3740_v7, 0.0  ;;  %v3752_v29 = vshll.u32 %v3745_v49, 16  ;;  %v5764_v49 = vld [vmem:[%s7401_s12 + $0xa0] sm:$0xff]   ;;  %v5765_v7 = vld [vmem:[%s7401_s12 + $0x88] sm:$0xff]  }
 0x53d   : > { %v3751_v58 = vrot.slane %v3749_v52, 7  ;;  %v3746_v43 = vpack.c.bf16 %v3743_v27, %v3743_v27  ;;  %v3768_v31 = vor.u32 %v3766_v5, %v3765_v34  ;;  %v5768_v34 = vld [vmem:[%s7401_s12 + $0xf8] sm:$0xff]   ;;  %v5766_v52 = vld [vmem:[%s7401_s12 + $0x80] sm:$0xff]   ;;  %v5770_v27 = vld [vmem:[%s7401_s12 + $0xf0] sm:$0xff]  }
 0x53f   : > { %v3754_v15 = vor.u32 %v3752_v29, %v3751_v58  ;;  %v3756_v63 = vshrl.u32 %v3746_v43, 16  ;;  %v3759_v47 = vshll.u32 %v3746_v43, 16  ;;  %v3774_v50 = vsel %vm7040_vm9, 0, %v3768_v31  ;;  %v5767_v58 = vld [vmem:[%s7401_s12 + $0xd8] sm:$0xff]   ;;  %v5772_v43 = vld [vmem:[%s7401_s12 + $0xe8] sm:$0xff]  }
 0x540   : > { %v3780_v3 = vsel %vm2861_vm10, %v3774_v50, 0  ;;  %v5778_v50 = vld [vmem:[%s7401_s12 + $0x100] sm:$0xff]  }
 0x541   : > { %v3758_v18 = vrot.slane %v3756_v63, 7  ;;  %v3772_v44 = vsel %vm7040_vm9, 0, %v3754_v15  ;;  %v4934_v28 = vcombine.low %v3780_v3, %v7438_v33  ;;  %v4927_v56 = vcombine.low %v3780_v3, %v3780_v3  ;;  %v5774_v15 = vld [vmem:[%s7401_s12 + $0xe0] sm:$0xff]   ;;  %v5771_v63 = vld [vmem:[%s7401_s12 + $0xc8] sm:$0xff]  }
 0x542   : > { %v3776_v23 = vsel %vm2861_vm10, %v3772_v44, 0  ;;  %v5776_v44 = vld [vmem:[%s7401_s12 + $0x110] sm:$0xff]  }
 0x543   : > { %v3761_v37 = vor.u32 %v3759_v47, %v3758_v18  ;;  %v4905_v2 = vcombine.low %v7438_v33, %v3776_v23  ;;  %v4298_v12 = vrot.slane %v4934_v28, 1  ;;  %v4209_v30 = vshll.u32 %v4934_v28, 16  ;;  %v5773_v18 = vld [vmem:[%s7401_s12 + $0xc0] sm:$0xff]   ;;  %v5775_v47 = vld [vmem:[%s7401_s12 + $0x118] sm:$0xff]  }
 0x544   : > { %v4213_v29 = vshrl.u32 %v4934_v28, 16 }
 0x545   : > { %v3773_v20 = vsel %vm7040_vm9, 0, %v3761_v37  ;;  %5439 = vmatprep.mubr.msk.bf16.mxu0 %vm1954_vm6, %v4905_v2  ;;  %v3866_v17 = vshll.u32 %v4905_v2, 16  ;;  %v3864_v21 = vshrl.u32 %v4905_v2, 16  ;;  %v4034_v8 = vrot.slane %v4905_v2, 1 }
 0x546   : > { %v3778_v40 = vsel %vm2861_vm10, %v3773_v20, 0  ;;  %v4211_v45 = vrot.slane %v4209_v30, 1 }
 0x547   : > { %v7252_v62 = vcombine.low %v3778_v40, %v3780_v3  ;;  %v4913_v9 = vcombine.low %v3778_v40, %v3778_v40  ;;  %v4926_v48 = vcombine.low %v3776_v23, %v3778_v40  ;;  %v3868_v6 = vrot.slane %v3866_v17, 1 }
 0x548   : > { %v4215_v31 = vor.u32 %v4213_v29, %v4211_v45 }
 0x549   : > { %5440 = vmatmul.mubr.msk.bf16.vlgmr.msra.gmra.mxu0 %vm1954_vm6, %v4913_v9  ;;  %v3871_v19 = vshll.u32 %v7252_v62, 16  ;;  %v3869_v13 = vor.u32 %v3868_v6, %v3864_v21  ;;  %v3875_v10 = vshrl.u32 %v7252_v62, 16  ;;  %v7263_v16 = vrot.slane %v7252_v62, 1 }
 0x54a   : > { %5456 = vmatpush3.bf16.msra.mxu0 %v7223_v39  ;;  %5463 = vmatprep.mubr.msk.bf16.mxu0 %vm1954_vm6, %v4926_v48  ;;  %v5755_v39 = vld [vmem:[%s7401_s12 + $0x50] sm:$0xff]   ;;  %v4204_v61 = vshll.u32 %v4926_v48, 16  ;;  %v4297_v42 = vrot.slane %v4926_v48, 1  ;;  %v4202_v53 = vshrl.u32 %v4926_v48, 16 }
 0x54b   : > { %5457 = vmatprep.subr.bf16.mxu0 %v5752_v38  ;;  %v3873_v57 = vrot.slane %v3871_v19, 1  ;;  %v4036_v4 = vsel %vm3124_vm11, %v4034_v8, %v7263_v16  ;;  %v4537_v23 = vsel %vm3124_vm11, %v7263_v16, %v7180_v11 }
 0x54c   : > { %v4206_v51 = vrot.slane %v4204_v61, 1  ;;  %v4299_v33 = vsel %vm3124_vm11, %v4297_v42, %v4298_v12 }
 0x54d   : > { %v3874_v0 = vsel %vm585_vm1, %v3869_v13, %v3873_v57  ;;  %v7269_v41 = vor.u32 %v3875_v10, %v3873_v57 }
 0x54e   : > { %5458 = vmatpush3.bf16.msra.mxu0 %v5752_v38  ;;  %5427 = vmatprep.mubr.msk.bf16.mxu1 %vm1954_vm6, %v3874_v0  ;;  %v4207_v14 = vor.u32 %v4206_v51, %v4202_v53 }
 0x54f   : > { %5428 = vmatmul.mubr.msk.bf16.vlgmr.msra.gmra.mxu1 %vm1954_vm6, %v7269_v41  ;;  %5459 = vmatprep.subr.bf16.mxu0 %v5754_v32  ;;  %v4458_v5 = vsel %vm585_vm1, %v7269_v41, %v7136_v36  ;;  %v5769_v36 = vld [vmem:[%s7401_s12 + $0xd0] sm:$0xff]  }
 0x550   : > { %5444 = vmatpush3.bf16.msra.mxu1 %v7232_v25  ;;  %5451 = vmatprep.mubr.msk.bf16.mxu1 %vm1954_vm6, %v4036_v4  ;;  %v5759_v25 = vld [vmem:[%s7401_s12 + $0x40] sm:$0xff]   ;;  %v4212_v35 = vsel %vm585_vm1, %v4207_v14, %v4211_v45 }
 0x551   : > { %5445 = vmatprep.subr.bf16.mxu1 %v5755_v39 }
 0x552   : > { %5460 = vmatpush3.bf16.msra.mxu0 %v5754_v32 }
 0x553   : > { %5461 = vmatprep.subr.bf16.mxu0 %v5756_v60 }
 0x554   : > { %5446 = vmatpush3.bf16.msra.mxu1 %v5755_v39 }
 0x555   : > { %5447 = vmatprep.subr.bf16.mxu1 %v5757_v1 }
 0x556   : > { %5462 = vmatpush3.bf16.msra.mxu0 %v5756_v60 }
 0x557   : > { %5479 = vmatprep.subr.bf16.mxu0 %v5758_v54 }
 0x558   : > { %5448 = vmatpush3.bf16.msra.mxu1 %v5757_v1 }
 0x559   : > { %5464 = vmatmul.mubr.msk.bf16.vlgmr.msra.gmra.mxu0 %vm1954_vm6, %v4927_v56  ;;  %5449 = vmatprep.subr.bf16.mxu1 %v5759_v25 }
 0x55a   : > { %5480 = vmatpush3.bf16.msra.mxu0 %v5758_v54  ;;  %5487 = vmatprep.mubr.msk.bf16.mxu0 %vm1954_vm6, %v4299_v33 }
 0x55b   : > { %5481 = vmatprep.subr.bf16.mxu0 %v5760_v26 }
 0x55c   : > { %5450 = vmatpush3.bf16.msra.mxu1 %v5759_v25 }
 0x55d   : > { %5467 = vmatprep.subr.bf16.mxu1 %v5761_v55 }
 0x55e   : > { %5482 = vmatpush3.bf16.msra.mxu0 %v5760_v26 }
 0x55f   : > { %5452 = vmatmul.mubr.msk.bf16.vlgmr.msra.gmra.mxu1 %vm1954_vm6, %v7263_v16  ;;  %5483 = vmatprep.subr.bf16.mxu0 %v5762_v22 }
 0x560   : > { %5468 = vmatpush3.bf16.msra.mxu1 %v5761_v55  ;;  %5475 = vmatprep.mubr.msk.bf16.mxu1 %vm1954_vm6, %v4212_v35 }
 0x561   : > { %5469 = vmatprep.subr.bf16.mxu1 %v5763_v46 }
 0x562   : > { %5484 = vmatpush3.bf16.msra.mxu0 %v5762_v22 }
 0x563   : > { %5485 = vmatprep.subr.bf16.mxu0 %v5764_v49 }
 0x564   : > { %5470 = vmatpush3.bf16.msra.mxu1 %v5763_v46 }
 0x565   : > { %5471 = vmatprep.subr.bf16.mxu1 %v5765_v7 }
 0x566   : > { %5486 = vmatpush3.bf16.msra.mxu0 %v5764_v49 }
 0x567   : > { %5503 = vmatprep.subr.bf16.mxu0 %v5768_v34 }
 0x568   : > { %5472 = vmatpush3.bf16.msra.mxu1 %v5765_v7 }
 0x569   : > { %5488 = vmatmul.mubr.msk.bf16.vlgmr.msra.gmra.mxu0 %vm1954_vm6, %v4298_v12  ;;  %5473 = vmatprep.subr.bf16.mxu1 %v5766_v52 }
 0x56a   : > { %5511 = vmatprep.mubr.msk.bf16.mxu0 %vm1954_vm6, %v4458_v5  ;;  %5504 = vmatpush3.bf16.msra.mxu0 %v5768_v34 }
 0x56b   : > { %5505 = vmatprep.subr.bf16.mxu0 %v5770_v27 }
 0x56c   : > { %5474 = vmatpush3.bf16.msra.mxu1 %v5766_v52 }
 0x56d   : > { %5491 = vmatprep.subr.bf16.mxu1 %v5767_v58 }
 0x56e   : > { %5506 = vmatpush3.bf16.msra.mxu0 %v5770_v27  ;;  %v4965_v27 = vld [vmem:[%s7402_s13] ss:$0 sm:$0xff] }
 0x56f   : > { %5476 = vmatmul.mubr.msk.bf16.vlgmr.msra.gmra.mxu1 %vm1954_vm6, %v4215_v31  ;;  %5507 = vmatprep.subr.bf16.mxu0 %v5772_v43 }
 0x570   : > { %5492 = vmatpush3.bf16.msra.mxu1 %v5767_v58  ;;  %5499 = vmatprep.mubr.msk.bf16.mxu1 %vm1954_vm6, %v7252_v62 }
 0x571   : > { %5493 = vmatprep.subr.bf16.mxu1 %v5769_v36 }
 0x572   : > { %5508 = vmatpush3.bf16.msra.mxu0 %v5772_v43 }
 0x573   : > { %5509 = vmatprep.subr.bf16.mxu0 %v5774_v15 }
 0x574   : > { %5494 = vmatpush3.bf16.msra.mxu1 %v5769_v36  ;;  %v4966_v36 = vld [vmem:[%s7403_s14] ss:$0 sm:$0xff] }
 0x575   : > { %5495 = vmatprep.subr.bf16.mxu1 %v5771_v63 }
 0x576   : > { %5510 = vmatpush3.bf16.msra.mxu0 %v5774_v15 }
 0x578   : > { %5496 = vmatpush3.bf16.msra.mxu1 %v5771_v63 }
 0x579   : > { %5497 = vmatprep.subr.bf16.mxu1 %v5773_v18  ;;  %5512 = vmatmul.mubr.msk.bf16.vlgmr.msra.gmra.mxu0 %vm1954_vm6, %v7166_v59  ;;  %v5777_v59 = vld [vmem:[%s7401_s12 + $0x108] sm:$0xff]  }
 0x57c   : > { %5498 = vmatpush3.bf16.msra.mxu1 %v5773_v18 }
 0x57d   : > { %5515 = vmatprep.subr.bf16.mxu1 %v5775_v47 }
 0x57f   : > { %5500 = vmatmul.mubr.msk.bf16.vlgmr.msra.gmra.mxu1 %vm1954_vm6, %v7120_v24 }
 0x580   : > { %5516 = vmatpush3.bf16.msra.mxu1 %v5775_v47  ;;  %5523 = vmatprep.mubr.msk.bf16.mxu1 %vm1954_vm6, %v4537_v23 }
 0x581   : > { %5517 = vmatprep.subr.bf16.mxu1 %v5776_v44 }
 0x584   : > { %5518 = vmatpush3.bf16.msra.mxu1 %v5776_v44 }
 0x585   : > { %5519 = vmatprep.subr.bf16.mxu1 %v5777_v59 }
 0x588   : > { %5520 = vmatpush3.bf16.msra.mxu1 %v5777_v59 }
 0x589   : > { %5521 = vmatprep.subr.bf16.mxu1 %v5778_v50 }
 0x58c   : > { %5522 = vmatpush3.bf16.msra.mxu1 %v5778_v50 }
 0x58f   : > { %5524 = vmatmul.mubr.msk.bf16.vlgmr.msra.gmra.mxu1 %vm1954_vm6, %v7180_v11 }
 0x609   : > { %v5441_v24 = vpop.f32.mrf.mxu0 }
 0x60b   : > { %v4020_v37 = vpop.f32.mrf.mxu0 }
 0x60d   : > { %v5442_v2 = vpop.f32.mrf.mxu0 }
 0x60f   : > { %v5429_v20 = vpop.f32.mrf.mxu1  ;;  %v4023_v40 = vpop.f32.mrf.mxu0 }
 0x610   : > { %v4029_v60 = vadd.f32 %v5441_v24, %v5429_v20 }
 0x611   : > { %v3942_v17 = vpop.f32.mrf.mxu1 }
 0x612   : > { %v4021_v28 = vadd.f32 %v4020_v37, %v3942_v17 }
 0x613   : > { %v5430_v3 = vpop.f32.mrf.mxu1 }
 0x615   : > { %v3945_v48 = vpop.f32.mrf.mxu1 }
 0x616   : > { %v4024_v12 = vadd.f32 %v4023_v40, %v3945_v48 }
 0x619   : > { %v5465_v62 = vpop.f32.mrf.mxu0 }
 0x61b   : > { %v4184_v9 = vpop.f32.mrf.mxu0 }
 0x61d   : > { %v5466_v38 = vpop.f32.mrf.mxu0 }
 0x61f   : > { %v5453_v6 = vpop.f32.mrf.mxu1  ;;  %v4187_v13 = vpop.f32.mrf.mxu0 }
 0x620   : > { %v4117_v61 = vadd.f32 %v5453_v6, %v4029_v60 }
 0x621   : > { %v4101_v21 = vpop.f32.mrf.mxu1 }
 0x622   : > { %v4115_v25 = vadd.f32 %v4101_v21, %v4021_v28  ;;  %v4200_v26 = vadd.f32 %v5465_v62, %v4117_v61 }
 0x623   : > { %v5454_v19 = vpop.f32.mrf.mxu1 }
 0x624   : > { %v4198_v53 = vadd.f32 %v4184_v9, %v4115_v25 }
 0x625   : > { %v4104_v16 = vpop.f32.mrf.mxu1 }
 0x626   : > { %v4116_v33 = vadd.f32 %v4104_v16, %v4024_v12 }
 0x628   : > { %v4199_v14 = vadd.f32 %v4187_v13, %v4116_v33 }
 0x629   : > { %v5489_v57 = vpop.f32.mrf.mxu0 }
 0x62b   : > { %v4364_v10 = vpop.f32.mrf.mxu0 }
 0x62d   : > { %v5490_v32 = vpop.f32.mrf.mxu0 }
 0x62f   : > { %v5477_v11 = vpop.f32.mrf.mxu1  ;;  %v4367_v8 = vpop.f32.mrf.mxu0 }
 0x630   : > { %v4296_v55 = vadd.f32 %v5477_v11, %v4200_v26 }
 0x631   : > { %v4280_v0 = vpop.f32.mrf.mxu1 }
 0x632   : > { %v4294_v30 = vadd.f32 %v4280_v0, %v4198_v53  ;;  %v4380_v22 = vadd.f32 %v5489_v57, %v4296_v55 }
 0x633   : > { %v5478_v41 = vpop.f32.mrf.mxu1 }
 0x634   : > { %v4378_v35 = vadd.f32 %v4364_v10, %v4294_v30 }
 0x635   : > { %v4283_v1 = vpop.f32.mrf.mxu1 }
 0x636   : > { %v4295_v45 = vadd.f32 %v4283_v1, %v4199_v14 }
 0x638   : > { %v4379_v52 = vadd.f32 %v4367_v8, %v4295_v45 }
 0x639   : > { %v5513_v39 = vpop.f32.mrf.mxu0 }
 0x63b   : > { %v4520_v4 = vpop.f32.mrf.mxu0 }
 0x63d   : > { %v5514_v54 = vpop.f32.mrf.mxu0 }
 0x63f   : > { %v5501_v42 = vpop.f32.mrf.mxu1  ;;  %v4523_v31 = vpop.f32.mrf.mxu0 }
 0x640   : > { %v4457_v46 = vadd.f32 %v5501_v42, %v4380_v22 }
 0x641   : > { %v4441_v56 = vpop.f32.mrf.mxu1 }
 0x642   : > { %v4455_v49 = vadd.f32 %v4441_v56, %v4378_v35  ;;  %v4536_v34 = vadd.f32 %v5513_v39, %v4457_v46 }
 0x643   : > { %v5502_v51 = vpop.f32.mrf.mxu1 }
 0x644   : > { %v4534_v58 = vadd.f32 %v4520_v4, %v4455_v49 }
 0x645   : > { %v4444_v7 = vpop.f32.mrf.mxu1 }
 0x646   : > { %v4456_v29 = vadd.f32 %v4444_v7, %v4379_v52 }
 0x648   : > { %v4535_v44 = vadd.f32 %v4523_v31, %v4456_v29 }
 0x64f   : > { %v5525_v5 = vpop.f32.mrf.mxu1 }
 0x650   : > { %v4615_v43 = vadd.f32 %v5525_v5, %v4536_v34 }
 0x651   : > { %v4599_v15 = vpop.f32.mrf.mxu1 }
 0x652   : > { %v4624_v63 = vmul.f32 %v4965_v27, %v4615_v43  ;;  %v4613_v18 = vadd.f32 %v4599_v15, %v4534_v58 }
 0x653   : > { %v5526_v47 = vpop.f32.mrf.mxu1 }
 0x654   : > { %v4633_v23 = vadd.f32 %v4966_v36, %v4624_v63  ;;  %v4622_v59 = vmul.f32 %v4965_v27, %v4613_v18 }
 0x655   : > { %v4602_v50 = vpop.f32.mrf.mxu1 }
 0x656   : > { %v4636_v24 = vmax.f32 %v4633_v23, 0.0  ;;  %v4631_v37 = vadd.f32 %v4966_v36, %v4622_v59  ;;  %v4614_v2 = vadd.f32 %v4602_v50, %v4535_v44 }
 0x658   : > { %4640 = vst.msk [vmem:[%s494_s30 + $0x8] sm:$0x7] %vm4637_vm12, %v4636_v24  ;;  %v4634_v20 = vmax.f32 %v4631_v37, 0.0  ;;  %v4623_v17 = vmul.f32 %v4965_v27, %v4614_v2 }
 0x65a   : > { %4638 = vst.msk [vmem:[%s494_s30] sm:$0x7] %vm4637_vm12, %v4634_v20  ;;  %v4632_v3 = vadd.f32 %v4966_v36, %v4623_v17 }
 0x65c   : > { %v4635_v40 = vmax.f32 %v4632_v3, 0.0 }
 0x65e   : > { %4639 = vst.msk [vmem:[%s494_s30 + $0x4] sm:$0x7] %vm4637_vm12, %v4635_v40 }
 0x65f PF: > { %s25_s18 = sadd.s32 1, %s5785_s18  }
 0x660   : > { %p22_p4 = scmp.ge.s32.totalorder %s25_s18, 4  }
 0x662   :  { %24 = sbr.rel (!%p22_p4) target bundleno = 1 (0x1), region = 110 }

</bundles_post_ra>
